<compile_context>
chip_gen: v7x
topology: tpu7x:2x2x1
jax: 0.10.0
libtpu: 0.0.40
codegen_flags: <defaults>
</compile_context>

<pallas_src>
import jax
import jax.numpy as jnp
from jax.experimental import pallas as pl
from jax.experimental.pallas import tpu as pltpu


IN_F = 6
DIMS = [(6, 24), (24, 18), (18, 12), (12, 1)]   # (fan_in, fan_out) per layer
CHUNK_B = 512     # lane-chunk per inner-loop step (keeps activations in vregs)
TILE_B = 2048     # batch columns per grid step (multiple of CHUNK_B)


def _default_compute_dtype():
    """bf16 MAC chain only on chips with a bf16 VALU (v6e / v7x); f32 elsewhere."""
    try:
        kind = jax.devices()[0].device_kind.lower()
    except Exception:
        return jnp.float32
    if "v6" in kind or "v7" in kind:
        return jnp.bfloat16
    return jnp.float32


def _linear_vpu(h, w, b):
    """y = W @ h + b, unrolled into column-broadcast MACs on the VPU.

    h: (in_f, n)  activations (batch on lanes), compute dtype
    w: (out_f, in_f) weight, same dtype as h
    b: (out_f, 1) f32 bias column
    returns f32 (out_f, n)
    """
    out_f, in_f = w.shape
    acc = w[:, 0:1] * h[0:1, :]
    for k in range(1, in_f):                       # static unroll, in_f <= 24
        acc = acc + w[:, k:k + 1] * h[k:k + 1, :]
    return acc.astype(jnp.float32) + b


def _sigmoid(x):
    """sigmoid(x) = 1 / (1 + exp(-x)); exp and the reciprocal ride the EUP."""
    return pl.reciprocal(1.0 + jnp.exp(-x), approx=False)


def make_mlp_kernel(compute_dtype):
    def mlp_kernel(x_ref,
                   w1_ref, b1_ref,
                   w2_ref, b2_ref,
                   w3_ref, b3_ref,
                   w4_ref, b4_ref,
                   o_ref):
        # Tiny weights: load once per grid step, reuse across all chunks.
        w1 = w1_ref[...]; b1 = b1_ref[...]
        w2 = w2_ref[...]; b2 = b2_ref[...]
        w3 = w3_ref[...]; b3 = b3_ref[...]
        w4 = w4_ref[...]; b4 = b4_ref[...]        # w4 is a (12, 1) f32 column

        num_chunks = x_ref.shape[0]

        # Inner chunk loop bounds live activation ranges (~36 vregs) while the
        # grid tile stays large enough to amortize per-step pipeline overhead.
        @pl.loop(0, num_chunks, unroll=True)
        def _(c):
            x = x_ref[c].astype(compute_dtype)                      # (6, CHUNK_B)
            h1 = _sigmoid(_linear_vpu(x, w1, b1)).astype(compute_dtype)   # 24 rows
            h2 = _sigmoid(_linear_vpu(h1, w2, b2)).astype(compute_dtype)  # 18 rows
            h3 = jnp.maximum(_linear_vpu(h2, w3, b3), 0.0)          # f32 (12, n)
            # Layer 4 (12 -> 1): elementwise mul + sublane reduce (XLU) instead
            # of broadcasting into a mostly-empty (1, n) accumulator.
            h4 = jnp.sum(h3 * w4, axis=0, keepdims=True) + b4       # (1, CHUNK_B)
            o_ref[c] = h4.astype(o_ref.dtype)

    return mlp_kernel


def mlp_forward(x, params, *, tile_b=TILE_B, chunk_b=CHUNK_B,
                compute_dtype=None):
    """x: (B, 6) float. params: PyTorch-layout weights. Returns (B, 1) f32."""
    if compute_dtype is None:
        compute_dtype = _default_compute_dtype()
    assert tile_b % chunk_b == 0 and chunk_b % 128 == 0

    B = x.shape[0]
    b_chunks = pl.cdiv(B, chunk_b)                      # chunks covering B
    chunks_per_tile = max(1, min(tile_b // chunk_b, b_chunks))
    num_tiles = pl.cdiv(b_chunks, chunks_per_tile)      # >= 2 for large B (megacore)
    total_chunks = num_tiles * chunks_per_tile
    b_pad = total_chunks * chunk_b

    # Lane-dense layout: (chunk, features, chunk_b); each grid step gets a
    # contiguous slab and the inner loop indexes chunks on the leading axis.
    x_t = jnp.pad(x.astype(jnp.float32).T, ((0, 0), (0, b_pad - B)))
    x_c = x_t.reshape(IN_F, total_chunks, chunk_b).transpose(1, 0, 2)

    cdt = compute_dtype
    param_ops = (
        params["w1"].astype(cdt), params["b1"].astype(jnp.float32),
        params["w2"].astype(cdt), params["b2"].astype(jnp.float32),
        params["w3"].astype(cdt), params["b3"].astype(jnp.float32),
        # Layer-4 weight as a (12, 1) f32 column for the XLU-reduce path.
        params["w4"].astype(jnp.float32).reshape(DIMS[3][0], 1),
        params["b4"].astype(jnp.float32),
    )

    in_specs = [pl.BlockSpec((chunks_per_tile, IN_F, chunk_b),
                             lambda i: (i, 0, 0))]
    for op in param_ops:
        # Full-array block, constant index; default-arg capture avoids the
        # late-binding-lambda bug.
        in_specs.append(pl.BlockSpec(op.shape, lambda i, nd=op.ndim: (0,) * nd))

    out_spec = pl.BlockSpec((chunks_per_tile, 1, chunk_b), lambda i: (i, 0, 0))

    n_param_bytes = sum(int(w.size) * w.dtype.itemsize for w in param_ops)
    flops_per_sample = 2 * sum(fi * fo for fi, fo in DIMS)
    cost = pl.CostEstimate(
        flops=flops_per_sample * b_pad,
        transcendentals=(DIMS[0][1] + DIMS[1][1]) * b_pad,       # sigmoids
        bytes_accessed=4 * (IN_F + 1) * b_pad + n_param_bytes,
    )

    out = pl.pallas_call(
        make_mlp_kernel(cdt),
        out_shape=jax.ShapeDtypeStruct((total_chunks, 1, chunk_b), jnp.float32),
        grid=(num_tiles,),
        in_specs=in_specs,
        out_specs=out_spec,
        compiler_params=pltpu.CompilerParams(
            dimension_semantics=("parallel",)),
        cost_estimate=cost,
    )(x_c, *param_ops)

    # (total_chunks, 1, chunk_b) flattens in batch order; drop padding columns.
    return out.reshape(b_pad, 1)[:B]


def init_params(key):
    """Deterministic PyTorch-like uniform fan-in init.

    Weights are stored PyTorch-style: w_k has shape (out_features, in_features),
    biases as (out_features, 1) columns (kernel computes y = W @ x + b).
    """
    params = {}
    keys = jax.random.split(key, 2 * len(DIMS))
    for i, (fan_in, fan_out) in enumerate(DIMS):
        bound = 1.0 / jnp.sqrt(float(fan_in))
        w = jax.random.uniform(keys[2 * i], (fan_out, fan_in),
                               minval=-bound, maxval=bound, dtype=jnp.float32)
        b = jax.random.uniform(keys[2 * i + 1], (fan_out, 1),
                               minval=-bound, maxval=bound, dtype=jnp.float32)
        params[f"w{i + 1}"] = w
        params[f"b{i + 1}"] = b
    return params


def reference_forward(x, params):
    """Pure-JAX reference matching the PyTorch forward semantics."""
    h = jax.nn.sigmoid(x @ params["w1"].T + params["b1"][:, 0])
    h = jax.nn.sigmoid(h @ params["w2"].T + params["b2"][:, 0])
    h = jnp.maximum(h @ params["w3"].T + params["b3"][:, 0], 0.0)
    return h @ params["w4"].T + params["b4"][:, 0]


if __name__ == "__main__":
    key = jax.random.PRNGKey(0)
    k_param, k_x = jax.random.split(key)

    params = init_params(k_param)
    x = jax.random.normal(k_x, (8, IN_F), dtype=jnp.float32)   # batch=8, features=6

    cdt = _default_compute_dtype()
    out = jax.block_until_ready(mlp_forward(x, params, compute_dtype=cdt))

    ref = reference_forward(x, params)
    assert out.shape == (8, 1)
    # bf16 MAC chain (v6e/v7x) loosens the tolerance; f32 path stays at 1e-5.
    tol = 5e-2 if jnp.dtype(cdt) == jnp.dtype(jnp.bfloat16) else 1e-5
    assert jnp.allclose(out, ref, atol=tol, rtol=tol), "mismatch vs reference"

    print("KERNEL_OK")
</pallas_src>

<mosaic_0001>
module attributes {stable_mosaic.version = 11 : i64} {
  func.func @mlp_kernel(%arg0: i32, %arg1: memref<1x6x512xf32, #tpu.memory_space<vmem>>, %arg2: memref<24x6xf32, #tpu.memory_space<vmem>>, %arg3: memref<24x1xf32, #tpu.memory_space<vmem>>, %arg4: memref<18x24xf32, #tpu.memory_space<vmem>>, %arg5: memref<18x1xf32, #tpu.memory_space<vmem>>, %arg6: memref<12x18xf32, #tpu.memory_space<vmem>>, %arg7: memref<12x1xf32, #tpu.memory_space<vmem>>, %arg8: memref<12x1xf32, #tpu.memory_space<vmem>>, %arg9: memref<1x1xf32, #tpu.memory_space<vmem>>, %arg10: memref<1x1x512xf32, #tpu.memory_space<vmem>>) attributes {dimension_semantics = [#tpu.dimension_semantics<parallel>], iteration_bounds = array<i64: 1>, scalar_prefetch = 0 : i64, scratch_operands = 0 : i64, tpu.core_type = #tpu.core_type<tc>, window_params = [{transform_indices = @transform_0, window_bounds = array<i64: 1, 6, 512>}, {pipeline_mode = #tpu.pipeline_mode<synchronous>, transform_indices = @transform_1, window_bounds = array<i64: 24, 6>}, {pipeline_mode = #tpu.pipeline_mode<synchronous>, transform_indices = @transform_2, window_bounds = array<i64: 24, 1>}, {pipeline_mode = #tpu.pipeline_mode<synchronous>, transform_indices = @transform_3, window_bounds = array<i64: 18, 24>}, {pipeline_mode = #tpu.pipeline_mode<synchronous>, transform_indices = @transform_4, window_bounds = array<i64: 18, 1>}, {pipeline_mode = #tpu.pipeline_mode<synchronous>, transform_indices = @transform_5, window_bounds = array<i64: 12, 18>}, {pipeline_mode = #tpu.pipeline_mode<synchronous>, transform_indices = @transform_6, window_bounds = array<i64: 12, 1>}, {pipeline_mode = #tpu.pipeline_mode<synchronous>, transform_indices = @transform_7, window_bounds = array<i64: 12, 1>}, {pipeline_mode = #tpu.pipeline_mode<synchronous>, transform_indices = @transform_8, window_bounds = array<i64: 1, 1>}, {transform_indices = @transform_9, window_bounds = array<i64: 1, 1, 512>}]} {
    %c0 = arith.constant 0 : index
    %c0_0 = arith.constant 0 : index
    %0 = vector.load %arg2[%c0, %c0_0] : memref<24x6xf32, #tpu.memory_space<vmem>>, vector<24x6xf32>
    %c0_1 = arith.constant 0 : index
    %c0_2 = arith.constant 0 : index
    %1 = vector.load %arg3[%c0_1, %c0_2] : memref<24x1xf32, #tpu.memory_space<vmem>>, vector<24x1xf32>
    %c0_3 = arith.constant 0 : index
    %c0_4 = arith.constant 0 : index
    %2 = vector.load %arg4[%c0_3, %c0_4] : memref<18x24xf32, #tpu.memory_space<vmem>>, vector<18x24xf32>
    %c0_5 = arith.constant 0 : index
    %c0_6 = arith.constant 0 : index
    %3 = vector.load %arg5[%c0_5, %c0_6] : memref<18x1xf32, #tpu.memory_space<vmem>>, vector<18x1xf32>
    %c0_7 = arith.constant 0 : index
    %c0_8 = arith.constant 0 : index
    %4 = vector.load %arg6[%c0_7, %c0_8] : memref<12x18xf32, #tpu.memory_space<vmem>>, vector<12x18xf32>
    %c0_9 = arith.constant 0 : index
    %c0_10 = arith.constant 0 : index
    %5 = vector.load %arg7[%c0_9, %c0_10] : memref<12x1xf32, #tpu.memory_space<vmem>>, vector<12x1xf32>
    %c0_11 = arith.constant 0 : index
    %c0_12 = arith.constant 0 : index
    %6 = vector.load %arg8[%c0_11, %c0_12] : memref<12x1xf32, #tpu.memory_space<vmem>>, vector<12x1xf32>
    %c0_13 = arith.constant 0 : index
    %c0_14 = arith.constant 0 : index
    %7 = vector.load %arg9[%c0_13, %c0_14] : memref<1x1xf32, #tpu.memory_space<vmem>>, vector<1x1xf32>
    %c0_i32 = arith.constant 0 : i32
    %c1_i32 = arith.constant 1 : i32
    %8 = arith.muli %c0_i32, %c1_i32 : i32
    %c0_i32_15 = arith.constant 0 : i32
    %9 = arith.addi %c0_i32_15, %8 : i32
    %10 = arith.index_cast %9 : i32 to index
    %c0_16 = arith.constant 0 : index
    %c0_17 = arith.constant 0 : index
    %11 = vector.load %arg1[%10, %c0_16, %c0_17] : memref<1x6x512xf32, #tpu.memory_space<vmem>>, vector<1x6x512xf32>
    %12 = vector.shape_cast %11 : vector<1x6x512xf32> to vector<6x512xf32>
    %13 = vector.extract_strided_slice %0 {offsets = [0, 0], sizes = [24, 1], strides = [1, 1]} : vector<24x6xf32> to vector<24x1xf32>
    %14 = vector.extract_strided_slice %12 {offsets = [0, 0], sizes = [1, 512], strides = [1, 1]} : vector<6x512xf32> to vector<1x512xf32>
    %15 = vector.broadcast %13 : vector<24x1xf32> to vector<24x512xf32>
    %16 = vector.broadcast %14 : vector<1x512xf32> to vector<24x512xf32>
    %17 = arith.mulf %15, %16 : vector<24x512xf32>
    %18 = vector.extract_strided_slice %0 {offsets = [0, 1], sizes = [24, 1], strides = [1, 1]} : vector<24x6xf32> to vector<24x1xf32>
    %19 = vector.extract_strided_slice %12 {offsets = [1, 0], sizes = [1, 512], strides = [1, 1]} : vector<6x512xf32> to vector<1x512xf32>
    %20 = vector.broadcast %18 : vector<24x1xf32> to vector<24x512xf32>
    %21 = vector.broadcast %19 : vector<1x512xf32> to vector<24x512xf32>
    %22 = arith.mulf %20, %21 : vector<24x512xf32>
    %23 = arith.addf %17, %22 : vector<24x512xf32>
    %24 = vector.extract_strided_slice %0 {offsets = [0, 2], sizes = [24, 1], strides = [1, 1]} : vector<24x6xf32> to vector<24x1xf32>
    %25 = vector.extract_strided_slice %12 {offsets = [2, 0], sizes = [1, 512], strides = [1, 1]} : vector<6x512xf32> to vector<1x512xf32>
    %26 = vector.broadcast %24 : vector<24x1xf32> to vector<24x512xf32>
    %27 = vector.broadcast %25 : vector<1x512xf32> to vector<24x512xf32>
    %28 = arith.mulf %26, %27 : vector<24x512xf32>
    %29 = arith.addf %23, %28 : vector<24x512xf32>
    %30 = vector.extract_strided_slice %0 {offsets = [0, 3], sizes = [24, 1], strides = [1, 1]} : vector<24x6xf32> to vector<24x1xf32>
    %31 = vector.extract_strided_slice %12 {offsets = [3, 0], sizes = [1, 512], strides = [1, 1]} : vector<6x512xf32> to vector<1x512xf32>
    %32 = vector.broadcast %30 : vector<24x1xf32> to vector<24x512xf32>
    %33 = vector.broadcast %31 : vector<1x512xf32> to vector<24x512xf32>
    %34 = arith.mulf %32, %33 : vector<24x512xf32>
    %35 = arith.addf %29, %34 : vector<24x512xf32>
    %36 = vector.extract_strided_slice %0 {offsets = [0, 4], sizes = [24, 1], strides = [1, 1]} : vector<24x6xf32> to vector<24x1xf32>
    %37 = vector.extract_strided_slice %12 {offsets = [4, 0], sizes = [1, 512], strides = [1, 1]} : vector<6x512xf32> to vector<1x512xf32>
    %38 = vector.broadcast %36 : vector<24x1xf32> to vector<24x512xf32>
    %39 = vector.broadcast %37 : vector<1x512xf32> to vector<24x512xf32>
    %40 = arith.mulf %38, %39 : vector<24x512xf32>
    %41 = arith.addf %35, %40 : vector<24x512xf32>
    %42 = vector.extract_strided_slice %0 {offsets = [0, 5], sizes = [24, 1], strides = [1, 1]} : vector<24x6xf32> to vector<24x1xf32>
    %43 = vector.extract_strided_slice %12 {offsets = [5, 0], sizes = [1, 512], strides = [1, 1]} : vector<6x512xf32> to vector<1x512xf32>
    %44 = vector.broadcast %42 : vector<24x1xf32> to vector<24x512xf32>
    %45 = vector.broadcast %43 : vector<1x512xf32> to vector<24x512xf32>
    %46 = arith.mulf %44, %45 : vector<24x512xf32>
    %47 = arith.addf %41, %46 : vector<24x512xf32>
    %48 = vector.broadcast %1 : vector<24x1xf32> to vector<24x512xf32>
    %49 = arith.addf %47, %48 : vector<24x512xf32>
    %cst = arith.constant 0.000000e+00 : f32
    %50 = vector.broadcast %cst : f32 to vector<24x512xf32>
    %51 = arith.subf %50, %49 : vector<24x512xf32>
    %52 = math.exp %51 : vector<24x512xf32>
    %cst_18 = arith.constant 1.000000e+00 : f32
    %53 = vector.broadcast %cst_18 : f32 to vector<24x512xf32>
    %54 = arith.addf %53, %52 : vector<24x512xf32>
    %55 = tpu.reciprocal %54 : vector<24x512xf32> -> vector<24x512xf32>
    %56 = vector.extract_strided_slice %2 {offsets = [0, 0], sizes = [18, 1], strides = [1, 1]} : vector<18x24xf32> to vector<18x1xf32>
    %57 = vector.extract_strided_slice %55 {offsets = [0, 0], sizes = [1, 512], strides = [1, 1]} : vector<24x512xf32> to vector<1x512xf32>
    %58 = vector.broadcast %56 : vector<18x1xf32> to vector<18x512xf32>
    %59 = vector.broadcast %57 : vector<1x512xf32> to vector<18x512xf32>
    %60 = arith.mulf %58, %59 : vector<18x512xf32>
    %61 = vector.extract_strided_slice %2 {offsets = [0, 1], sizes = [18, 1], strides = [1, 1]} : vector<18x24xf32> to vector<18x1xf32>
    %62 = vector.extract_strided_slice %55 {offsets = [1, 0], sizes = [1, 512], strides = [1, 1]} : vector<24x512xf32> to vector<1x512xf32>
    %63 = vector.broadcast %61 : vector<18x1xf32> to vector<18x512xf32>
    %64 = vector.broadcast %62 : vector<1x512xf32> to vector<18x512xf32>
    %65 = arith.mulf %63, %64 : vector<18x512xf32>
    %66 = arith.addf %60, %65 : vector<18x512xf32>
    %67 = vector.extract_strided_slice %2 {offsets = [0, 2], sizes = [18, 1], strides = [1, 1]} : vector<18x24xf32> to vector<18x1xf32>
    %68 = vector.extract_strided_slice %55 {offsets = [2, 0], sizes = [1, 512], strides = [1, 1]} : vector<24x512xf32> to vector<1x512xf32>
    %69 = vector.broadcast %67 : vector<18x1xf32> to vector<18x512xf32>
    %70 = vector.broadcast %68 : vector<1x512xf32> to vector<18x512xf32>
    %71 = arith.mulf %69, %70 : vector<18x512xf32>
    %72 = arith.addf %66, %71 : vector<18x512xf32>
    %73 = vector.extract_strided_slice %2 {offsets = [0, 3], sizes = [18, 1], strides = [1, 1]} : vector<18x24xf32> to vector<18x1xf32>
    %74 = vector.extract_strided_slice %55 {offsets = [3, 0], sizes = [1, 512], strides = [1, 1]} : vector<24x512xf32> to vector<1x512xf32>
    %75 = vector.broadcast %73 : vector<18x1xf32> to vector<18x512xf32>
    %76 = vector.broadcast %74 : vector<1x512xf32> to vector<18x512xf32>
    %77 = arith.mulf %75, %76 : vector<18x512xf32>
    %78 = arith.addf %72, %77 : vector<18x512xf32>
    %79 = vector.extract_strided_slice %2 {offsets = [0, 4], sizes = [18, 1], strides = [1, 1]} : vector<18x24xf32> to vector<18x1xf32>
    %80 = vector.extract_strided_slice %55 {offsets = [4, 0], sizes = [1, 512], strides = [1, 1]} : vector<24x512xf32> to vector<1x512xf32>
    %81 = vector.broadcast %79 : vector<18x1xf32> to vector<18x512xf32>
    %82 = vector.broadcast %80 : vector<1x512xf32> to vector<18x512xf32>
    %83 = arith.mulf %81, %82 : vector<18x512xf32>
    %84 = arith.addf %78, %83 : vector<18x512xf32>
    %85 = vector.extract_strided_slice %2 {offsets = [0, 5], sizes = [18, 1], strides = [1, 1]} : vector<18x24xf32> to vector<18x1xf32>
    %86 = vector.extract_strided_slice %55 {offsets = [5, 0], sizes = [1, 512], strides = [1, 1]} : vector<24x512xf32> to vector<1x512xf32>
    %87 = vector.broadcast %85 : vector<18x1xf32> to vector<18x512xf32>
    %88 = vector.broadcast %86 : vector<1x512xf32> to vector<18x512xf32>
    %89 = arith.mulf %87, %88 : vector<18x512xf32>
    %90 = arith.addf %84, %89 : vector<18x512xf32>
    %91 = vector.extract_strided_slice %2 {offsets = [0, 6], sizes = [18, 1], strides = [1, 1]} : vector<18x24xf32> to vector<18x1xf32>
    %92 = vector.extract_strided_slice %55 {offsets = [6, 0], sizes = [1, 512], strides = [1, 1]} : vector<24x512xf32> to vector<1x512xf32>
    %93 = vector.broadcast %91 : vector<18x1xf32> to vector<18x512xf32>
    %94 = vector.broadcast %92 : vector<1x512xf32> to vector<18x512xf32>
    %95 = arith.mulf %93, %94 : vector<18x512xf32>
    %96 = arith.addf %90, %95 : vector<18x512xf32>
    %97 = vector.extract_strided_slice %2 {offsets = [0, 7], sizes = [18, 1], strides = [1, 1]} : vector<18x24xf32> to vector<18x1xf32>
    %98 = vector.extract_strided_slice %55 {offsets = [7, 0], sizes = [1, 512], strides = [1, 1]} : vector<24x512xf32> to vector<1x512xf32>
    %99 = vector.broadcast %97 : vector<18x1xf32> to vector<18x512xf32>
    %100 = vector.broadcast %98 : vector<1x512xf32> to vector<18x512xf32>
    %101 = arith.mulf %99, %100 : vector<18x512xf32>
    %102 = arith.addf %96, %101 : vector<18x512xf32>
    %103 = vector.extract_strided_slice %2 {offsets = [0, 8], sizes = [18, 1], strides = [1, 1]} : vector<18x24xf32> to vector<18x1xf32>
    %104 = vector.extract_strided_slice %55 {offsets = [8, 0], sizes = [1, 512], strides = [1, 1]} : vector<24x512xf32> to vector<1x512xf32>
    %105 = vector.broadcast %103 : vector<18x1xf32> to vector<18x512xf32>
    %106 = vector.broadcast %104 : vector<1x512xf32> to vector<18x512xf32>
    %107 = arith.mulf %105, %106 : vector<18x512xf32>
    %108 = arith.addf %102, %107 : vector<18x512xf32>
    %109 = vector.extract_strided_slice %2 {offsets = [0, 9], sizes = [18, 1], strides = [1, 1]} : vector<18x24xf32> to vector<18x1xf32>
    %110 = vector.extract_strided_slice %55 {offsets = [9, 0], sizes = [1, 512], strides = [1, 1]} : vector<24x512xf32> to vector<1x512xf32>
    %111 = vector.broadcast %109 : vector<18x1xf32> to vector<18x512xf32>
    %112 = vector.broadcast %110 : vector<1x512xf32> to vector<18x512xf32>
    %113 = arith.mulf %111, %112 : vector<18x512xf32>
    %114 = arith.addf %108, %113 : vector<18x512xf32>
    %115 = vector.extract_strided_slice %2 {offsets = [0, 10], sizes = [18, 1], strides = [1, 1]} : vector<18x24xf32> to vector<18x1xf32>
    %116 = vector.extract_strided_slice %55 {offsets = [10, 0], sizes = [1, 512], strides = [1, 1]} : vector<24x512xf32> to vector<1x512xf32>
    %117 = vector.broadcast %115 : vector<18x1xf32> to vector<18x512xf32>
    %118 = vector.broadcast %116 : vector<1x512xf32> to vector<18x512xf32>
    %119 = arith.mulf %117, %118 : vector<18x512xf32>
    %120 = arith.addf %114, %119 : vector<18x512xf32>
    %121 = vector.extract_strided_slice %2 {offsets = [0, 11], sizes = [18, 1], strides = [1, 1]} : vector<18x24xf32> to vector<18x1xf32>
    %122 = vector.extract_strided_slice %55 {offsets = [11, 0], sizes = [1, 512], strides = [1, 1]} : vector<24x512xf32> to vector<1x512xf32>
    %123 = vector.broadcast %121 : vector<18x1xf32> to vector<18x512xf32>
    %124 = vector.broadcast %122 : vector<1x512xf32> to vector<18x512xf32>
    %125 = arith.mulf %123, %124 : vector<18x512xf32>
    %126 = arith.addf %120, %125 : vector<18x512xf32>
    %127 = vector.extract_strided_slice %2 {offsets = [0, 12], sizes = [18, 1], strides = [1, 1]} : vector<18x24xf32> to vector<18x1xf32>
    %128 = vector.extract_strided_slice %55 {offsets = [12, 0], sizes = [1, 512], strides = [1, 1]} : vector<24x512xf32> to vector<1x512xf32>
    %129 = vector.broadcast %127 : vector<18x1xf32> to vector<18x512xf32>
    %130 = vector.broadcast %128 : vector<1x512xf32> to vector<18x512xf32>
    %131 = arith.mulf %129, %130 : vector<18x512xf32>
    %132 = arith.addf %126, %131 : vector<18x512xf32>
    %133 = vector.extract_strided_slice %2 {offsets = [0, 13], sizes = [18, 1], strides = [1, 1]} : vector<18x24xf32> to vector<18x1xf32>
    %134 = vector.extract_strided_slice %55 {offsets = [13, 0], sizes = [1, 512], strides = [1, 1]} : vector<24x512xf32> to vector<1x512xf32>
    %135 = vector.broadcast %133 : vector<18x1xf32> to vector<18x512xf32>
    %136 = vector.broadcast %134 : vector<1x512xf32> to vector<18x512xf32>
    %137 = arith.mulf %135, %136 : vector<18x512xf32>
    %138 = arith.addf %132, %137 : vector<18x512xf32>
    %139 = vector.extract_strided_slice %2 {offsets = [0, 14], sizes = [18, 1], strides = [1, 1]} : vector<18x24xf32> to vector<18x1xf32>
    %140 = vector.extract_strided_slice %55 {offsets = [14, 0], sizes = [1, 512], strides = [1, 1]} : vector<24x512xf32> to vector<1x512xf32>
    %141 = vector.broadcast %139 : vector<18x1xf32> to vector<18x512xf32>
    %142 = vector.broadcast %140 : vector<1x512xf32> to vector<18x512xf32>
    %143 = arith.mulf %141, %142 : vector<18x512xf32>
    %144 = arith.addf %138, %143 : vector<18x512xf32>
    %145 = vector.extract_strided_slice %2 {offsets = [0, 15], sizes = [18, 1], strides = [1, 1]} : vector<18x24xf32> to vector<18x1xf32>
    %146 = vector.extract_strided_slice %55 {offsets = [15, 0], sizes = [1, 512], strides = [1, 1]} : vector<24x512xf32> to vector<1x512xf32>
    %147 = vector.broadcast %145 : vector<18x1xf32> to vector<18x512xf32>
    %148 = vector.broadcast %146 : vector<1x512xf32> to vector<18x512xf32>
    %149 = arith.mulf %147, %148 : vector<18x512xf32>
    %150 = arith.addf %144, %149 : vector<18x512xf32>
    %151 = vector.extract_strided_slice %2 {offsets = [0, 16], sizes = [18, 1], strides = [1, 1]} : vector<18x24xf32> to vector<18x1xf32>
    %152 = vector.extract_strided_slice %55 {offsets = [16, 0], sizes = [1, 512], strides = [1, 1]} : vector<24x512xf32> to vector<1x512xf32>
    %153 = vector.broadcast %151 : vector<18x1xf32> to vector<18x512xf32>
    %154 = vector.broadcast %152 : vector<1x512xf32> to vector<18x512xf32>
    %155 = arith.mulf %153, %154 : vector<18x512xf32>
    %156 = arith.addf %150, %155 : vector<18x512xf32>
    %157 = vector.extract_strided_slice %2 {offsets = [0, 17], sizes = [18, 1], strides = [1, 1]} : vector<18x24xf32> to vector<18x1xf32>
    %158 = vector.extract_strided_slice %55 {offsets = [17, 0], sizes = [1, 512], strides = [1, 1]} : vector<24x512xf32> to vector<1x512xf32>
    %159 = vector.broadcast %157 : vector<18x1xf32> to vector<18x512xf32>
    %160 = vector.broadcast %158 : vector<1x512xf32> to vector<18x512xf32>
    %161 = arith.mulf %159, %160 : vector<18x512xf32>
    %162 = arith.addf %156, %161 : vector<18x512xf32>
    %163 = vector.extract_strided_slice %2 {offsets = [0, 18], sizes = [18, 1], strides = [1, 1]} : vector<18x24xf32> to vector<18x1xf32>
    %164 = vector.extract_strided_slice %55 {offsets = [18, 0], sizes = [1, 512], strides = [1, 1]} : vector<24x512xf32> to vector<1x512xf32>
    %165 = vector.broadcast %163 : vector<18x1xf32> to vector<18x512xf32>
    %166 = vector.broadcast %164 : vector<1x512xf32> to vector<18x512xf32>
    %167 = arith.mulf %165, %166 : vector<18x512xf32>
    %168 = arith.addf %162, %167 : vector<18x512xf32>
    %169 = vector.extract_strided_slice %2 {offsets = [0, 19], sizes = [18, 1], strides = [1, 1]} : vector<18x24xf32> to vector<18x1xf32>
    %170 = vector.extract_strided_slice %55 {offsets = [19, 0], sizes = [1, 512], strides = [1, 1]} : vector<24x512xf32> to vector<1x512xf32>
    %171 = vector.broadcast %169 : vector<18x1xf32> to vector<18x512xf32>
    %172 = vector.broadcast %170 : vector<1x512xf32> to vector<18x512xf32>
    %173 = arith.mulf %171, %172 : vector<18x512xf32>
    %174 = arith.addf %168, %173 : vector<18x512xf32>
    %175 = vector.extract_strided_slice %2 {offsets = [0, 20], sizes = [18, 1], strides = [1, 1]} : vector<18x24xf32> to vector<18x1xf32>
    %176 = vector.extract_strided_slice %55 {offsets = [20, 0], sizes = [1, 512], strides = [1, 1]} : vector<24x512xf32> to vector<1x512xf32>
    %177 = vector.broadcast %175 : vector<18x1xf32> to vector<18x512xf32>
    %178 = vector.broadcast %176 : vector<1x512xf32> to vector<18x512xf32>
    %179 = arith.mulf %177, %178 : vector<18x512xf32>
    %180 = arith.addf %174, %179 : vector<18x512xf32>
    %181 = vector.extract_strided_slice %2 {offsets = [0, 21], sizes = [18, 1], strides = [1, 1]} : vector<18x24xf32> to vector<18x1xf32>
    %182 = vector.extract_strided_slice %55 {offsets = [21, 0], sizes = [1, 512], strides = [1, 1]} : vector<24x512xf32> to vector<1x512xf32>
    %183 = vector.broadcast %181 : vector<18x1xf32> to vector<18x512xf32>
    %184 = vector.broadcast %182 : vector<1x512xf32> to vector<18x512xf32>
    %185 = arith.mulf %183, %184 : vector<18x512xf32>
    %186 = arith.addf %180, %185 : vector<18x512xf32>
    %187 = vector.extract_strided_slice %2 {offsets = [0, 22], sizes = [18, 1], strides = [1, 1]} : vector<18x24xf32> to vector<18x1xf32>
    %188 = vector.extract_strided_slice %55 {offsets = [22, 0], sizes = [1, 512], strides = [1, 1]} : vector<24x512xf32> to vector<1x512xf32>
    %189 = vector.broadcast %187 : vector<18x1xf32> to vector<18x512xf32>
    %190 = vector.broadcast %188 : vector<1x512xf32> to vector<18x512xf32>
    %191 = arith.mulf %189, %190 : vector<18x512xf32>
    %192 = arith.addf %186, %191 : vector<18x512xf32>
    %193 = vector.extract_strided_slice %2 {offsets = [0, 23], sizes = [18, 1], strides = [1, 1]} : vector<18x24xf32> to vector<18x1xf32>
    %194 = vector.extract_strided_slice %55 {offsets = [23, 0], sizes = [1, 512], strides = [1, 1]} : vector<24x512xf32> to vector<1x512xf32>
    %195 = vector.broadcast %193 : vector<18x1xf32> to vector<18x512xf32>
    %196 = vector.broadcast %194 : vector<1x512xf32> to vector<18x512xf32>
    %197 = arith.mulf %195, %196 : vector<18x512xf32>
    %198 = arith.addf %192, %197 : vector<18x512xf32>
    %199 = vector.broadcast %3 : vector<18x1xf32> to vector<18x512xf32>
    %200 = arith.addf %198, %199 : vector<18x512xf32>
    %cst_19 = arith.constant 0.000000e+00 : f32
    %201 = vector.broadcast %cst_19 : f32 to vector<18x512xf32>
    %202 = arith.subf %201, %200 : vector<18x512xf32>
    %203 = math.exp %202 : vector<18x512xf32>
    %cst_20 = arith.constant 1.000000e+00 : f32
    %204 = vector.broadcast %cst_20 : f32 to vector<18x512xf32>
    %205 = arith.addf %204, %203 : vector<18x512xf32>
    %206 = tpu.reciprocal %205 : vector<18x512xf32> -> vector<18x512xf32>
    %207 = vector.extract_strided_slice %4 {offsets = [0, 0], sizes = [12, 1], strides = [1, 1]} : vector<12x18xf32> to vector<12x1xf32>
    %208 = vector.extract_strided_slice %206 {offsets = [0, 0], sizes = [1, 512], strides = [1, 1]} : vector<18x512xf32> to vector<1x512xf32>
    %209 = vector.broadcast %207 : vector<12x1xf32> to vector<12x512xf32>
    %210 = vector.broadcast %208 : vector<1x512xf32> to vector<12x512xf32>
    %211 = arith.mulf %209, %210 : vector<12x512xf32>
    %212 = vector.extract_strided_slice %4 {offsets = [0, 1], sizes = [12, 1], strides = [1, 1]} : vector<12x18xf32> to vector<12x1xf32>
    %213 = vector.extract_strided_slice %206 {offsets = [1, 0], sizes = [1, 512], strides = [1, 1]} : vector<18x512xf32> to vector<1x512xf32>
    %214 = vector.broadcast %212 : vector<12x1xf32> to vector<12x512xf32>
    %215 = vector.broadcast %213 : vector<1x512xf32> to vector<12x512xf32>
    %216 = arith.mulf %214, %215 : vector<12x512xf32>
    %217 = arith.addf %211, %216 : vector<12x512xf32>
    %218 = vector.extract_strided_slice %4 {offsets = [0, 2], sizes = [12, 1], strides = [1, 1]} : vector<12x18xf32> to vector<12x1xf32>
    %219 = vector.extract_strided_slice %206 {offsets = [2, 0], sizes = [1, 512], strides = [1, 1]} : vector<18x512xf32> to vector<1x512xf32>
    %220 = vector.broadcast %218 : vector<12x1xf32> to vector<12x512xf32>
    %221 = vector.broadcast %219 : vector<1x512xf32> to vector<12x512xf32>
    %222 = arith.mulf %220, %221 : vector<12x512xf32>
    %223 = arith.addf %217, %222 : vector<12x512xf32>
    %224 = vector.extract_strided_slice %4 {offsets = [0, 3], sizes = [12, 1], strides = [1, 1]} : vector<12x18xf32> to vector<12x1xf32>
    %225 = vector.extract_strided_slice %206 {offsets = [3, 0], sizes = [1, 512], strides = [1, 1]} : vector<18x512xf32> to vector<1x512xf32>
    %226 = vector.broadcast %224 : vector<12x1xf32> to vector<12x512xf32>
    %227 = vector.broadcast %225 : vector<1x512xf32> to vector<12x512xf32>
    %228 = arith.mulf %226, %227 : vector<12x512xf32>
    %229 = arith.addf %223, %228 : vector<12x512xf32>
    %230 = vector.extract_strided_slice %4 {offsets = [0, 4], sizes = [12, 1], strides = [1, 1]} : vector<12x18xf32> to vector<12x1xf32>
    %231 = vector.extract_strided_slice %206 {offsets = [4, 0], sizes = [1, 512], strides = [1, 1]} : vector<18x512xf32> to vector<1x512xf32>
    %232 = vector.broadcast %230 : vector<12x1xf32> to vector<12x512xf32>
    %233 = vector.broadcast %231 : vector<1x512xf32> to vector<12x512xf32>
    %234 = arith.mulf %232, %233 : vector<12x512xf32>
    %235 = arith.addf %229, %234 : vector<12x512xf32>
    %236 = vector.extract_strided_slice %4 {offsets = [0, 5], sizes = [12, 1], strides = [1, 1]} : vector<12x18xf32> to vector<12x1xf32>
    %237 = vector.extract_strided_slice %206 {offsets = [5, 0], sizes = [1, 512], strides = [1, 1]} : vector<18x512xf32> to vector<1x512xf32>
    %238 = vector.broadcast %236 : vector<12x1xf32> to vector<12x512xf32>
    %239 = vector.broadcast %237 : vector<1x512xf32> to vector<12x512xf32>
    %240 = arith.mulf %238, %239 : vector<12x512xf32>
    %241 = arith.addf %235, %240 : vector<12x512xf32>
    %242 = vector.extract_strided_slice %4 {offsets = [0, 6], sizes = [12, 1], strides = [1, 1]} : vector<12x18xf32> to vector<12x1xf32>
    %243 = vector.extract_strided_slice %206 {offsets = [6, 0], sizes = [1, 512], strides = [1, 1]} : vector<18x512xf32> to vector<1x512xf32>
    %244 = vector.broadcast %242 : vector<12x1xf32> to vector<12x512xf32>
    %245 = vector.broadcast %243 : vector<1x512xf32> to vector<12x512xf32>
    %246 = arith.mulf %244, %245 : vector<12x512xf32>
    %247 = arith.addf %241, %246 : vector<12x512xf32>
    %248 = vector.extract_strided_slice %4 {offsets = [0, 7], sizes = [12, 1], strides = [1, 1]} : vector<12x18xf32> to vector<12x1xf32>
    %249 = vector.extract_strided_slice %206 {offsets = [7, 0], sizes = [1, 512], strides = [1, 1]} : vector<18x512xf32> to vector<1x512xf32>
    %250 = vector.broadcast %248 : vector<12x1xf32> to vector<12x512xf32>
    %251 = vector.broadcast %249 : vector<1x512xf32> to vector<12x512xf32>
    %252 = arith.mulf %250, %251 : vector<12x512xf32>
    %253 = arith.addf %247, %252 : vector<12x512xf32>
    %254 = vector.extract_strided_slice %4 {offsets = [0, 8], sizes = [12, 1], strides = [1, 1]} : vector<12x18xf32> to vector<12x1xf32>
    %255 = vector.extract_strided_slice %206 {offsets = [8, 0], sizes = [1, 512], strides = [1, 1]} : vector<18x512xf32> to vector<1x512xf32>
    %256 = vector.broadcast %254 : vector<12x1xf32> to vector<12x512xf32>
    %257 = vector.broadcast %255 : vector<1x512xf32> to vector<12x512xf32>
    %258 = arith.mulf %256, %257 : vector<12x512xf32>
    %259 = arith.addf %253, %258 : vector<12x512xf32>
    %260 = vector.extract_strided_slice %4 {offsets = [0, 9], sizes = [12, 1], strides = [1, 1]} : vector<12x18xf32> to vector<12x1xf32>
    %261 = vector.extract_strided_slice %206 {offsets = [9, 0], sizes = [1, 512], strides = [1, 1]} : vector<18x512xf32> to vector<1x512xf32>
    %262 = vector.broadcast %260 : vector<12x1xf32> to vector<12x512xf32>
    %263 = vector.broadcast %261 : vector<1x512xf32> to vector<12x512xf32>
    %264 = arith.mulf %262, %263 : vector<12x512xf32>
    %265 = arith.addf %259, %264 : vector<12x512xf32>
    %266 = vector.extract_strided_slice %4 {offsets = [0, 10], sizes = [12, 1], strides = [1, 1]} : vector<12x18xf32> to vector<12x1xf32>
    %267 = vector.extract_strided_slice %206 {offsets = [10, 0], sizes = [1, 512], strides = [1, 1]} : vector<18x512xf32> to vector<1x512xf32>
    %268 = vector.broadcast %266 : vector<12x1xf32> to vector<12x512xf32>
    %269 = vector.broadcast %267 : vector<1x512xf32> to vector<12x512xf32>
    %270 = arith.mulf %268, %269 : vector<12x512xf32>
    %271 = arith.addf %265, %270 : vector<12x512xf32>
    %272 = vector.extract_strided_slice %4 {offsets = [0, 11], sizes = [12, 1], strides = [1, 1]} : vector<12x18xf32> to vector<12x1xf32>
    %273 = vector.extract_strided_slice %206 {offsets = [11, 0], sizes = [1, 512], strides = [1, 1]} : vector<18x512xf32> to vector<1x512xf32>
    %274 = vector.broadcast %272 : vector<12x1xf32> to vector<12x512xf32>
    %275 = vector.broadcast %273 : vector<1x512xf32> to vector<12x512xf32>
    %276 = arith.mulf %274, %275 : vector<12x512xf32>
    %277 = arith.addf %271, %276 : vector<12x512xf32>
    %278 = vector.extract_strided_slice %4 {offsets = [0, 12], sizes = [12, 1], strides = [1, 1]} : vector<12x18xf32> to vector<12x1xf32>
    %279 = vector.extract_strided_slice %206 {offsets = [12, 0], sizes = [1, 512], strides = [1, 1]} : vector<18x512xf32> to vector<1x512xf32>
    %280 = vector.broadcast %278 : vector<12x1xf32> to vector<12x512xf32>
    %281 = vector.broadcast %279 : vector<1x512xf32> to vector<12x512xf32>
    %282 = arith.mulf %280, %281 : vector<12x512xf32>
    %283 = arith.addf %277, %282 : vector<12x512xf32>
    %284 = vector.extract_strided_slice %4 {offsets = [0, 13], sizes = [12, 1], strides = [1, 1]} : vector<12x18xf32> to vector<12x1xf32>
    %285 = vector.extract_strided_slice %206 {offsets = [13, 0], sizes = [1, 512], strides = [1, 1]} : vector<18x512xf32> to vector<1x512xf32>
    %286 = vector.broadcast %284 : vector<12x1xf32> to vector<12x512xf32>
    %287 = vector.broadcast %285 : vector<1x512xf32> to vector<12x512xf32>
    %288 = arith.mulf %286, %287 : vector<12x512xf32>
    %289 = arith.addf %283, %288 : vector<12x512xf32>
    %290 = vector.extract_strided_slice %4 {offsets = [0, 14], sizes = [12, 1], strides = [1, 1]} : vector<12x18xf32> to vector<12x1xf32>
    %291 = vector.extract_strided_slice %206 {offsets = [14, 0], sizes = [1, 512], strides = [1, 1]} : vector<18x512xf32> to vector<1x512xf32>
    %292 = vector.broadcast %290 : vector<12x1xf32> to vector<12x512xf32>
    %293 = vector.broadcast %291 : vector<1x512xf32> to vector<12x512xf32>
    %294 = arith.mulf %292, %293 : vector<12x512xf32>
    %295 = arith.addf %289, %294 : vector<12x512xf32>
    %296 = vector.extract_strided_slice %4 {offsets = [0, 15], sizes = [12, 1], strides = [1, 1]} : vector<12x18xf32> to vector<12x1xf32>
    %297 = vector.extract_strided_slice %206 {offsets = [15, 0], sizes = [1, 512], strides = [1, 1]} : vector<18x512xf32> to vector<1x512xf32>
    %298 = vector.broadcast %296 : vector<12x1xf32> to vector<12x512xf32>
    %299 = vector.broadcast %297 : vector<1x512xf32> to vector<12x512xf32>
    %300 = arith.mulf %298, %299 : vector<12x512xf32>
    %301 = arith.addf %295, %300 : vector<12x512xf32>
    %302 = vector.extract_strided_slice %4 {offsets = [0, 16], sizes = [12, 1], strides = [1, 1]} : vector<12x18xf32> to vector<12x1xf32>
    %303 = vector.extract_strided_slice %206 {offsets = [16, 0], sizes = [1, 512], strides = [1, 1]} : vector<18x512xf32> to vector<1x512xf32>
    %304 = vector.broadcast %302 : vector<12x1xf32> to vector<12x512xf32>
    %305 = vector.broadcast %303 : vector<1x512xf32> to vector<12x512xf32>
    %306 = arith.mulf %304, %305 : vector<12x512xf32>
    %307 = arith.addf %301, %306 : vector<12x512xf32>
    %308 = vector.extract_strided_slice %4 {offsets = [0, 17], sizes = [12, 1], strides = [1, 1]} : vector<12x18xf32> to vector<12x1xf32>
    %309 = vector.extract_strided_slice %206 {offsets = [17, 0], sizes = [1, 512], strides = [1, 1]} : vector<18x512xf32> to vector<1x512xf32>
    %310 = vector.broadcast %308 : vector<12x1xf32> to vector<12x512xf32>
    %311 = vector.broadcast %309 : vector<1x512xf32> to vector<12x512xf32>
    %312 = arith.mulf %310, %311 : vector<12x512xf32>
    %313 = arith.addf %307, %312 : vector<12x512xf32>
    %314 = vector.broadcast %5 : vector<12x1xf32> to vector<12x512xf32>
    %315 = arith.addf %313, %314 : vector<12x512xf32>
    %cst_21 = arith.constant 0.000000e+00 : f32
    %316 = vector.broadcast %cst_21 : f32 to vector<12x512xf32>
    %317 = arith.maximumf %315, %316 : vector<12x512xf32>
    %318 = vector.broadcast %6 : vector<12x1xf32> to vector<12x512xf32>
    %319 = arith.mulf %317, %318 : vector<12x512xf32>
    %cst_22 = arith.constant dense<0.000000e+00> : vector<512xf32>
    %320 = vector.multi_reduction <add>, %319, %cst_22 [0] : vector<12x512xf32> to vector<512xf32>
    %321 = vector.shape_cast %320 : vector<512xf32> to vector<1x512xf32>
    %322 = vector.broadcast %7 : vector<1x1xf32> to vector<1x512xf32>
    %323 = arith.addf %321, %322 : vector<1x512xf32>
    %324 = arith.index_cast %9 : i32 to index
    %c0_23 = arith.constant 0 : index
    %c0_24 = arith.constant 0 : index
    %325 = vector.load %arg10[%324, %c0_23, %c0_24] : memref<1x1x512xf32, #tpu.memory_space<vmem>>, vector<1x1x512xf32>
    %326 = vector.shape_cast %325 : vector<1x1x512xf32> to vector<1x512xf32>
    %327 = vector.shape_cast %323 : vector<1x512xf32> to vector<1x1x512xf32>
    tpu.vector_store %arg10[%324, %c0_23, %c0_24], %327 {strides = array<i32>} : memref<1x1x512xf32, #tpu.memory_space<vmem>>, vector<1x1x512xf32>,
    %c1_i32_25 = arith.constant 1 : i32
    return
  }
  func.func @transform_0(%arg0: i32) -> (i32, i32, i32) {
    %c0_i32 = arith.constant 0 : i32
    %c0_i32_0 = arith.constant 0 : i32
    %c0_i32_1 = arith.constant 0 : i32
    return %arg0, %c0_i32, %c0_i32_0 : i32, i32, i32
  }
  func.func @transform_1(%arg0: i32) -> (i32, i32) {
    %c0_i32 = arith.constant 0 : i32
    %c0_i32_0 = arith.constant 0 : i32
    %c0_i32_1 = arith.constant 0 : i32
    return %c0_i32, %c0_i32_0 : i32, i32
  }
  func.func @transform_2(%arg0: i32) -> (i32, i32) {
    %c0_i32 = arith.constant 0 : i32
    %c0_i32_0 = arith.constant 0 : i32
    %c0_i32_1 = arith.constant 0 : i32
    return %c0_i32, %c0_i32_0 : i32, i32
  }
  func.func @transform_3(%arg0: i32) -> (i32, i32) {
    %c0_i32 = arith.constant 0 : i32
    %c0_i32_0 = arith.constant 0 : i32
    %c0_i32_1 = arith.constant 0 : i32
    return %c0_i32, %c0_i32_0 : i32, i32
  }
  func.func @transform_4(%arg0: i32) -> (i32, i32) {
    %c0_i32 = arith.constant 0 : i32
    %c0_i32_0 = arith.constant 0 : i32
    %c0_i32_1 = arith.constant 0 : i32
    return %c0_i32, %c0_i32_0 : i32, i32
  }
  func.func @transform_5(%arg0: i32) -> (i32, i32) {
    %c0_i32 = arith.constant 0 : i32
    %c0_i32_0 = arith.constant 0 : i32
    %c0_i32_1 = arith.constant 0 : i32
    return %c0_i32, %c0_i32_0 : i32, i32
  }
  func.func @transform_6(%arg0: i32) -> (i32, i32) {
    %c0_i32 = arith.constant 0 : i32
    %c0_i32_0 = arith.constant 0 : i32
    %c0_i32_1 = arith.constant 0 : i32
    return %c0_i32, %c0_i32_0 : i32, i32
  }
  func.func @transform_7(%arg0: i32) -> (i32, i32) {
    %c0_i32 = arith.constant 0 : i32
    %c0_i32_0 = arith.constant 0 : i32
    %c0_i32_1 = arith.constant 0 : i32
    return %c0_i32, %c0_i32_0 : i32, i32
  }
  func.func @transform_8(%arg0: i32) -> (i32, i32) {
    %c0_i32 = arith.constant 0 : i32
    %c0_i32_0 = arith.constant 0 : i32
    %c0_i32_1 = arith.constant 0 : i32
    return %c0_i32, %c0_i32_0 : i32, i32
  }
  func.func @transform_9(%arg0: i32) -> (i32, i32, i32) {
    %c0_i32 = arith.constant 0 : i32
    %c0_i32_0 = arith.constant 0 : i32
    %c0_i32_1 = arith.constant 0 : i32
    return %arg0, %c0_i32, %c0_i32_0 : i32, i32, i32
  }
}

</mosaic_0001>

<bundles_post_ra>
// kernel: tpu_custom_call.1
= control target key start
LH: loop header
LB: loop body
LE: loop exit
PB: predicated region body
PF: predicated region fallthrough
CT: control target
= control target key end

     0   :  { %s5224_s0 = inlined_call_operand.vmem [shape: f32[1,6,512], index: 0, kind: input, shape index: {}]   ;;  %s5225_s1 = inlined_call_operand.vmem [shape: f32[24,6], index: 1, kind: input, shape index: {}]   ;;  %s5226_s2 = inlined_call_operand.vmem [shape: f32[24,1], index: 2, kind: input, shape index: {}]   ;;  %s5227_s3 = inlined_call_operand.vmem [shape: f32[18,24], index: 3, kind: input, shape index: {}]   ;;  %s5228_s4 = inlined_call_operand.vmem [shape: f32[18,1], index: 4, kind: input, shape index: {}]   ;;  %s5229_s5 = inlined_call_operand.vmem [shape: f32[12,18], index: 5, kind: input, shape index: {}]   ;;  %s5230_s6 = inlined_call_operand.vmem [shape: f32[12,1], index: 6, kind: input, shape index: {}]   ;;  %s5231_s7 = inlined_call_operand.vmem [shape: f32[12,1], index: 7, kind: input, shape index: {}]   ;;  %s5232_s8 = inlined_call_operand.<no memory space> [shape: f32[1,1], index: 8, kind: input, shape index: {}]   ;;  %s5233_s9 = inlined_call_operand.hbm [shape: f32[1,1,512], index: 9, kind: output, shape index: {}]  }
   0x1   :  { %v14_v0 = vstv %s5232_s8 }
   0x2   :  { %15 = vst [vmem:[#allocation2] sm:$0x1] %v14_v0 }
   0x3   :  { %v37_v1 = vld [vmem:[%s5225_s1 + $0x10] sm:$0xff]  ;;  %v35_v2 = vld [vmem:[%s5225_s1] sm:$0xff]  ;;  %v5243_v3 = vmov 0   ;;  %v36_v4 = vld [vmem:[%s5225_s1 + $0x8] sm:$0xff]  ;;  %v5272_v5 = vmov 1  }
   0x4   :  { %2653 = vset.pattern.permute.xlu1 %v5243_v3  ;;  %2652 = vset.pattern.permute.xlu0 %v5243_v3  ;;  %v39_v6 = vld [vmem:[%s5226_s2 + $0x8] sm:$0xff] }
   0x5   :  { %70 = vperm.xlu1 %2653, %v37_v1   ;;  %60 = vperm.xlu0 %2652, %v35_v2  }
   0x9   :  { %2654 = vset.pattern.permute.xlu1 %v5272_v5  ;;  %65 = vperm.xlu0 %2652, %v36_v4  }
   0xa   :  { %102 = vperm.xlu1 %2654, %v35_v2  }
   0xb   :  { %16 = vsyncpa [#allocation4], 0  ;;  %v5266_v7 = vmov 2   ;;  %v2962_v8 = vld [vmem:[%s5227_s3] sm:$0xff]  ;;  %v5237_v9 = vmov 3   ;;  %v5264_v10 = vmov 4   ;;  %v5234_v30 = vlaneseq }
   0xc   :  { %v5260_v11 = vmov 5   ;;  %v38_v12 = vld [vmem:[%s5226_s2] sm:$0xff]  ;;  %v40_v13 = vld [vmem:[%s5226_s2 + $0x10] sm:$0xff]  ;;  %v5236_v14 = vmov 6   ;;  %v5258_v16 = vmov 7   ;;  %v2997_v17 = vld [vmem:[%s5227_s3 + $0x8] sm:$0xff] }
   0xd   :  { %368 = vperm.xlu0 %2652, %v39_v6   ;;  %v2989_v15 = vld [vmem:[%s5227_s3 + $0x10] sm:$0x3]  ;;  %v5254_v18 = vmov 8   ;;  %v5235_v19 = vmov 9   ;;  %v5250_v20 = vmov 10   ;;  %v5270_v21 = vmov 11  }
   0xe   :  { %110 = vperm.xlu1 %2654, %v37_v1   ;;  %v5268_v22 = vmov 12   ;;  %v5262_v23 = vmov 13   ;;  %v5256_v24 = vmov 14   ;;  %v5252_v25 = vmov 15   ;;  %v3064_v39 = vld [vmem:[%s5224_s0] sm:$0x3f] }
   0xf   :  { %v5248_v26 = vmov 16   ;;  %v5246_v27 = vmov 17   ;;  %v5245_v28 = vmov 18   ;;  %v5242_v29 = vmov 19   ;;  %v3069_v40 = vld [vmem:[%s5224_s0 + $0x8] sm:$0x3f] }
  0x10   :  { %v5241_v32 = vmov 20   ;;  %v3050_v34 = vshrl.u32 %v5234_v30, 7  ;;  %v5240_v38 = vmov 21   ;;  %v3078_v42 = vld [vmem:[%s5224_s0 + $0x10] sm:$0x3f]  ;;  %v5239_v51 = vmov 22  }
  0x11   :  { %2660 = vset.pattern.permute.xlu0 %v5272_v5  ;;  %v3083_v43 = vld [vmem:[%s5224_s0 + $0x18] sm:$0x3f]  ;;  %vm2532_vm0 = vcmask 1043456  }
  0x12   :  { %2655 = vset.pattern.permute.xlu1 %v5266_v7  ;;  %106 = vperm.xlu0 %2660, %v36_v4   ;;  %5485 = vst [vmem:[#allocation6_spill] sm:$0xff] %v3050_v34  ;;  %v3056_v36 = vsub.s32 0, %v3050_v34  ;;  %v3072_v41 = vsub.s32 1, %v3050_v34 }
  0x13   :  { %154 = vperm.xlu1 %2655, %v35_v2  }
  0x14   :  { %5486 = vst [vmem:[#allocation7_spill] sm:$0xff] %v3056_v36  ;;  %5487 = vst [vmem:[#allocation8_spill] sm:$0xff] %v3072_v41  ;;  %v3090_v45 = vrot.slane %v3064_v39, %v3056_v36  ;;  %v3096_v47 = vrot.slane %v3069_v40, %v3056_v36  ;;  %v3100_v48 = vrot.slane %v3078_v42, %v3056_v36 }
  0x15   :  { %v3104_v49 = vrot.slane %v3083_v43, %v3056_v36  ;;  %v3108_v50 = vrot.slane %v3064_v39, %v3072_v41  ;;  %v3113_v52 = vrot.slane %v3069_v40, %v3072_v41  ;;  %v3117_v53 = vrot.slane %v3078_v42, %v3072_v41 }
  0x16   :  { %492 = vperm.xlu0 %2660, %v2962_v8   ;;  %v3121_v54 = vrot.slane %v3083_v43, %v3072_v41 }
  0x17   :  { %162 = vperm.xlu1 %2655, %v37_v1  }
  0x1a   :  { %2661 = vset.pattern.permute.xlu0 %v5266_v7 }
  0x1b   :  { %2656 = vset.pattern.permute.xlu1 %v5237_v9  ;;  %158 = vperm.xlu0 %2661, %v36_v4  }
  0x1c   :  { %206 = vperm.xlu1 %2656, %v35_v2  }
  0x1f   :  { %544 = vperm.xlu0 %2661, %v2962_v8  }
  0x20   :  { %214 = vperm.xlu1 %2656, %v37_v1  }
  0x23   :  { %2663 = vset.pattern.permute.xlu0 %v5237_v9 }
  0x24   :  { %2657 = vset.pattern.permute.xlu1 %v5264_v10  ;;  %210 = vperm.xlu0 %2663, %v36_v4  }
  0x25   :  { %258 = vperm.xlu1 %2657, %v35_v2  }
  0x28   :  { %596 = vperm.xlu0 %2663, %v2962_v8  }
  0x29   :  { %266 = vperm.xlu1 %2657, %v37_v1  }
  0x2c   :  { %2665 = vset.pattern.permute.xlu0 %v5264_v10 }
  0x2d   :  { %2658 = vset.pattern.permute.xlu1 %v5260_v11  ;;  %262 = vperm.xlu0 %2665, %v36_v4  }
  0x2e   :  { %310 = vperm.xlu1 %2658, %v35_v2  }
  0x31   :  { %648 = vperm.xlu0 %2665, %v2962_v8  }
  0x32   :  { %318 = vperm.xlu1 %2658, %v37_v1   ;;  %v5238_v1 = vmov 23  }
  0x35   :  { %2667 = vset.pattern.permute.xlu0 %v5260_v11 }
  0x36   :  { %2659 = vset.pattern.permute.xlu1 %v5243_v3  ;;  %314 = vperm.xlu0 %2667, %v36_v4  }
  0x37   :  { %363 = vperm.xlu1 %2659, %v38_v12  }
  0x3a   :  { %700 = vperm.xlu0 %2667, %v2962_v8  }
  0x3b   :  { %373 = vperm.xlu1 %2659, %v40_v13  }
  0x3e   :  { %2670 = vset.pattern.permute.xlu0 %v5236_v14 }
  0x3f   :  { %450 = vperm.xlu1 %2659, %v2962_v8   ;;  %752 = vperm.xlu0 %2670, %v2962_v8  }
  0x43   :  { %460 = vperm.xlu1 %2659, %v2989_v15   ;;  %2672 = vset.pattern.permute.xlu0 %v5258_v16 }
  0x44   :  { %804 = vperm.xlu0 %2672, %v2962_v8  }
  0x47   :  { %2662 = vset.pattern.permute.xlu1 %v5272_v5 }
  0x48   :  { %496 = vperm.xlu1 %2662, %v2997_v17   ;;  %2674 = vset.pattern.permute.xlu0 %v5254_v18 }
  0x49   :  { %856 = vperm.xlu0 %2674, %v2962_v8  }
  0x4c   :  { %500 = vperm.xlu1 %2662, %v2989_v15  }
  0x4d   :  { %2676 = vset.pattern.permute.xlu0 %v5235_v19 }
  0x4e   :  { %908 = vperm.xlu0 %2676, %v2962_v8  }
  0x50   :  { %2664 = vset.pattern.permute.xlu1 %v5266_v7 }
  0x51   :  { %548 = vperm.xlu1 %2664, %v2997_v17  }
  0x52   :  { %2678 = vset.pattern.permute.xlu0 %v5250_v20 }
  0x53   :  { %960 = vperm.xlu0 %2678, %v2962_v8  }
  0x55   :  { %552 = vperm.xlu1 %2664, %v2989_v15  }
  0x57   :  { %2680 = vset.pattern.permute.xlu0 %v5270_v21 }
  0x58   :  { %1012 = vperm.xlu0 %2680, %v2962_v8  }
  0x59   :  { %2666 = vset.pattern.permute.xlu1 %v5237_v9 }
  0x5a   :  { %600 = vperm.xlu1 %2666, %v2997_v17  }
  0x5c   :  { %2682 = vset.pattern.permute.xlu0 %v5268_v22 }
  0x5d   :  { %1064 = vperm.xlu0 %2682, %v2962_v8  }
  0x5e   :  { %604 = vperm.xlu1 %2666, %v2989_v15  }
  0x61   :  { %2684 = vset.pattern.permute.xlu0 %v5262_v23 }
  0x62   :  { %2668 = vset.pattern.permute.xlu1 %v5264_v10  ;;  %1116 = vperm.xlu0 %2684, %v2962_v8  }
  0x63   :  { %652 = vperm.xlu1 %2668, %v2997_v17  }
  0x66   :  { %2686 = vset.pattern.permute.xlu0 %v5256_v24 }
  0x67   :  { %656 = vperm.xlu1 %2668, %v2989_v15   ;;  %1168 = vperm.xlu0 %2686, %v2962_v8  }
  0x6b   :  { %2669 = vset.pattern.permute.xlu1 %v5260_v11  ;;  %2688 = vset.pattern.permute.xlu0 %v5252_v25  ;;  %v3258_v11 = vld [vmem:[%s5229_s5] sm:$0xff] }
  0x6c   :  { %704 = vperm.xlu1 %2669, %v2997_v17   ;;  %1220 = vperm.xlu0 %2688, %v2962_v8  }
  0x70   :  { %708 = vperm.xlu1 %2669, %v2989_v15   ;;  %2690 = vset.pattern.permute.xlu0 %v5248_v26 }
  0x71   :  { %1272 = vperm.xlu0 %2690, %v2962_v8  }
  0x74   :  { %2671 = vset.pattern.permute.xlu1 %v5236_v14 }
  0x75   :  { %756 = vperm.xlu1 %2671, %v2997_v17   ;;  %2692 = vset.pattern.permute.xlu0 %v5246_v27 }
  0x76   :  { %1324 = vperm.xlu0 %2692, %v2962_v8  }
  0x79   :  { %760 = vperm.xlu1 %2671, %v2989_v15  }
  0x7a   :  { %2694 = vset.pattern.permute.xlu0 %v5245_v28 }
  0x7b   :  { %1376 = vperm.xlu0 %2694, %v2962_v8  }
  0x7d   :  { %2673 = vset.pattern.permute.xlu1 %v5258_v16 }
  0x7e   :  { %808 = vperm.xlu1 %2673, %v2997_v17  }
  0x7f   :  { %2696 = vset.pattern.permute.xlu0 %v5242_v29 }
  0x80   :  { %1428 = vperm.xlu0 %2696, %v2962_v8  }
  0x82   :  { %812 = vperm.xlu1 %2673, %v2989_v15  }
  0x84   :  { %v3044_v31 = vpop.permute.xlu1 %70  ;;  %2698 = vset.pattern.permute.xlu0 %v5241_v32  ;;  %v3047_v33 = vpop.permute.xlu0 %60 }
  0x85   :  { %1480 = vperm.xlu0 %2698, %v2962_v8   ;;  %v91_v25 = vmul.f32 %v3100_v48, %v3047_v33  ;;  %v92_v16 = vmul.f32 %v3104_v49, %v3047_v33  ;;  %v98_v22 = vmul.f32 %v3096_v47, %v3044_v31 }
  0x86   :  { %2675 = vset.pattern.permute.xlu1 %v5254_v18 }
  0x87   :  { %860 = vperm.xlu1 %2675, %v2997_v17  }
  0x88   :  { %v66_v35 = vpop.permute.xlu0 %65 }
  0x89   :  { %v3058_v37 = vpop.permute.xlu1 %102  ;;  %2700 = vset.pattern.permute.xlu0 %v5240_v38  ;;  %v93_v55 = vmul.f32 %v3090_v45, %v66_v35  ;;  %v94_v56 = vmul.f32 %v3096_v47, %v66_v35  ;;  %v95_v57 = vmul.f32 %v3100_v48, %v66_v35  ;;  %v96_v58 = vmul.f32 %v3104_v49, %v66_v35 }
  0x8a   :  { %1532 = vperm.xlu0 %2700, %v2962_v8   ;;  %v131_v24 = vmul.f32 %v3117_v53, %v3058_v37 }
  0x8b   :  { %864 = vperm.xlu1 %2675, %v2989_v15  }
  0x8c   :  { %v3086_v44 = vpop.permute.xlu0 %368 }
  0x8d   :  { %v3092_v46 = vpop.permute.xlu1 %110 }
  0x8e   :  { %2702 = vset.pattern.permute.xlu0 %v5239_v51  ;;  %v137_v23 = vmul.f32 %v3108_v50, %v3092_v46  ;;  %v138_v10 = vmul.f32 %v3113_v52, %v3092_v46  ;;  %v139_v7 = vmul.f32 %v3117_v53, %v3092_v46 }
  0x8f   :  { %2677 = vset.pattern.permute.xlu1 %v5235_v19  ;;  %1584 = vperm.xlu0 %2702, %v2962_v8  }
  0x90   :  { %912 = vperm.xlu1 %2677, %v2997_v17  }
  0x91   :  { %v107_v59 = vpop.permute.xlu0 %106 }
  0x92   :  { %v3130_v60 = vpop.permute.xlu1 %154  ;;  %v133_v61 = vmul.f32 %v3108_v50, %v107_v59  ;;  %v134_v62 = vmul.f32 %v3113_v52, %v107_v59  ;;  %v135_v63 = vmul.f32 %v3117_v53, %v107_v59  ;;  %v136_v0 = vmul.f32 %v3121_v54, %v107_v59 }
  0x93   :  { %2704 = vset.pattern.permute.xlu0 %v5238_v1  ;;  %v3152_v59 = vsub.s32 2, %v3050_v34 }
  0x94   :  { %916 = vperm.xlu1 %2677, %v2989_v15   ;;  %1636 = vperm.xlu0 %2704, %v2962_v8   ;;  %v3139_v2 = vadd.f32 %v133_v61, %v93_v55  ;;  %v3141_v4 = vadd.f32 %v134_v62, %v94_v56  ;;  %v3143_v6 = vadd.f32 %v135_v63, %v95_v57  ;;  %v3157_v8 = vsub.s32 3, %v3050_v34 }
  0x95   :  { %v3145_v12 = vpop.permute.xlu0 %492  ;;  %v3149_v35 = vadd.f32 %v136_v0, %v96_v58  ;;  %5489 = vst [vmem:[#allocation10_spill] sm:$0xff] %v3152_v59  ;;  %v3161_v55 = vsub.s32 4, %v3050_v34  ;;  %v3165_v57 = vsub.s32 5, %v3050_v34  ;;  %v3169_v58 = vrot.slane %v3064_v39, %v3152_v59  ;;  %v44_v0 = vld [vmem:[%s5228_s4] sm:$0xff] }
  0x96   :  { %5488 = vst [vmem:[#allocation9_spill] sm:$0xff] %v3145_v12  ;;  %v3147_v13 = vpop.permute.xlu1 %162  ;;  %5490 = vst [vmem:[#allocation11_spill] sm:$0xff] %v3157_v8  ;;  %v3173_v61 = vrot.slane %v3069_v40, %v3152_v59  ;;  %v3177_v62 = vrot.slane %v3078_v42, %v3152_v59  ;;  %v3186_v30 = vrot.slane %v3083_v43, %v3152_v59 }
  0x97   :  { %5491 = vst [vmem:[#allocation12_spill] sm:$0xff] %v3161_v55  ;;  %5492 = vst [vmem:[#allocation13_spill] sm:$0xff] %v3165_v57  ;;  %v3190_v19 = vrot.slane %v3064_v39, %v3157_v8  ;;  %v3194_v14 = vrot.slane %v3069_v40, %v3157_v8  ;;  %v3198_v9 = vrot.slane %v3078_v42, %v3157_v8 }
  0x98   :  { %2679 = vset.pattern.permute.xlu1 %v5250_v20  ;;  %2705 = vset.pattern.permute.xlu0 %v5243_v3  ;;  %v3202_v1 = vrot.slane %v3083_v43, %v3157_v8  ;;  %v3207_v51 = vrot.slane %v3064_v39, %v3161_v55  ;;  %v3211_v38 = vrot.slane %v3069_v40, %v3161_v55 }
  0x99   :  { %964 = vperm.xlu1 %2679, %v2997_v17   ;;  %455 = vperm.xlu0 %2705, %v2997_v17   ;;  %v3215_v32 = vrot.slane %v3078_v42, %v3161_v55  ;;  %v3219_v29 = vrot.slane %v3083_v43, %v3161_v55  ;;  %v3225_v28 = vrot.slane %v3064_v39, %v3165_v57 }
  0x9a   :  { %v159_v56 = vpop.permute.xlu0 %158  ;;  %v3229_v27 = vrot.slane %v3069_v40, %v3165_v57  ;;  %v3233_v26 = vrot.slane %v3078_v42, %v3165_v57  ;;  %v90_v20 = vmul.f32 %v3096_v47, %v3047_v33  ;;  %v3245_v39 = vrot.slane %v3083_v43, %v3165_v57 }
  0x9b   :  { %v3179_v63 = vpop.permute.xlu1 %206  ;;  %v129_v40 = vmul.f32 %v3108_v50, %v3058_v37  ;;  %v130_v42 = vmul.f32 %v3113_v52, %v3058_v37  ;;  %v132_v43 = vmul.f32 %v3121_v54, %v3058_v37  ;;  %v99_v37 = vmul.f32 %v3100_v48, %v3044_v31 }
  0x9c   :  { %v100_v50 = vmul.f32 %v3104_v49, %v3044_v31  ;;  %v140_v52 = vmul.f32 %v3121_v54, %v3092_v46  ;;  %v181_v53 = vmul.f32 %v3169_v58, %v3130_v60  ;;  %v183_v47 = vmul.f32 %v3177_v62, %v3130_v60 }
  0x9d   :  { %968 = vperm.xlu1 %2679, %v2989_v15   ;;  %1689 = vperm.xlu0 %2705, %v44_v0   ;;  %v89_v0 = vmul.f32 %v3090_v45, %v3047_v33  ;;  %v97_v33 = vmul.f32 %v3090_v45, %v3044_v31  ;;  %v182_v45 = vmul.f32 %v3173_v61, %v3130_v60 }
  0x9e   :  { %v3221_v3 = vpop.permute.xlu0 %544  ;;  %v142_v5 = vadd.f32 %v130_v42, %v90_v20  ;;  %v143_v31 = vadd.f32 %v131_v24, %v91_v25  ;;  %v184_v49 = vmul.f32 %v3186_v30, %v3130_v60  ;;  %v144_v46 = vadd.f32 %v132_v43, %v92_v16 }
  0x9f   :  { %5493 = vst [vmem:[#allocation14_spill] sm:$0xff] %v3221_v3  ;;  %v3241_v18 = vpop.permute.xlu1 %214  ;;  %v149_v54 = vadd.f32 %v137_v23, %v97_v33  ;;  %v150_v8 = vadd.f32 %v138_v10, %v98_v22  ;;  %v151_v34 = vadd.f32 %v139_v7, %v99_v37  ;;  %v185_v3 = vmul.f32 %v3169_v58, %v159_v56 }
  0xa0   :  { %v186_v12 = vmul.f32 %v3173_v61, %v159_v56  ;;  %v187_v59 = vmul.f32 %v3177_v62, %v159_v56  ;;  %v152_v20 = vadd.f32 %v140_v52, %v100_v50  ;;  %v194_v25 = vadd.f32 %v182_v45, %v142_v5  ;;  %v3322_v50 = vld [vmem:[%s5229_s5 + $0x8] sm:$0xf] }
  0xa1   :  { %2681 = vset.pattern.permute.xlu1 %v5270_v21  ;;  %1776 = vperm.xlu0 %2705, %v3258_v11   ;;  %v141_v21 = vadd.f32 %v129_v40, %v89_v0  ;;  %v188_v0 = vmul.f32 %v3186_v30, %v159_v56  ;;  %v195_v40 = vadd.f32 %v183_v47, %v143_v31  ;;  %v5494_v60 = vmov 1  }
  0xa2   :  { %1016 = vperm.xlu1 %2681, %v2997_v17   ;;  %v196_v10 = vadd.f32 %v184_v49, %v144_v46  ;;  %v189_v7 = vmul.f32 %v3169_v58, %v3147_v13  ;;  %v190_v22 = vmul.f32 %v3173_v61, %v3147_v13  ;;  %v191_v23 = vmul.f32 %v3177_v62, %v3147_v13 }
  0xa3   :  { %v211_v48 = vpop.permute.xlu0 %210  ;;  %v193_v24 = vadd.f32 %v181_v53, %v141_v21  ;;  %v233_v5 = vmul.f32 %v3190_v19, %v3179_v63  ;;  %v234_v21 = vmul.f32 %v3194_v14, %v3179_v63  ;;  %v235_v56 = vmul.f32 %v3198_v9, %v3179_v63 }
  0xa4   :  { %v259_v57 = vpop.permute.xlu1 %258  ;;  %v236_v58 = vmul.f32 %v3202_v1, %v3179_v63  ;;  %v197_v61 = vadd.f32 %v185_v3, %v3139_v2  ;;  %v198_v62 = vadd.f32 %v186_v12, %v3141_v4  ;;  %v199_v43 = vadd.f32 %v187_v59, %v3143_v6 }
  0xa5   :  { %2708 = vset.pattern.permute.xlu0 %v5494_v60  ;;  %v200_v33 = vadd.f32 %v188_v0, %v3149_v35  ;;  %v5496_v37 = vmov 12   ;;  %v237_v52 = vmul.f32 %v3190_v19, %v211_v48  ;;  %v238_v63 = vmul.f32 %v3194_v14, %v211_v48 }
  0xa6   :  { %1020 = vperm.xlu1 %2681, %v2989_v15   ;;  %1809 = vperm.xlu0 %2708, %v3258_v11   ;;  %v239_v3 = vmul.f32 %v3198_v9, %v211_v48  ;;  %v240_v2 = vmul.f32 %v3202_v1, %v211_v48  ;;  %v192_v4 = vmul.f32 %v3186_v30, %v3147_v13  ;;  %v5497_v59 = vmov 2  }
  0xa7   :  { %v3295_v16 = vpop.permute.xlu0 %596  ;;  %v3331_v6 = vadd.f32 %v189_v7, %v149_v54  ;;  %v3333_v12 = vadd.f32 %v190_v22, %v150_v8  ;;  %v3335_v35 = vadd.f32 %v191_v23, %v151_v34  ;;  %v245_v45 = vadd.f32 %v233_v5, %v193_v24 }
  0xa8   :  { %5495 = vst [vmem:[#allocation15_spill] sm:$0xff] %v3295_v16  ;;  %v3303_v42 = vpop.permute.xlu1 %266  ;;  %v246_v47 = vadd.f32 %v234_v21, %v194_v25  ;;  %v247_v31 = vadd.f32 %v235_v56, %v195_v40  ;;  %v248_v49 = vadd.f32 %v236_v58, %v196_v10  ;;  %v285_v48 = vmul.f32 %v3207_v51, %v259_v57 }
  0xa9   :  { %v286_v30 = vmul.f32 %v3211_v38, %v259_v57  ;;  %v287_v13 = vmul.f32 %v3215_v32, %v259_v57  ;;  %v288_v8 = vmul.f32 %v3219_v29, %v259_v57  ;;  %v249_v34 = vadd.f32 %v237_v52, %v197_v61 }
  0xaa   :  { %2683 = vset.pattern.permute.xlu1 %v5496_v37  ;;  %2711 = vset.pattern.permute.xlu0 %v5497_v59  ;;  %v250_v54 = vadd.f32 %v238_v63, %v198_v62  ;;  %v251_v0 = vadd.f32 %v239_v3, %v199_v43  ;;  %v252_v24 = vadd.f32 %v240_v2, %v200_v33  ;;  %v5498_v58 = vmov 4  }
  0xab   :  { %1068 = vperm.xlu1 %2683, %v2997_v17   ;;  %1853 = vperm.xlu0 %2711, %v3322_v50   ;;  %v3357_v61 = vadd.f32 %v192_v4, %v152_v20  ;;  %v241_v62 = vmul.f32 %v3190_v19, %v3241_v18  ;;  %v242_v43 = vmul.f32 %v3194_v14, %v3241_v18  ;;  %v5500_v16 = vmov 5  }
  0xac   :  { %v263_v53 = vpop.permute.xlu0 %262  ;;  %v243_v33 = vmul.f32 %v3198_v9, %v3241_v18  ;;  %v297_v52 = vadd.f32 %v285_v48, %v245_v45  ;;  %v298_v63 = vadd.f32 %v286_v30, %v246_v47  ;;  %v299_v3 = vadd.f32 %v287_v13, %v247_v31 }
  0xad   :  { %v311_v46 = vpop.permute.xlu1 %310  ;;  %v289_v25 = vmul.f32 %v3207_v51, %v263_v53  ;;  %v290_v40 = vmul.f32 %v3211_v38, %v263_v53  ;;  %v291_v10 = vmul.f32 %v3215_v32, %v263_v53  ;;  %v292_v7 = vmul.f32 %v3219_v29, %v263_v53 }
  0xae   :  { %v337_v23 = vmul.f32 %v3225_v28, %v311_v46  ;;  %v338_v57 = vmul.f32 %v3229_v27, %v311_v46  ;;  %v339_v5 = vmul.f32 %v3233_v26, %v311_v46  ;;  %v340_v21 = vmul.f32 %v3245_v39, %v311_v46 }
  0xaf   :  { %1072 = vperm.xlu1 %2683, %v2989_v15   ;;  %2713 = vset.pattern.permute.xlu0 %v5498_v58  ;;  %v300_v2 = vadd.f32 %v288_v8, %v248_v49  ;;  %v5499_v53 = vmov 13   ;;  %v301_v20 = vadd.f32 %v289_v25, %v249_v34  ;;  %v302_v4 = vadd.f32 %v290_v40, %v250_v54 }
  0xb0   :  { %v3348_v22 = vpop.permute.xlu0 %648  ;;  %1929 = vperm.xlu0 %2713, %v3258_v11   ;;  %v303_v46 = vadd.f32 %v291_v10, %v251_v0  ;;  %v304_v19 = vadd.f32 %v292_v7, %v252_v24  ;;  %v349_v37 = vadd.f32 %v337_v23, %v297_v52  ;;  %v350_v58 = vadd.f32 %v338_v57, %v298_v63 }
  0xb1   :  { %v3354_v56 = vpop.permute.xlu1 %318  ;;  %v351_v14 = vadd.f32 %v339_v5, %v299_v3  ;;  %v352_v59 = vadd.f32 %v340_v21, %v300_v2  ;;  %v244_v5 = vmul.f32 %v3202_v1, %v3241_v18  ;;  %v5501_v63 = vmov 7  }
  0xb2   :  { %v253_v3 = vadd.f32 %v241_v62, %v3331_v6  ;;  %v254_v2 = vadd.f32 %v242_v43, %v3333_v12  ;;  %v294_v18 = vmul.f32 %v3211_v38, %v3303_v42  ;;  %v295_v6 = vmul.f32 %v3215_v32, %v3303_v42 }
  0xb3   :  { %2685 = vset.pattern.permute.xlu1 %v5499_v53  ;;  %v346_v38 = vmul.f32 %v3229_v27, %v3354_v56 }
  0xb4   :  { %1120 = vperm.xlu1 %2685, %v2997_v17   ;;  %2716 = vset.pattern.permute.xlu0 %v5500_v16 }
  0xb5   :  { %v315_v60 = vpop.permute.xlu0 %314  ;;  %1969 = vperm.xlu0 %2716, %v3258_v11  }
  0xb6   :  { %v364_v9 = vpop.permute.xlu1 %363  ;;  %v341_v45 = vmul.f32 %v3225_v28, %v315_v60  ;;  %v342_v47 = vmul.f32 %v3229_v27, %v315_v60  ;;  %v343_v31 = vmul.f32 %v3233_v26, %v315_v60  ;;  %v344_v49 = vmul.f32 %v3245_v39, %v315_v60 }
  0xb7   :  { %v376_v48 = vadd.f32 %v364_v9, %v349_v37  ;;  %v377_v30 = vadd.f32 %v364_v9, %v350_v58  ;;  %v378_v13 = vadd.f32 %v364_v9, %v351_v14  ;;  %v379_v8 = vadd.f32 %v364_v9, %v352_v59 }
  0xb8   :  { %1124 = vperm.xlu1 %2685, %v2989_v15   ;;  %v353_v34 = vadd.f32 %v341_v45, %v301_v20  ;;  %v354_v54 = vadd.f32 %v342_v47, %v302_v4  ;;  %v355_v0 = vadd.f32 %v343_v31, %v303_v46  ;;  %v356_v24 = vadd.f32 %v344_v49, %v304_v19 }
  0xb9   :  { %v388_v25 = vsub.f32 0.0, %v376_v48  ;;  %v389_v40 = vsub.f32 0.0, %v377_v30  ;;  %v390_v10 = vsub.f32 0.0, %v378_v13  ;;  %v391_v7 = vsub.f32 0.0, %v379_v8  ;;  %2718 = vset.pattern.permute.xlu0 %v5501_v63  ;;  %v3412_v30 = vpop.permute.xlu0 %700 }
  0xba   :  { %v374_v23 = vpop.permute.xlu1 %373  ;;  %v380_v57 = vadd.f32 %v3086_v44, %v353_v34  ;;  %v381_v60 = vadd.f32 %v3086_v44, %v354_v54  ;;  %v382_v37 = vadd.f32 %v3086_v44, %v355_v0  ;;  %v383_v59 = vadd.f32 %v3086_v44, %v356_v24  ;;  %2053 = vperm.xlu0 %2718, %v3322_v50  }
  0xbb   :  { %v400_v21 = vmul.f32 1.442695, %v388_v25  ;;  %v402_v58 = vmul.f32 1.442695, %v389_v40  ;;  %v404_v52 = vmul.f32 1.442695, %v390_v10  ;;  %v293_v20 = vmul.f32 %v3207_v51, %v3303_v42 }
  0xbc   :  { %v406_v4 = vmul.f32 1.442695, %v391_v7  ;;  %v5502_v46 = vmov 14   ;;  %v255_v44 = vadd.f32 %v243_v33, %v3335_v35  ;;  %v392_v1 = vsub.f32 0.0, %v380_v57 }
  0xbd   :  { %2687 = vset.pattern.permute.xlu1 %v5502_v46  ;;  %2739 = vpow2.f32 %v400_v21  ;;  %v345_v51 = vmul.f32 %v3225_v28, %v3354_v56  ;;  %v393_v62 = vsub.f32 0.0, %v381_v60  ;;  %v296_v35 = vmul.f32 %v3219_v29, %v3303_v42 }
  0xbe   :  { %1172 = vperm.xlu1 %2687, %v2997_v17   ;;  %2741 = vpow2.f32 %v402_v58  ;;  %v3396_v12 = vpop.permute.xlu1 %450  ;;  %v394_v43 = vsub.f32 0.0, %v382_v37  ;;  %v305_v33 = vadd.f32 %v293_v20, %v253_v3  ;;  %v347_v19 = vmul.f32 %v3233_v26, %v3354_v56 }
  0xbf   :  { %2743 = vpow2.f32 %v404_v52  ;;  %v395_v32 = vsub.f32 0.0, %v383_v59  ;;  %v5503_v14 = vmov 8   ;;  %v256_v28 = vadd.f32 %v244_v5, %v3357_v61  ;;  %v3420_v5 = vpop.permute.xlu0 %752 }
  0xc0   :  { %2745 = vpow2.f32 %v406_v4  ;;  %2721 = vset.pattern.permute.xlu0 %v5503_v14  ;;  %v306_v9 = vadd.f32 %v294_v18, %v254_v2  ;;  %v348_v45 = vmul.f32 %v3245_v39, %v3354_v56  ;;  %v408_v29 = vmul.f32 1.442695, %v392_v1 }
  0xc1   :  { %2089 = vperm.xlu0 %2721, %v3258_v11   ;;  %v307_v27 = vadd.f32 %v295_v6, %v255_v44  ;;  %v357_v42 = vadd.f32 %v345_v51, %v305_v33  ;;  %v410_v47 = vmul.f32 1.442695, %v393_v62  ;;  %v308_v26 = vadd.f32 %v296_v35, %v256_v28 }
  0xc2   :  { %1176 = vperm.xlu1 %2687, %v2989_v15   ;;  %v3410_v31 = vpop.permute.xlu1 %460  ;;  %v358_v49 = vadd.f32 %v346_v38, %v306_v9  ;;  %v412_v48 = vmul.f32 1.442695, %v394_v43  ;;  %v414_v8 = vmul.f32 1.442695, %v395_v32  ;;  %2747 = vpow2.f32 %v408_v29 }
  0xc3   :  { %v359_v61 = vadd.f32 %v347_v19, %v307_v27  ;;  %v384_v13 = vadd.f32 %v374_v23, %v357_v42  ;;  %v360_v34 = vadd.f32 %v348_v45, %v308_v26  ;;  %v5504_v56 = vmov 15   ;;  %v3428_v62 = vpop.permute.xlu0 %804 }
  0xc4   :  { %v385_v39 = vadd.f32 %v374_v23, %v358_v49  ;;  %v5505_v54 = vmov 10   ;;  %2749 = vpow2.f32 %v410_v47  ;;  %v5506_v3 = vmov 11   ;;  %v5511_v49 = vld [vmem:[#allocation10_spill] sm:$0xff] }
  0xc5   :  { %2723 = vset.pattern.permute.xlu0 %v5505_v54  ;;  %v386_v0 = vadd.f32 %v374_v23, %v359_v61  ;;  %v387_v25 = vadd.f32 %v374_v23, %v360_v34  ;;  %2751 = vpow2.f32 %v412_v48  ;;  %v396_v57 = vsub.f32 0.0, %v384_v13  ;;  %v5523_v54 = vld [vmem:[#allocation14_spill] sm:$0xff] }
  0xc6   :  { %2689 = vset.pattern.permute.xlu1 %v5504_v56  ;;  %2173 = vperm.xlu0 %2723, %v3322_v50   ;;  %2753 = vpow2.f32 %v414_v8  ;;  %v397_v59 = vsub.f32 0.0, %v385_v39  ;;  %v5507_v1 = vmov 16  }
  0xc7   :  { %1224 = vperm.xlu1 %2689, %v2997_v17   ;;  %v2740_v24 = vpop.eup %2739  ;;  %v3418_v40 = vpop.permute.xlu1 %496  ;;  %v398_v52 = vsub.f32 0.0, %v386_v0  ;;  %v399_v2 = vsub.f32 0.0, %v387_v25  ;;  %v416_v4 = vmul.f32 1.442695, %v396_v57 }
  0xc8   :  { %v2742_v10 = vpop.eup %2741  ;;  %v424_v7 = vadd.f32 1.0, %v2740_v24  ;;  %v418_v44 = vmul.f32 1.442695, %v397_v59  ;;  %v3463_v61 = vpop.permute.xlu0 %856 }
  0xc9   :  { %v2744_v60 = vpop.eup %2743  ;;  %v425_v37 = vadd.f32 1.0, %v2742_v10  ;;  %v420_v18 = vmul.f32 1.442695, %v398_v52  ;;  %v422_v51 = vmul.f32 1.442695, %v399_v2 }
  0xca   :  { %v2746_v21 = vpop.eup %2745  ;;  %v426_v58 = vadd.f32 1.0, %v2744_v60  ;;  %2755 = vrcp.f32 %v424_v7  ;;  %2726 = vset.pattern.permute.xlu0 %v5506_v3  ;;  %v5516_v60 = vmov 17  }
  0xcb   :  { %1228 = vperm.xlu1 %2689, %v2989_v15   ;;  %v427_v23 = vadd.f32 1.0, %v2746_v21  ;;  %2757 = vrcp.f32 %v425_v37  ;;  %v3424_v20 = vpop.permute.xlu1 %500  ;;  %2209 = vperm.xlu0 %2726, %v3258_v11  }
  0xcc   :  { %2759 = vrcp.f32 %v426_v58  ;;  %v2748_v6 = vpop.eup %2747 }
  0xcd   :  { %2761 = vrcp.f32 %v427_v23  ;;  %v428_v38 = vadd.f32 1.0, %v2748_v6 }
  0xce   :  { %v2750_v35 = vpop.eup %2749  ;;  %2763 = vpow2.f32 %v416_v4 }
  0xcf   :  { %2691 = vset.pattern.permute.xlu1 %v5507_v1  ;;  %2728 = vset.pattern.permute.xlu0 %v5499_v53  ;;  %v2752_v33 = vpop.eup %2751  ;;  %2765 = vpow2.f32 %v418_v44  ;;  %v429_v28 = vadd.f32 1.0, %v2750_v35  ;;  %v5520_v35 = vld [vmem:[#allocation9_spill] sm:$0xff] }
  0xd0   :  { %1276 = vperm.xlu1 %2691, %v2997_v17   ;;  %v3432_v43 = vpop.permute.xlu1 %548  ;;  %2293 = vperm.xlu0 %2728, %v3322_v50   ;;  %v2754_v19 = vpop.eup %2753  ;;  %2767 = vpow2.f32 %v420_v18  ;;  %v3438_v9 = vadd.f32 1.0, %v2752_v33 }
  0xd1   :  { %2769 = vpow2.f32 %v422_v51  ;;  %v3440_v45 = vadd.f32 1.0, %v2754_v19 }
  0xd2   :  { %2771 = vrcp.f32 %v428_v38 }
  0xd3   :  { %2773 = vrcp.f32 %v429_v28 }
  0xd4   :  { %1280 = vperm.xlu1 %2691, %v2989_v15   ;;  %v3436_v32 = vpop.eup %2755  ;;  %v3442_v29 = vpop.permute.xlu1 %552  ;;  %2731 = vset.pattern.permute.xlu0 %v5502_v46  ;;  %2775 = vrcp.f32 %v3438_v9 }
  0xd5   :  { %5508 = vst [vmem:[#allocation16_spill] sm:$0xff] %v3442_v29  ;;  %v3445_v27 = vpop.eup %2757  ;;  %v3449_v42 = vrot.slane %v3436_v32, %v3161_v55  ;;  %v3453_v47 = vrot.slane %v3436_v32, %v3056_v36  ;;  %v3457_v26 = vrot.slane %v3436_v32, %v3072_v41  ;;  %v3461_v48 = vrot.slane %v3436_v32, %v5511_v49  ;;  %v3558_v46 = vpop.permute.xlu0 %908 }
  0xd6   :  { %2329 = vperm.xlu0 %2731, %v3258_v11   ;;  %v3466_v13 = vpop.eup %2759  ;;  %v3470_v8 = vrot.slane %v3445_v27, %v3161_v55  ;;  %v3474_v34 = vrot.slane %v3445_v27, %v3056_v36  ;;  %v3478_v39 = vrot.slane %v3445_v27, %v3072_v41  ;;  %v3482_v0 = vrot.slane %v3445_v27, %v5511_v49 }
  0xd7   :  { %5509 = vst [vmem:[#allocation17_spill] sm:$0xff] %v3449_v42  ;;  %5510 = vst [vmem:[#allocation18_spill] sm:$0xff] %v3453_v47  ;;  %v3484_v24 = vpop.eup %2761  ;;  %v3488_v25 = vrot.slane %v3466_v13, %v3161_v55  ;;  %v3492_v10 = vmul.f32 %v3449_v42, %v3348_v22  ;;  %v3496_v7 = vrot.slane %v3466_v13, %v3056_v36  ;;  %2777 = vrcp.f32 %v3440_v45 }
  0xd8   :  { %5512 = vst [vmem:[#allocation19_spill] sm:$0xff] %v3470_v8  ;;  %5513 = vst [vmem:[#allocation20_spill] sm:$0xff] %v3474_v34  ;;  %v479_v57 = vmul.f32 %v3453_v47, %v3396_v12  ;;  %2693 = vset.pattern.permute.xlu1 %v5516_v60  ;;  %v3503_v37 = vrot.slane %v3484_v24, %v3161_v55  ;;  %v3507_v59 = vmul.f32 %v3470_v8, %v3348_v22  ;;  %v2764_v18 = vpop.eup %2763 }
  0xd9   :  { %5514 = vst [vmem:[#allocation21_spill] sm:$0xff] %v3488_v25  ;;  %5515 = vst [vmem:[#allocation22_spill] sm:$0xff] %v3496_v7  ;;  %v3511_v21 = vrot.slane %v3484_v24, %v3056_v36  ;;  %v480_v58 = vmul.f32 %v3474_v34, %v3396_v12  ;;  %1328 = vperm.xlu1 %2693, %v2997_v17   ;;  %v3518_v52 = vmul.f32 %v3488_v25, %v3348_v22  ;;  %v3530_v44 = vpop.permute.xlu1 %600  ;;  %v3544_v19 = vpop.eup %2765 }
  0xda   :  { %5517 = vst [vmem:[#allocation23_spill] sm:$0xff] %v3503_v37  ;;  %v481_v23 = vmul.f32 %v3496_v7, %v3396_v12  ;;  %v3524_v2 = vrot.slane %v3466_v13, %v3072_v41  ;;  %v3528_v4 = vrot.slane %v3484_v24, %v3072_v41  ;;  %5519 = vst [vmem:[#allocation25_spill] sm:$0xff] %v3530_v44  ;;  %2733 = vset.pattern.permute.xlu0 %v5507_v1  ;;  %v3560_v53 = vpop.eup %2767 }
  0xdb   :  { %5518 = vst [vmem:[#allocation24_spill] sm:$0xff] %v3511_v21  ;;  %v3535_v6 = vmul.f32 %v3503_v37, %v3348_v22  ;;  %v482_v51 = vmul.f32 %v3511_v21, %v3396_v12  ;;  %v519_v38 = vmul.f32 %v3457_v26, %v5520_v35  ;;  %v520_v33 = vmul.f32 %v3478_v39, %v5520_v35  ;;  %v3567_v63 = vpop.eup %2769 }
  0xdc   :  { %2413 = vperm.xlu0 %2733, %v3322_v50   ;;  %v521_v1 = vmul.f32 %v3524_v2, %v5520_v35  ;;  %v522_v22 = vmul.f32 %v3528_v4, %v5520_v35  ;;  %v3552_v56 = vrot.slane %v3466_v13, %v5511_v49  ;;  %v3556_v12 = vrot.slane %v3484_v24, %v5511_v49 }
  0xdd   :  { %v531_v50 = vadd.f32 %v519_v38, %v479_v57  ;;  %v532_v3 = vadd.f32 %v520_v33, %v480_v58  ;;  %v571_v14 = vmul.f32 %v3461_v48, %v5523_v54  ;;  %v572_v35 = vmul.f32 %v3482_v0, %v5523_v54  ;;  %1332 = vperm.xlu1 %2693, %v2989_v15   ;;  %v3573_v57 = vpop.permute.xlu1 %604  ;;  %v3575_v58 = vpop.eup %2771 }
  0xde   :  { %5521 = vst [vmem:[#allocation9_spill] sm:$0xff] %v3552_v56  ;;  %5522 = vst [vmem:[#allocation26_spill] sm:$0xff] %v3556_v12  ;;  %v533_v16 = vadd.f32 %v521_v1, %v481_v23  ;;  %v534_v37 = vadd.f32 %v522_v22, %v482_v51  ;;  %v573_v25 = vmul.f32 %v3552_v56, %v5523_v54  ;;  %v5525_v1 = vld [vmem:[#allocation6_spill] sm:$0xff] }
  0xdf   :  { %v574_v8 = vmul.f32 %v3556_v12, %v5523_v54  ;;  %5524 = vst [vmem:[#allocation14_spill] sm:$0xff] %v3573_v57  ;;  %v583_v38 = vadd.f32 %v571_v14, %v531_v50  ;;  %v584_v33 = vadd.f32 %v572_v35, %v532_v3  ;;  %v3580_v23 = vsub.s32 6, %v5525_v1  ;;  %v5527_v54 = vld [vmem:[#allocation11_spill] sm:$0xff] }
  0xe0   :  { %2736 = vset.pattern.permute.xlu0 %v5516_v60  ;;  %v585_v42 = vadd.f32 %v573_v25, %v533_v16  ;;  %v3586_v51 = vrot.slane %v3436_v32, %v5527_v54  ;;  %v3590_v14 = vrot.slane %v3445_v27, %v5527_v54  ;;  %v3594_v16 = vrot.slane %v3466_v13, %v5527_v54  ;;  %v3613_v25 = vpop.permute.xlu0 %960 }
  0xe1   :  { %v586_v44 = vadd.f32 %v574_v8, %v534_v37  ;;  %5526 = vst [vmem:[#allocation27_spill] sm:$0xff] %v3580_v23  ;;  %2449 = vperm.xlu0 %2736, %v3258_v11   ;;  %v5531_v3 = vmov 18   ;;  %v3599_v28 = vrot.slane %v3484_v24, %v5527_v54  ;;  %v5533_v11 = vld [vmem:[#allocation13_spill] sm:$0xff]  ;;  %v5537_v37 = vld [vmem:[#allocation15_spill] sm:$0xff]  ;;  %v5539_v12 = vmov 0  }
  0xe2   :  { %5528 = vst [vmem:[#allocation28_spill] sm:$0xff] %v3586_v51  ;;  %5529 = vst [vmem:[#allocation29_spill] sm:$0xff] %v3590_v14  ;;  %2695 = vset.pattern.permute.xlu1 %v5531_v3  ;;  %v3603_v9 = vrot.slane %v3436_v32, %v5533_v11  ;;  %v3607_v45 = vrot.slane %v3445_v27, %v5533_v11  ;;  %v3611_v8 = vrot.slane %v3466_v13, %v5533_v11  ;;  %v3626_v60 = vpop.permute.xlu1 %652 }
  0xe3   :  { %5530 = vst [vmem:[#allocation30_spill] sm:$0xff] %v3594_v16  ;;  %5532 = vst [vmem:[#allocation31_spill] sm:$0xff] %v3599_v28  ;;  %1380 = vperm.xlu1 %2695, %v2997_v17   ;;  %v623_v22 = vmul.f32 %v3586_v51, %v5537_v37  ;;  %v624_v50 = vmul.f32 %v3590_v14, %v5537_v37  ;;  %v625_v35 = vmul.f32 %v3594_v16, %v5537_v37 }
  0xe4   :  { %5534 = vst [vmem:[#allocation32_spill] sm:$0xff] %v3603_v9  ;;  %5535 = vst [vmem:[#allocation33_spill] sm:$0xff] %v3607_v45  ;;  %v3624_v3 = vrot.slane %v3484_v24, %v5533_v11  ;;  %v626_v57 = vmul.f32 %v3599_v28, %v5537_v37  ;;  %v727_v29 = vmul.f32 %v3603_v9, %v3412_v30  ;;  %v3640_v37 = vsub.s32 7, %v5525_v1 }
  0xe5   :  { %5536 = vst [vmem:[#allocation34_spill] sm:$0xff] %v3611_v8  ;;  %5538 = vst [vmem:[#allocation15_spill] sm:$0xff] %v3626_v60  ;;  %v728_v51 = vmul.f32 %v3607_v45, %v3412_v30  ;;  %v729_v14 = vmul.f32 %v3611_v8, %v3412_v30  ;;  %2738 = vset.pattern.permute.xlu0 %v5539_v12  ;;  %v635_v16 = vadd.f32 %v623_v22, %v583_v38 }
  0xe6   :  { %v636_v56 = vadd.f32 %v624_v50, %v584_v33  ;;  %v637_v11 = vadd.f32 %v625_v35, %v585_v42  ;;  %v730_v60 = vmul.f32 %v3624_v3, %v3412_v30  ;;  %v638_v55 = vadd.f32 %v626_v57, %v586_v44  ;;  %5540 = vst [vmem:[#allocation35_spill] sm:$0xff] %v3640_v37  ;;  %v3646_v12 = vpop.permute.xlu1 %656 }
  0xe7   :  { %1384 = vperm.xlu1 %2695, %v2989_v15   ;;  %v432_v9 = vadd.f32 1.0, %v2764_v18  ;;  %v687_v45 = vadd.f32 %v3492_v10, %v635_v16  ;;  %v3651_v30 = vrot.slane %v3436_v32, %v3580_v23  ;;  %v3655_v44 = vrot.slane %v3445_v27, %v3580_v23  ;;  %v3661_v10 = vpop.permute.xlu0 %1012 }
  0xe8   :  { %v688_v28 = vadd.f32 %v3507_v59, %v636_v56  ;;  %v689_v8 = vadd.f32 %v3518_v52, %v637_v11  ;;  %v690_v42 = vadd.f32 %v3535_v6, %v638_v55  ;;  %v3659_v15 = vrot.slane %v3466_v13, %v3580_v23  ;;  %v3663_v56 = vpop.eup %2773 }
  0xe9   :  { %v739_v59 = vadd.f32 %v727_v29, %v687_v45  ;;  %v3667_v55 = vrot.slane %v3484_v24, %v3580_v23  ;;  %v3669_v6 = vpop.eup %2775  ;;  %v779_v38 = vmul.f32 %v3651_v30, %v3420_v5  ;;  %v780_v33 = vmul.f32 %v3655_v44, %v3420_v5 }
  0xea   :  { %v740_v52 = vadd.f32 %v728_v51, %v688_v28  ;;  %v741_v18 = vadd.f32 %v729_v14, %v689_v8  ;;  %v742_v57 = vadd.f32 %v730_v60, %v690_v42  ;;  %v781_v16 = vmul.f32 %v3659_v15, %v3420_v5  ;;  %v3678_v29 = vpop.eup %2777 }
  0xeb   :  { %v5541_v11 = vmov 19   ;;  %v433_v51 = vadd.f32 1.0, %v3544_v19  ;;  %v782_v14 = vmul.f32 %v3667_v55, %v3420_v5  ;;  %v434_v60 = vadd.f32 1.0, %v3560_v53  ;;  %v3685_v22 = vpop.permute.xlu1 %704  ;;  %v3699_v53 = vpop.permute.xlu0 %1064 }
  0xec   :  { %2697 = vset.pattern.permute.xlu1 %v5541_v11  ;;  %v791_v28 = vadd.f32 %v779_v38, %v739_v59  ;;  %v792_v45 = vadd.f32 %v780_v33, %v740_v52  ;;  %v793_v8 = vadd.f32 %v781_v16, %v741_v18  ;;  %2779 = vrcp.f32 %v432_v9 }
  0xed   :  { %1432 = vperm.xlu1 %2697, %v2997_v17   ;;  %v794_v50 = vadd.f32 %v782_v14, %v742_v57  ;;  %v3689_v35 = vrot.slane %v3436_v32, %v3640_v37  ;;  %v3693_v19 = vrot.slane %v3445_v27, %v3640_v37  ;;  %v3697_v17 = vrot.slane %v3466_v13, %v3640_v37  ;;  %v3709_v32 = vld [vmem:[%s5227_s3 + $0x10] sm:$0x3] }
  0xee   :  { %v435_v5 = vadd.f32 1.0, %v3567_v63  ;;  %2781 = vrcp.f32 %v433_v51  ;;  %v3704_v9 = vrot.slane %v3484_v24, %v3640_v37  ;;  %v3724_v59 = vrot.slane %v3575_v58, %v3056_v36 }
  0xef   :  { %5542 = vst [vmem:[#allocation36_spill] sm:$0xff] %v3689_v35  ;;  %5543 = vst [vmem:[#allocation37_spill] sm:$0xff] %v3693_v19  ;;  %2783 = vrcp.f32 %v434_v60  ;;  %v831_v27 = vmul.f32 %v3689_v35, %v3428_v62  ;;  %v832_v13 = vmul.f32 %v3693_v19, %v3428_v62  ;;  %v833_v63 = vmul.f32 %v3697_v17, %v3428_v62  ;;  %v3718_v42 = vpop.permute.xlu1 %708 }
  0xf0   :  { %5544 = vst [vmem:[#allocation38_spill] sm:$0xff] %v3697_v17  ;;  %5545 = vst [vmem:[#allocation39_spill] sm:$0xff] %v3704_v9  ;;  %v834_v24 = vmul.f32 %v3704_v9, %v3428_v62  ;;  %v3728_v52 = vrot.slane %v3663_v56, %v3056_v36  ;;  %v3732_v18 = vrot.slane %v3669_v6, %v3056_v36  ;;  %v5550_v60 = vmov 20  }
  0xf1   :  { %1436 = vperm.xlu1 %2697, %v3709_v32   ;;  %5546 = vst [vmem:[#allocation40_spill] sm:$0xff] %v3724_v59  ;;  %v843_v57 = vadd.f32 %v831_v27, %v791_v28  ;;  %v844_v38 = vadd.f32 %v832_v13, %v792_v45  ;;  %v845_v33 = vadd.f32 %v833_v63, %v793_v8  ;;  %2785 = vrcp.f32 %v435_v5  ;;  %v3749_v8 = vpop.permute.xlu0 %1116 }
  0xf2   :  { %5547 = vst [vmem:[#allocation41_spill] sm:$0xff] %v3728_v52  ;;  %5548 = vst [vmem:[#allocation42_spill] sm:$0xff] %v3732_v18  ;;  %v3736_v16 = vrot.slane %v3678_v29, %v3056_v36  ;;  %v846_v62 = vadd.f32 %v834_v24, %v794_v50  ;;  %v883_v11 = vmul.f32 %v3724_v59, %v3463_v61  ;;  %v3754_v50 = vld [vmem:[%s5227_s3 + $0x8] sm:$0xff] }
  0xf3   :  { %v884_v51 = vmul.f32 %v3728_v52, %v3463_v61  ;;  %v885_v14 = vmul.f32 %v3732_v18, %v3463_v61  ;;  %v487_v28 = vmul.f32 %v3453_v47, %v3410_v31  ;;  %v488_v27 = vmul.f32 %v3474_v34, %v3410_v31 }
  0xf4   :  { %5549 = vst [vmem:[#allocation43_spill] sm:$0xff] %v3736_v16  ;;  %v886_v45 = vmul.f32 %v3736_v16, %v3463_v61  ;;  %v895_v13 = vadd.f32 %v883_v11, %v843_v57  ;;  %v3759_v24 = vpop.permute.xlu1 %756  ;;  %v489_v61 = vmul.f32 %v3496_v7, %v3410_v31  ;;  %v3767_v1 = vmul.f32 %v3457_v26, %v3418_v40 }
  0xf5   :  { %2699 = vset.pattern.permute.xlu1 %v5550_v60  ;;  %v896_v5 = vadd.f32 %v884_v51, %v844_v38  ;;  %v897_v63 = vadd.f32 %v885_v14, %v845_v33  ;;  %v490_v60 = vmul.f32 %v3511_v21, %v3410_v31  ;;  %v527_v16 = vmul.f32 %v3457_v26, %v3424_v20  ;;  %v3826_v59 = vpop.permute.xlu0 %1168 }
  0xf6   :  { %1484 = vperm.xlu1 %2699, %v3754_v50   ;;  %5551 = vst [vmem:[#allocation44_spill] sm:$0xff] %v3767_v1  ;;  %v898_v47 = vadd.f32 %v886_v45, %v846_v62  ;;  %v3773_v57 = vrot.slane %v3575_v58, %v3072_v41  ;;  %v3777_v38 = vrot.slane %v3663_v56, %v3072_v41  ;;  %v3783_v31 = vpop.eup %2779 }
  0xf7   :  { %v3781_v33 = vrot.slane %v3669_v6, %v3072_v41  ;;  %v3787_v62 = vrot.slane %v3678_v29, %v3072_v41  ;;  %v3791_v26 = vrot.slane %v3575_v58, %v5511_v49  ;;  %v3795_v11 = vrot.slane %v3663_v56, %v5511_v49 }
  0xf8   :  { %5552 = vst [vmem:[#allocation45_spill] sm:$0xff] %v3773_v57  ;;  %5553 = vst [vmem:[#allocation46_spill] sm:$0xff] %v3777_v38  ;;  %v3799_v51 = vrot.slane %v3669_v6, %v5511_v49  ;;  %v3802_v14 = vpop.eup %2781  ;;  %v935_v45 = vmul.f32 %v3773_v57, %v3558_v46  ;;  %v936_v1 = vmul.f32 %v3777_v38, %v3558_v46  ;;  %v3814_v34 = vpop.permute.xlu1 %760 }
  0xf9   :  { %5554 = vst [vmem:[#allocation47_spill] sm:$0xff] %v3781_v33  ;;  %5555 = vst [vmem:[#allocation48_spill] sm:$0xff] %v3787_v62  ;;  %v937_v21 = vmul.f32 %v3781_v33, %v3558_v46  ;;  %v3812_v7 = vrot.slane %v3678_v29, %v5511_v49  ;;  %v3816_v18 = vpop.eup %2783  ;;  %v938_v52 = vmul.f32 %v3787_v62, %v3558_v46 }
  0xfa   :  { %5556 = vst [vmem:[#allocation49_spill] sm:$0xff] %v3791_v26  ;;  %5557 = vst [vmem:[#allocation50_spill] sm:$0xff] %v3795_v11  ;;  %1488 = vperm.xlu1 %2699, %v3709_v32   ;;  %v987_v57 = vmul.f32 %v3791_v26, %v3613_v25  ;;  %v988_v38 = vmul.f32 %v3795_v11, %v3613_v25  ;;  %v989_v33 = vmul.f32 %v3799_v51, %v3613_v25 }
  0xfb   :  { %5558 = vst [vmem:[#allocation51_spill] sm:$0xff] %v3799_v51  ;;  %5559 = vst [vmem:[#allocation52_spill] sm:$0xff] %v3812_v7  ;;  %v947_v9 = vadd.f32 %v935_v45, %v895_v13  ;;  %v948_v17 = vadd.f32 %v936_v1, %v896_v5  ;;  %v949_v19 = vadd.f32 %v937_v21, %v897_v63  ;;  %v5561_v51 = vmov 21  }
  0xfc   :  { %v990_v35 = vmul.f32 %v3812_v7, %v3613_v25  ;;  %v3832_v46 = vmul.f32 %v3478_v39, %v3418_v40  ;;  %v528_v26 = vmul.f32 %v3478_v39, %v3424_v20  ;;  %v529_v11 = vmul.f32 %v3524_v2, %v3424_v20  ;;  %v3842_v25 = vpop.eup %2785 }
  0xfd   :  { %v950_v62 = vadd.f32 %v938_v52, %v898_v47  ;;  %v530_v1 = vmul.f32 %v3528_v4, %v3424_v20  ;;  %v999_v21 = vadd.f32 %v987_v57, %v947_v9  ;;  %v1000_v13 = vadd.f32 %v988_v38, %v948_v17  ;;  %v3856_v20 = vpop.permute.xlu1 %808 }
  0xfe   :  { %5560 = vst [vmem:[#allocation53_spill] sm:$0xff] %v3832_v46  ;;  %2701 = vset.pattern.permute.xlu1 %v5561_v51  ;;  %v1001_v5 = vadd.f32 %v989_v33, %v949_v19  ;;  %v3846_v39 = vrot.slane %v3575_v58, %v5527_v54  ;;  %v3850_v47 = vrot.slane %v3663_v56, %v5527_v54  ;;  %v5587_v46 = vld [vmem:[#allocation25_spill] sm:$0xff] }
  0xff   :  { %1536 = vperm.xlu1 %2701, %v3754_v50   ;;  %v1002_v63 = vadd.f32 %v990_v35, %v950_v62  ;;  %v3854_v52 = vrot.slane %v3669_v6, %v5527_v54  ;;  %v3860_v19 = vmul.f32 %v3524_v2, %v3418_v40  ;;  %v3864_v35 = vmul.f32 %v3528_v4, %v3418_v40  ;;  %v3876_v62 = vpop.permute.xlu0 %1220 }
 0x100   :  { %5562 = vst [vmem:[#allocation54_spill] sm:$0xff] %v3846_v39  ;;  %5563 = vst [vmem:[#allocation55_spill] sm:$0xff] %v3850_v47  ;;  %v539_v17 = vadd.f32 %v527_v16, %v487_v28  ;;  %v3868_v9 = vrot.slane %v3678_v29, %v5527_v54  ;;  %v540_v57 = vadd.f32 %v528_v26, %v488_v27 }
 0x101   :  { %5564 = vst [vmem:[#allocation56_spill] sm:$0xff] %v3854_v52  ;;  %5565 = vst [vmem:[#allocation57_spill] sm:$0xff] %v3860_v19  ;;  %v1039_v38 = vmul.f32 %v3846_v39, %v3661_v10  ;;  %v1040_v33 = vmul.f32 %v3850_v47, %v3661_v10  ;;  %v1041_v2 = vmul.f32 %v3854_v52, %v3661_v10  ;;  %v3889_v52 = vpop.permute.xlu1 %812  ;;  %v5580_v39 = vmov 22  }
 0x102   :  { %5566 = vst [vmem:[#allocation58_spill] sm:$0xff] %v3864_v35  ;;  %5567 = vst [vmem:[#allocation59_spill] sm:$0xff] %v3868_v9  ;;  %v541_v51 = vadd.f32 %v529_v11, %v489_v61  ;;  %v542_v40 = vadd.f32 %v530_v1, %v490_v60  ;;  %v3880_v4 = vmul.f32 %v3461_v48, %v3432_v43  ;;  %v5570_v60 = vld [vmem:[#allocation12_spill] sm:$0xff] }
 0x103   :  { %v1042_v16 = vmul.f32 %v3868_v9, %v3661_v10  ;;  %1540 = vperm.xlu1 %2701, %v3709_v32   ;;  %v3887_v28 = vmul.f32 %v3482_v0, %v3432_v43  ;;  %v1051_v27 = vadd.f32 %v1039_v38, %v999_v21  ;;  %v1052_v26 = vadd.f32 %v1040_v33, %v1000_v13  ;;  %v5574_v9 = vld [vmem:[#allocation9_spill] sm:$0xff]  ;;  %v5576_v13 = vld [vmem:[#allocation26_spill] sm:$0xff] }
 0x104   :  { %5568 = vst [vmem:[#allocation60_spill] sm:$0xff] %v3880_v4  ;;  %v1053_v45 = vadd.f32 %v1041_v2, %v1001_v5  ;;  %v3893_v11 = vrot.slane %v3575_v58, %v5570_v60  ;;  %v3897_v1 = vrot.slane %v3663_v56, %v5570_v60  ;;  %v3901_v10 = vrot.slane %v3669_v6, %v5570_v60 }
 0x105   :  { %5569 = vst [vmem:[#allocation61_spill] sm:$0xff] %v3887_v28  ;;  %v1054_v61 = vadd.f32 %v1042_v16, %v1002_v63  ;;  %v3905_v21 = vmul.f32 %v5574_v9, %v3432_v43  ;;  %v3909_v5 = vmul.f32 %v5576_v13, %v3432_v43  ;;  %v5578_v63 = vld [vmem:[#allocation16_spill] sm:$0xff]  ;;  %v3915_v33 = vrot.slane %v3678_v29, %v5570_v60 }
 0x106   :  { %5571 = vst [vmem:[#allocation62_spill] sm:$0xff] %v3893_v11  ;;  %5572 = vst [vmem:[#allocation63_spill] sm:$0xff] %v3897_v1  ;;  %v579_v38 = vmul.f32 %v3461_v48, %v5578_v63  ;;  %v580_v2 = vmul.f32 %v3482_v0, %v5578_v63  ;;  %v1091_v16 = vmul.f32 %v3893_v11, %v3699_v53 }
 0x107   :  { %5573 = vst [vmem:[#allocation64_spill] sm:$0xff] %v3901_v10  ;;  %5575 = vst [vmem:[#allocation9_spill] sm:$0xff] %v3905_v21  ;;  %v1092_v47 = vmul.f32 %v3897_v1, %v3699_v53  ;;  %v1093_v43 = vmul.f32 %v3901_v10, %v3699_v53  ;;  %2703 = vset.pattern.permute.xlu1 %v5580_v39  ;;  %v1094_v48 = vmul.f32 %v3915_v33, %v3699_v53  ;;  %v3940_v1 = vpop.permute.xlu0 %1272 }
 0x108   :  { %5577 = vst [vmem:[#allocation26_spill] sm:$0xff] %v3909_v5  ;;  %5579 = vst [vmem:[#allocation16_spill] sm:$0xff] %v3915_v33  ;;  %v5581_v5 = vld [vmem:[#allocation13_spill] sm:$0xff]  ;;  %1588 = vperm.xlu1 %2703, %v3754_v50   ;;  %v1103_v39 = vadd.f32 %v1091_v16, %v1051_v27  ;;  %v3947_v33 = vpop.permute.xlu1 %860  ;;  %v582_v27 = vmul.f32 %v5576_v13, %v5578_v63 }
 0x109   :  { %v3930_v21 = vrot.slane %v3575_v58, %v5581_v5  ;;  %v3934_v0 = vrot.slane %v3663_v56, %v5581_v5  ;;  %v3938_v11 = vrot.slane %v3669_v6, %v5581_v5  ;;  %v1104_v10 = vadd.f32 %v1092_v47, %v1052_v26  ;;  %5586 = vst [vmem:[#allocation69_spill] sm:$0xff] %v3947_v33 }
 0x10a   :  { %v1105_v28 = vadd.f32 %v1093_v43, %v1053_v45  ;;  %v3945_v53 = vrot.slane %v3678_v29, %v5581_v5  ;;  %v1106_v4 = vadd.f32 %v1094_v48, %v1054_v61  ;;  %v581_v47 = vmul.f32 %v5574_v9, %v5578_v63  ;;  %v5597_v63 = vld [vmem:[#allocation31_spill] sm:$0xff] }
 0x10b   :  { %5582 = vst [vmem:[#allocation65_spill] sm:$0xff] %v3930_v21  ;;  %5583 = vst [vmem:[#allocation66_spill] sm:$0xff] %v3934_v0  ;;  %v1143_v35 = vmul.f32 %v3930_v21, %v3749_v8  ;;  %v1144_v7 = vmul.f32 %v3934_v0, %v3749_v8  ;;  %v1145_v19 = vmul.f32 %v3938_v11, %v3749_v8 }
 0x10c   :  { %5584 = vst [vmem:[#allocation67_spill] sm:$0xff] %v3938_v11  ;;  %5585 = vst [vmem:[#allocation68_spill] sm:$0xff] %v3945_v53  ;;  %v591_v26 = vadd.f32 %v579_v38, %v539_v17  ;;  %v1146_v45 = vmul.f32 %v3945_v53, %v3749_v8  ;;  %v592_v61 = vadd.f32 %v580_v2, %v540_v57  ;;  %1592 = vperm.xlu1 %2703, %v3709_v32   ;;  %v5588_v11 = vld [vmem:[#allocation28_spill] sm:$0xff]  ;;  %v3966_v33 = vpop.permute.xlu1 %864  ;;  %v5589_v17 = vld [vmem:[#allocation29_spill] sm:$0xff] }
 0x10d   :  { %v1155_v16 = vadd.f32 %v1143_v35, %v1103_v39  ;;  %v1156_v43 = vadd.f32 %v1144_v7, %v1104_v10  ;;  %v1157_v48 = vadd.f32 %v1145_v19, %v1105_v28  ;;  %v593_v0 = vadd.f32 %v581_v47, %v541_v51  ;;  %v3984_v35 = vpop.permute.xlu0 %1324  ;;  %v5594_v57 = vld [vmem:[#allocation14_spill] sm:$0xff] }
 0x10e   :  { %v594_v21 = vadd.f32 %v582_v27, %v542_v40  ;;  %v3964_v5 = vmul.f32 %v5588_v11, %v5587_v46  ;;  %v1158_v9 = vadd.f32 %v1146_v45, %v1106_v4  ;;  %v3970_v13 = vmul.f32 %v5589_v17, %v5587_v46  ;;  %v5595_v4 = vld [vmem:[#allocation30_spill] sm:$0xff] }
 0x10f   :  { %v3974_v8 = vrot.slane %v3575_v58, %v3580_v23  ;;  %v3978_v7 = vrot.slane %v3663_v56, %v3580_v23  ;;  %v3982_v19 = vrot.slane %v3669_v6, %v3580_v23  ;;  %v631_v51 = vmul.f32 %v5588_v11, %v5594_v57  ;;  %v52_v53 = vld [vmem:[%s5231_s7 + $0x8] sm:$0xf] }
 0x110   :  { %5590 = vst [vmem:[#allocation25_spill] sm:$0xff] %v3970_v13  ;;  %v632_v40 = vmul.f32 %v5589_v17, %v5594_v57  ;;  %v633_v28 = vmul.f32 %v5595_v4, %v5594_v57  ;;  %v3994_v10 = vrot.slane %v3678_v29, %v3580_v23  ;;  %v634_v38 = vmul.f32 %v5597_v63, %v5594_v57 }
 0x111   :  { %5591 = vst [vmem:[#allocation28_spill] sm:$0xff] %v3974_v8  ;;  %5592 = vst [vmem:[#allocation29_spill] sm:$0xff] %v3978_v7  ;;  %v1195_v2 = vmul.f32 %v3974_v8, %v3826_v59  ;;  %v1196_v39 = vmul.f32 %v3978_v7, %v3826_v59  ;;  %v1197_v11 = vmul.f32 %v3982_v19, %v3826_v59  ;;  %v5598_v47 = vmov 23   ;;  %2521 = vperm.xlu0 %2738, %v52_v53  }
 0x112   :  { %5593 = vst [vmem:[#allocation70_spill] sm:$0xff] %v3982_v19  ;;  %5596 = vst [vmem:[#allocation14_spill] sm:$0xff] %v3994_v10  ;;  %2706 = vset.pattern.permute.xlu1 %v5598_v47  ;;  %v1198_v27 = vmul.f32 %v3994_v10, %v3826_v59  ;;  %v4009_v45 = vrot.slane %v3575_v58, %v3640_v37  ;;  %v4013_v17 = vrot.slane %v3663_v56, %v3640_v37  ;;  %v4024_v10 = vpop.permute.xlu1 %912 }
 0x113   :  { %v4017_v57 = vrot.slane %v3669_v6, %v3640_v37  ;;  %1640 = vperm.xlu1 %2706, %v3754_v50   ;;  %v1207_v19 = vadd.f32 %v1195_v2, %v1155_v16  ;;  %v1208_v7 = vadd.f32 %v1196_v39, %v1156_v43  ;;  %v1209_v47 = vadd.f32 %v1197_v11, %v1157_v48  ;;  %v5603_v50 = vld [vmem:[#allocation17_spill] sm:$0xff]  ;;  %v5604_v43 = vld [vmem:[#allocation19_spill] sm:$0xff]  ;;  %v4040_v39 = vpop.permute.xlu0 %1376 }
 0x114   :  { %5599 = vst [vmem:[#allocation30_spill] sm:$0xff] %v4009_v45  ;;  %5600 = vst [vmem:[#allocation31_spill] sm:$0xff] %v4013_v17  ;;  %v4022_v59 = vrot.slane %v3678_v29, %v3640_v37  ;;  %v1210_v58 = vadd.f32 %v1198_v27, %v1158_v9  ;;  %v1247_v56 = vmul.f32 %v4009_v45, %v3876_v62  ;;  %v5605_v29 = vld [vmem:[#allocation21_spill] sm:$0xff]  ;;  %v5606_v11 = vld [vmem:[#allocation23_spill] sm:$0xff] }
 0x115   :  { %5601 = vst [vmem:[#allocation71_spill] sm:$0xff] %v4017_v57  ;;  %v1248_v8 = vmul.f32 %v4013_v17, %v3876_v62  ;;  %v1249_v6 = vmul.f32 %v4017_v57, %v3876_v62  ;;  %v683_v16 = vmul.f32 %v5603_v50, %v3646_v12  ;;  %v684_v48 = vmul.f32 %v5604_v43, %v3646_v12 }
 0x116   :  { %5602 = vst [vmem:[#allocation72_spill] sm:$0xff] %v4022_v59  ;;  %v685_v2 = vmul.f32 %v5605_v29, %v3646_v12  ;;  %v1250_v9 = vmul.f32 %v4022_v59, %v3876_v62  ;;  %v686_v27 = vmul.f32 %v5606_v11, %v3646_v12  ;;  %v1259_v17 = vadd.f32 %v1247_v56, %v1207_v19  ;;  %v4056_v12 = vpop.permute.xlu1 %916  ;;  %v5607_v19 = vld [vmem:[#allocation15_spill] sm:$0xff] }
 0x117   :  { %v1260_v45 = vadd.f32 %v1248_v8, %v1208_v7  ;;  %v1261_v57 = vadd.f32 %v1249_v6, %v1209_v47  ;;  %1644 = vperm.xlu1 %2706, %v3709_v32   ;;  %v4050_v37 = vmul.f32 %v5595_v4, %v5587_v46  ;;  %v4054_v62 = vmul.f32 %v5597_v63, %v5587_v46  ;;  %v45_v4 = vld [vmem:[%s5228_s4 + $0x8] sm:$0xff] }
 0x118   :  { %v643_v59 = vadd.f32 %v631_v51, %v591_v26  ;;  %v1262_v13 = vadd.f32 %v1250_v9, %v1210_v58  ;;  %v644_v8 = vadd.f32 %v632_v40, %v592_v61  ;;  %v645_v7 = vadd.f32 %v633_v28, %v593_v0  ;;  %v5608_v40 = vld [vmem:[#allocation32_spill] sm:$0xff]  ;;  %v5610_v58 = vld [vmem:[#allocation33_spill] sm:$0xff]  ;;  %v5611_v6 = vld [vmem:[#allocation34_spill] sm:$0xff] }
 0x119   :  { %v646_v32 = vadd.f32 %v634_v38, %v594_v21  ;;  %v4060_v47 = vmul.f32 %v5603_v50, %v5607_v19  ;;  %v4067_v46 = vmul.f32 %v5604_v43, %v5607_v19  ;;  %v4071_v26 = vmul.f32 %v5605_v29, %v5607_v19 }
 0x11a   :  { %v4075_v0 = vmul.f32 %v5606_v11, %v5607_v19  ;;  %v695_v21 = vadd.f32 %v683_v16, %v643_v59  ;;  %v696_v53 = vadd.f32 %v684_v48, %v644_v8  ;;  %v697_v61 = vadd.f32 %v685_v2, %v645_v7  ;;  %v4096_v16 = vpop.permute.xlu0 %1428  ;;  %v4110_v9 = vpop.permute.xlu1 %964  ;;  %v46_v11 = vld [vmem:[%s5228_s4 + $0x10] sm:$0x3] }
 0x11b   :  { %v698_v51 = vadd.f32 %v686_v27, %v646_v32  ;;  %v735_v28 = vmul.f32 %v5608_v40, %v3718_v42  ;;  %v5609_v63 = vmov 0   ;;  %v4082_v38 = vmul.f32 %v5608_v40, %v3685_v22 }
 0x11c   :  { %2707 = vset.pattern.permute.xlu1 %v5609_v63  ;;  %v4086_v56 = vmul.f32 %v5610_v58, %v3685_v22  ;;  %v4090_v50 = vmul.f32 %v5611_v6, %v3685_v22  ;;  %v4094_v59 = vrot.slane %v3783_v31, %v3056_v36  ;;  %v4100_v43 = vmul.f32 %v3624_v3, %v3685_v22 }
 0x11d   :  { %1694 = vperm.xlu1 %2707, %v45_v4   ;;  %v736_v48 = vmul.f32 %v5610_v58, %v3718_v42  ;;  %v737_v29 = vmul.f32 %v5611_v6, %v3718_v42  ;;  %v4108_v2 = vrot.slane %v3802_v14, %v3056_v36  ;;  %v738_v22 = vmul.f32 %v3624_v3, %v3718_v42 }
 0x11e   :  { %5612 = vst [vmem:[#allocation17_spill] sm:$0xff] %v4094_v59  ;;  %v4119_v27 = vrot.slane %v3816_v18, %v3056_v36  ;;  %v4123_v8 = vrot.slane %v3842_v25, %v3056_v36  ;;  %v1299_v7 = vmul.f32 %v4094_v59, %v3940_v1  ;;  %v747_v32 = vadd.f32 %v735_v28, %v695_v21 }
 0x11f   :  { %5613 = vst [vmem:[#allocation19_spill] sm:$0xff] %v4108_v2  ;;  %v1300_v19 = vmul.f32 %v4108_v2, %v3940_v1  ;;  %v4131_v4 = vrot.slane %v3783_v31, %v3072_v41  ;;  %v4135_v3 = vrot.slane %v3802_v14, %v3072_v41  ;;  %v4143_v21 = vrot.slane %v3816_v18, %v3072_v41  ;;  %v4155_v2 = vpop.permute.xlu0 %1480 }
 0x120   :  { %5614 = vst [vmem:[#allocation21_spill] sm:$0xff] %v4119_v27  ;;  %5615 = vst [vmem:[#allocation23_spill] sm:$0xff] %v4123_v8  ;;  %v1301_v42 = vmul.f32 %v4119_v27, %v3940_v1  ;;  %v1302_v40 = vmul.f32 %v4123_v8, %v3940_v1  ;;  %v1311_v58 = vadd.f32 %v1299_v7, %v1259_v17  ;;  %v4153_v27 = vpop.permute.xlu1 %968 }
 0x121   :  { %5616 = vst [vmem:[#allocation15_spill] sm:$0xff] %v4131_v4  ;;  %5617 = vst [vmem:[#allocation32_spill] sm:$0xff] %v4135_v3  ;;  %1699 = vperm.xlu1 %2707, %v46_v11   ;;  %v1312_v28 = vadd.f32 %v1300_v19, %v1260_v45  ;;  %v4147_v6 = vrot.slane %v3842_v25, %v3072_v41  ;;  %v1351_v36 = vmul.f32 %v4131_v4, %v3984_v35 }
 0x122   :  { %5618 = vst [vmem:[#allocation33_spill] sm:$0xff] %v4143_v21  ;;  %v1352_v63 = vmul.f32 %v4135_v3, %v3984_v35  ;;  %v748_v1 = vadd.f32 %v736_v48, %v696_v53  ;;  %v749_v17 = vadd.f32 %v737_v29, %v697_v61  ;;  %v750_v7 = vadd.f32 %v738_v22, %v698_v51 }
 0x123   :  { %5619 = vst [vmem:[#allocation34_spill] sm:$0xff] %v4147_v6  ;;  %v1313_v8 = vadd.f32 %v1301_v42, %v1261_v57  ;;  %v1314_v11 = vadd.f32 %v1302_v40, %v1262_v13  ;;  %v1353_v45 = vmul.f32 %v4143_v21, %v3984_v35  ;;  %v1354_v19 = vmul.f32 %v4147_v6, %v3984_v35  ;;  %v4182_v35 = vld [vmem:[%s5229_s5 + $0x8] sm:$0xf]  ;;  %v5632_v6 = vld [vmem:[#allocation36_spill] sm:$0xff] }
 0x124   :  { %v787_v41 = vmul.f32 %v3651_v30, %v3814_v34  ;;  %v4165_v3 = vmul.f32 %v3651_v30, %v3759_v24  ;;  %v4169_v53 = vmul.f32 %v3655_v44, %v3759_v24  ;;  %v4173_v13 = vmul.f32 %v3659_v15, %v3759_v24 }
 0x125   :  { %v4177_v57 = vmul.f32 %v3667_v55, %v3759_v24  ;;  %1781 = vperm.xlu1 %2707, %v4182_v35   ;;  %v1363_v30 = vadd.f32 %v1351_v36, %v1311_v58  ;;  %v1364_v61 = vadd.f32 %v1352_v63, %v1312_v28  ;;  %v788_v51 = vmul.f32 %v3655_v44, %v3814_v34  ;;  %v4203_v63 = vpop.permute.xlu1 %1016 }
 0x126   :  { %v789_v48 = vmul.f32 %v3659_v15, %v3814_v34  ;;  %v790_v29 = vmul.f32 %v3667_v55, %v3814_v34  ;;  %v4193_v24 = vrot.slane %v3783_v31, %v5511_v49  ;;  %v4197_v22 = vrot.slane %v3802_v14, %v5511_v49  ;;  %5624 = vst [vmem:[#allocation77_spill] sm:$0xff] %v4203_v63 }
 0x127   :  { %5620 = vst [vmem:[#allocation73_spill] sm:$0xff] %v4177_v57  ;;  %v4201_v36 = vrot.slane %v3816_v18, %v5511_v49  ;;  %v1365_v44 = vadd.f32 %v1353_v45, %v1313_v8  ;;  %v1366_v42 = vadd.f32 %v1354_v19, %v1314_v11  ;;  %v799_v15 = vadd.f32 %v787_v41, %v747_v32  ;;  %v4219_v8 = vpop.permute.xlu0 %1532 }
 0x128   :  { %5621 = vst [vmem:[#allocation74_spill] sm:$0xff] %v4193_v24  ;;  %5622 = vst [vmem:[#allocation75_spill] sm:$0xff] %v4197_v22  ;;  %v4207_v34 = vrot.slane %v3842_v25, %v5511_v49  ;;  %v1403_v55 = vmul.f32 %v4193_v24, %v4040_v39  ;;  %v1404_v40 = vmul.f32 %v4197_v22, %v4040_v39  ;;  %v5627_v41 = vmov 1  }
 0x129   :  { %5623 = vst [vmem:[#allocation76_spill] sm:$0xff] %v4201_v36  ;;  %v1405_v58 = vmul.f32 %v4201_v36, %v4040_v39  ;;  %v4217_v28 = vrot.slane %v3783_v31, %v5527_v54  ;;  %2709 = vset.pattern.permute.xlu1 %v5627_v41  ;;  %v4226_v11 = vrot.slane %v3802_v14, %v5527_v54 }
 0x12a   :  { %5625 = vst [vmem:[#allocation78_spill] sm:$0xff] %v4207_v34  ;;  %v1406_v32 = vmul.f32 %v4207_v34, %v4040_v39  ;;  %v4230_v45 = vrot.slane %v3816_v18, %v5527_v54  ;;  %v4234_v19 = vrot.slane %v3842_v25, %v5527_v54  ;;  %1813 = vperm.xlu1 %2709, %v4182_v35   ;;  %v4239_v34 = vpop.permute.xlu1 %1020 }
 0x12b   :  { %5626 = vst [vmem:[#allocation79_spill] sm:$0xff] %v4217_v28  ;;  %5628 = vst [vmem:[#allocation80_spill] sm:$0xff] %v4226_v11  ;;  %v800_v49 = vadd.f32 %v788_v51, %v748_v1  ;;  %v801_v36 = vadd.f32 %v789_v48, %v749_v17  ;;  %v802_v41 = vadd.f32 %v790_v29, %v750_v7  ;;  %v5633_v17 = vld [vmem:[#allocation37_spill] sm:$0xff]  ;;  %v5634_v51 = vld [vmem:[#allocation38_spill] sm:$0xff] }
 0x12c   :  { %5629 = vst [vmem:[#allocation81_spill] sm:$0xff] %v4230_v45  ;;  %5630 = vst [vmem:[#allocation82_spill] sm:$0xff] %v4234_v19  ;;  %v1455_v39 = vmul.f32 %v4217_v28, %v4096_v16  ;;  %v1456_v22 = vmul.f32 %v4226_v11, %v4096_v16  ;;  %v1457_v24 = vmul.f32 %v4230_v45, %v4096_v16  ;;  %v5635_v29 = vld [vmem:[#allocation39_spill] sm:$0xff] }
 0x12d   :  { %5631 = vst [vmem:[#allocation83_spill] sm:$0xff] %v4239_v34  ;;  %v1458_v54 = vmul.f32 %v4234_v19, %v4096_v16  ;;  %v839_v21 = vmul.f32 %v5632_v6, %v3889_v52  ;;  %v1415_v1 = vadd.f32 %v1403_v55, %v1363_v30  ;;  %v840_v7 = vmul.f32 %v5633_v17, %v3889_v52 }
 0x12e   :  { %v841_v48 = vmul.f32 %v5634_v51, %v3889_v52  ;;  %v842_v28 = vmul.f32 %v5635_v29, %v3889_v52  ;;  %v1416_v11 = vadd.f32 %v1404_v40, %v1364_v61  ;;  %v1417_v4 = vadd.f32 %v1405_v58, %v1365_v44  ;;  %v4272_v44 = vpop.permute.xlu0 %1584 }
 0x12f   :  { %v1418_v59 = vadd.f32 %v1406_v32, %v1366_v42  ;;  %v4257_v45 = vmul.f32 %v5632_v6, %v3856_v20  ;;  %v5637_v16 = vmov 2   ;;  %v4262_v30 = vmul.f32 %v5633_v17, %v3856_v20  ;;  %v4277_v6 = vld [vmem:[%s5229_s5] sm:$0xff]  ;;  %v4280_v17 = vpop.permute.xlu1 %1068 }
 0x130   :  { %2710 = vset.pattern.permute.xlu1 %v5637_v16  ;;  %v4266_v55 = vmul.f32 %v5634_v51, %v3856_v20  ;;  %v4270_v52 = vmul.f32 %v5635_v29, %v3856_v20  ;;  %v1467_v61 = vadd.f32 %v1455_v39, %v1415_v1  ;;  %5641 = vst [vmem:[#allocation84_spill] sm:$0xff] %v4277_v6  ;;  %5642 = vst [vmem:[#allocation85_spill] sm:$0xff] %v4280_v17  ;;  %v5645_v29 = vld [vmem:[#allocation40_spill] sm:$0xff] }
 0x131   :  { %5636 = vst [vmem:[#allocation36_spill] sm:$0xff] %v4257_v45  ;;  %5638 = vst [vmem:[#allocation37_spill] sm:$0xff] %v4262_v30  ;;  %1849 = vperm.xlu1 %2710, %v4277_v6   ;;  %v1468_v42 = vadd.f32 %v1456_v22, %v1416_v11  ;;  %v1469_v40 = vadd.f32 %v1457_v24, %v1417_v4  ;;  %v1470_v58 = vadd.f32 %v1458_v54, %v1418_v59  ;;  %v5646_v4 = vld [vmem:[#allocation41_spill] sm:$0xff]  ;;  %v5647_v59 = vld [vmem:[#allocation42_spill] sm:$0xff]  ;;  %v5653_v11 = vmov 3  }
 0x132   :  { %5639 = vst [vmem:[#allocation38_spill] sm:$0xff] %v4266_v55  ;;  %5640 = vst [vmem:[#allocation39_spill] sm:$0xff] %v4270_v52  ;;  %v851_v32 = vadd.f32 %v839_v21, %v799_v15  ;;  %v852_v51 = vadd.f32 %v840_v7, %v800_v49  ;;  %v853_v16 = vadd.f32 %v841_v48, %v801_v36  ;;  %v5650_v22 = vld [vmem:[#allocation69_spill] sm:$0xff]  ;;  %v5652_v15 = vld [vmem:[#allocation43_spill] sm:$0xff] }
 0x133   :  { %v854_v20 = vadd.f32 %v842_v28, %v802_v41  ;;  %v4284_v39 = vrot.slane %v3783_v31, %v5570_v60  ;;  %v4288_v1 = vrot.slane %v3802_v14, %v5570_v60  ;;  %v891_v19 = vmul.f32 %v5645_v29, %v3966_v33  ;;  %v4314_v34 = vpop.permute.xlu1 %1072 }
 0x134   :  { %v892_v54 = vmul.f32 %v5646_v4, %v3966_v33  ;;  %v893_v21 = vmul.f32 %v5647_v59, %v3966_v33  ;;  %v4298_v49 = vrot.slane %v3816_v18, %v5570_v60  ;;  %v4302_v24 = vrot.slane %v3842_v25, %v5570_v60  ;;  %5654 = vst [vmem:[#allocation69_spill] sm:$0xff] %v4314_v34 }
 0x135   :  { %5643 = vst [vmem:[#allocation86_spill] sm:$0xff] %v4284_v39  ;;  %5644 = vst [vmem:[#allocation87_spill] sm:$0xff] %v4288_v1  ;;  %v4306_v36 = vmul.f32 %v5645_v29, %v5650_v22  ;;  %v894_v28 = vmul.f32 %v5652_v15, %v3966_v33  ;;  %2712 = vset.pattern.permute.xlu1 %v5653_v11  ;;  %v1507_v41 = vmul.f32 %v4284_v39, %v4155_v2  ;;  %v5655_v29 = vld [vmem:[#allocation13_spill] sm:$0xff]  ;;  %v4326_v39 = vpop.permute.xlu0 %1636 }
 0x136   :  { %5648 = vst [vmem:[#allocation40_spill] sm:$0xff] %v4298_v49  ;;  %5649 = vst [vmem:[#allocation41_spill] sm:$0xff] %v4302_v24  ;;  %v903_v7 = vadd.f32 %v891_v19, %v851_v32  ;;  %v904_v48 = vadd.f32 %v892_v54, %v852_v51  ;;  %v905_v17 = vadd.f32 %v893_v21, %v853_v16  ;;  %1889 = vperm.xlu1 %2712, %v4277_v6  }
 0x137   :  { %5651 = vst [vmem:[#allocation42_spill] sm:$0xff] %v4306_v36  ;;  %v1508_v60 = vmul.f32 %v4288_v1, %v4155_v2  ;;  %v4320_v36 = vrot.slane %v3783_v31, %v5655_v29  ;;  %v4324_v33 = vrot.slane %v3802_v14, %v5655_v29  ;;  %v906_v11 = vadd.f32 %v894_v28, %v854_v20  ;;  %v5662_v28 = vld [vmem:[#allocation45_spill] sm:$0xff]  ;;  %v5663_v1 = vld [vmem:[#allocation46_spill] sm:$0xff] }
 0x138   :  { %v1509_v19 = vmul.f32 %v4298_v49, %v4155_v2  ;;  %v4332_v32 = vmul.f32 %v5646_v4, %v5650_v22  ;;  %v4336_v51 = vmul.f32 %v5647_v59, %v5650_v22  ;;  %v4340_v16 = vrot.slane %v3816_v18, %v5655_v29 }
 0x139   :  { %5656 = vst [vmem:[#allocation43_spill] sm:$0xff] %v4320_v36  ;;  %5657 = vst [vmem:[#allocation88_spill] sm:$0xff] %v4324_v33  ;;  %v1510_v20 = vmul.f32 %v4302_v24, %v4155_v2  ;;  %v4346_v54 = vrot.slane %v3842_v25, %v5655_v29  ;;  %v1559_v21 = vmul.f32 %v4320_v36, %v4219_v8  ;;  %v5664_v2 = vld [vmem:[#allocation47_spill] sm:$0xff] }
 0x13a   :  { %5658 = vst [vmem:[#allocation89_spill] sm:$0xff] %v4332_v32  ;;  %5659 = vst [vmem:[#allocation90_spill] sm:$0xff] %v4336_v51  ;;  %v1560_v4 = vmul.f32 %v4324_v33, %v4219_v8  ;;  %v1561_v59 = vmul.f32 %v4340_v16, %v4219_v8  ;;  %v943_v49 = vmul.f32 %v5662_v28, %v4056_v12  ;;  %1893 = vperm.xlu1 %2712, %v4182_v35   ;;  %v5665_v33 = vld [vmem:[#allocation48_spill] sm:$0xff] }
 0x13b   :  { %5660 = vst [vmem:[#allocation91_spill] sm:$0xff] %v4340_v16  ;;  %5661 = vst [vmem:[#allocation92_spill] sm:$0xff] %v4346_v54  ;;  %v944_v34 = vmul.f32 %v5663_v1, %v4056_v12  ;;  %v945_v24 = vmul.f32 %v5664_v2, %v4056_v12  ;;  %v1519_v29 = vadd.f32 %v1507_v41, %v1467_v61  ;;  %v4365_v16 = vpop.permute.xlu1 %1120 }
 0x13c   :  { %v1520_v51 = vadd.f32 %v1508_v60, %v1468_v42  ;;  %v1562_v36 = vmul.f32 %v4346_v54, %v4219_v8  ;;  %v946_v32 = vmul.f32 %v5665_v33, %v4056_v12  ;;  %5666 = vst [vmem:[#allocation45_spill] sm:$0xff] %v4365_v16  ;;  %v1521_v63 = vadd.f32 %v1509_v19, %v1469_v40  ;;  %v456_v8 = vpop.permute.xlu0 %455 }
 0x13d   :  { %v955_v52 = vadd.f32 %v943_v49, %v903_v7  ;;  %v956_v55 = vadd.f32 %v944_v34, %v904_v48  ;;  %v957_v30 = vadd.f32 %v945_v24, %v905_v17  ;;  %v1522_v45 = vadd.f32 %v1510_v20, %v1470_v58  ;;  %v5676_v48 = vld [vmem:[#allocation22_spill] sm:$0xff] }
 0x13e   :  { %v4369_v6 = vmul.f32 %v5652_v15, %v5650_v22  ;;  %v4373_v60 = vrot.slane %v3783_v31, %v3580_v23  ;;  %v958_v61 = vadd.f32 %v946_v32, %v906_v11  ;;  %v1571_v42 = vadd.f32 %v1559_v21, %v1519_v29  ;;  %v5675_v15 = vld [vmem:[#allocation20_spill] sm:$0xff]  ;;  %v5678_v32 = vld [vmem:[#allocation49_spill] sm:$0xff]  ;;  %v5679_v20 = vld [vmem:[#allocation50_spill] sm:$0xff] }
 0x13f   :  { %v1572_v41 = vadd.f32 %v1560_v4, %v1520_v51  ;;  %v4375_v12 = vadd.f32 %v1561_v59, %v1521_v63  ;;  %v4379_v40 = vrot.slane %v3802_v14, %v3580_v23  ;;  %v5671_v34 = vmov 4   ;;  %v4395_v24 = vpop.permute.xlu1 %1124  ;;  %v5677_v11 = vld [vmem:[#allocation24_spill] sm:$0xff]  ;;  %v5680_v4 = vld [vmem:[#allocation51_spill] sm:$0xff] }
 0x140   :  { %5667 = vst [vmem:[#allocation46_spill] sm:$0xff] %v4369_v6  ;;  %5668 = vst [vmem:[#allocation47_spill] sm:$0xff] %v4373_v60  ;;  %2714 = vset.pattern.permute.xlu1 %v5671_v34  ;;  %v4382_v58 = vadd.f32 %v1562_v36, %v1522_v45  ;;  %v4386_v17 = vrot.slane %v3816_v18, %v3580_v23  ;;  %v4390_v49 = vrot.slane %v3842_v25, %v3580_v23  ;;  %v5674_v45 = vld [vmem:[#allocation18_spill] sm:$0xff]  ;;  %v5681_v34 = vld [vmem:[#allocation44_spill] sm:$0xff] }
 0x141   :  { %5669 = vst [vmem:[#allocation48_spill] sm:$0xff] %v4375_v12  ;;  %5670 = vst [vmem:[#allocation93_spill] sm:$0xff] %v4379_v40  ;;  %v1611_v63 = vmul.f32 %v4373_v60, %v4272_v44  ;;  %1933 = vperm.xlu1 %2714, %v4182_v35   ;;  %v1612_v22 = vmul.f32 %v4379_v40, %v4272_v44  ;;  %v483_v36 = vmul.f32 %v5674_v45, %v456_v8  ;;  %v5682_v40 = vld [vmem:[#allocation53_spill] sm:$0xff]  ;;  %v5686_v12 = vmov 5   ;;  %v5687_v6 = vld [vmem:[#allocation60_spill] sm:$0xff] }
 0x142   :  { %5672 = vst [vmem:[#allocation94_spill] sm:$0xff] %v4382_v58  ;;  %5673 = vst [vmem:[#allocation95_spill] sm:$0xff] %v4395_v24  ;;  %v484_v7 = vmul.f32 %v5675_v15, %v456_v8  ;;  %v485_v29 = vmul.f32 %v5676_v48, %v456_v8  ;;  %v486_v19 = vmul.f32 %v5677_v11, %v456_v8  ;;  %v5683_v45 = vld [vmem:[#allocation57_spill] sm:$0xff]  ;;  %v5684_v15 = vld [vmem:[#allocation52_spill] sm:$0xff] }
 0x143   :  { %v995_v51 = vmul.f32 %v5678_v32, %v4153_v27  ;;  %v996_v21 = vmul.f32 %v5679_v20, %v4153_v27  ;;  %v997_v59 = vmul.f32 %v5680_v4, %v4153_v27  ;;  %v535_v23 = vadd.f32 %v5681_v34, %v483_v36  ;;  %v5685_v24 = vld [vmem:[#allocation58_spill] sm:$0xff]  ;;  %v5688_v36 = vld [vmem:[#allocation61_spill] sm:$0xff] }
 0x144   :  { %v536_v60 = vadd.f32 %v5682_v40, %v484_v7  ;;  %v537_v54 = vadd.f32 %v5683_v45, %v485_v29  ;;  %v998_v48 = vmul.f32 %v5684_v15, %v4153_v27  ;;  %v538_v8 = vadd.f32 %v5685_v24, %v486_v19  ;;  %v5689_v40 = vld [vmem:[#allocation9_spill] sm:$0xff]  ;;  %v4428_v27 = vpop.permute.xlu1 %1172 }
 0x145   :  { %v4415_v11 = vadd.f32 %v995_v51, %v955_v52  ;;  %v4417_v16 = vadd.f32 %v996_v21, %v956_v55  ;;  %v4419_v58 = vadd.f32 %v997_v59, %v957_v30  ;;  %2715 = vset.pattern.permute.xlu1 %v5686_v12  ;;  %v587_v57 = vadd.f32 %v5687_v6, %v535_v23  ;;  %v5690_v23 = vld [vmem:[#allocation26_spill] sm:$0xff] }
 0x146   :  { %v588_v34 = vadd.f32 %v5688_v36, %v536_v60  ;;  %v589_v7 = vadd.f32 %v5689_v40, %v537_v54  ;;  %v4425_v29 = vadd.f32 %v998_v48, %v958_v61  ;;  %1973 = vperm.xlu1 %2715, %v4182_v35   ;;  %v939_v55 = vmul.f32 %v5662_v28, %v4024_v10  ;;  %v5691_v61 = vld [vmem:[#allocation25_spill] sm:$0xff]  ;;  %v5698_v36 = vld [vmem:[#allocation38_spill] sm:$0xff]  ;;  %v5699_v40 = vld [vmem:[#allocation39_spill] sm:$0xff] }
 0x147   :  { %v940_v30 = vmul.f32 %v5663_v1, %v4024_v10  ;;  %v941_v52 = vmul.f32 %v5664_v2, %v4024_v10  ;;  %v590_v6 = vadd.f32 %v5690_v23, %v538_v8  ;;  %v4439_v54 = vmul.f32 %v4386_v17, %v4272_v44  ;;  %v5697_v48 = vld [vmem:[#allocation37_spill] sm:$0xff] }
 0x148   :  { %v639_v60 = vadd.f32 %v3964_v5, %v587_v57  ;;  %v640_v12 = vadd.f32 %v5691_v61, %v588_v34  ;;  %v641_v24 = vadd.f32 %v4050_v37, %v589_v7  ;;  %v4446_v28 = vmul.f32 %v4390_v49, %v4272_v44  ;;  %v4459_v59 = vpop.permute.xlu1 %1176  ;;  %v5693_v44 = vld [vmem:[#allocation35_spill] sm:$0xff]  ;;  %v5700_v23 = vld [vmem:[#allocation77_spill] sm:$0xff]  ;;  %v5703_v61 = vld [vmem:[#allocation56_spill] sm:$0xff] }
 0x149   :  { %v4448_v1 = vadd.f32 %v1611_v63, %v1571_v42  ;;  %v942_v2 = vmul.f32 %v5665_v33, %v4024_v10  ;;  %v642_v19 = vadd.f32 %v4054_v62, %v590_v6  ;;  %v4453_v51 = vadd.f32 %v1612_v22, %v1572_v41  ;;  %v5701_v6 = vld [vmem:[#allocation54_spill] sm:$0xff] }
 0x14a   :  { %v691_v21 = vadd.f32 %v4060_v47, %v639_v60  ;;  %v692_v5 = vadd.f32 %v4067_v46, %v640_v12  ;;  %v693_v57 = vadd.f32 %v4071_v26, %v641_v24  ;;  %v5692_v37 = vmov 6   ;;  %v5704_v24 = vld [vmem:[#allocation42_spill] sm:$0xff] }
 0x14b   :  { %2717 = vset.pattern.permute.xlu1 %v5692_v37  ;;  %v4463_v42 = vrot.slane %v3783_v31, %v5693_v44  ;;  %v4467_v10 = vrot.slane %v3802_v14, %v5693_v44  ;;  %v4471_v62 = vrot.slane %v3816_v18, %v5693_v44  ;;  %v694_v47 = vadd.f32 %v4075_v0, %v642_v19  ;;  %v5707_v37 = vld [vmem:[#allocation59_spill] sm:$0xff] }
 0x14c   :  { %2013 = vperm.xlu1 %2717, %v4182_v35   ;;  %v4477_v46 = vrot.slane %v3842_v25, %v5693_v44  ;;  %v743_v26 = vadd.f32 %v4082_v38, %v691_v21  ;;  %v744_v31 = vadd.f32 %v4086_v56, %v692_v5  ;;  %v745_v33 = vadd.f32 %v4090_v50, %v693_v57  ;;  %v4506_v45 = vpop.permute.xlu1 %1224  ;;  %v5706_v5 = vld [vmem:[#allocation90_spill] sm:$0xff] }
 0x14d   :  { %v991_v14 = vmul.f32 %v5678_v32, %v4110_v9  ;;  %v992_v18 = vmul.f32 %v5679_v20, %v4110_v9  ;;  %v993_v0 = vmul.f32 %v5680_v4, %v4110_v9  ;;  %v746_v41 = vadd.f32 %v4100_v43, %v694_v47  ;;  %v5694_v32 = vld [vmem:[#allocation73_spill] sm:$0xff]  ;;  %v5695_v4 = vld [vmem:[#allocation84_spill] sm:$0xff] }
 0x14e   :  { %v4491_v25 = vmul.f32 %v4463_v42, %v4326_v39  ;;  %v795_v38 = vadd.f32 %v4165_v3, %v743_v26  ;;  %v796_v56 = vadd.f32 %v4169_v53, %v744_v31  ;;  %v797_v50 = vadd.f32 %v4173_v13, %v745_v33  ;;  %v5696_v53 = vld [vmem:[#allocation36_spill] sm:$0xff]  ;;  %v5708_v26 = vld [vmem:[#allocation46_spill] sm:$0xff]  ;;  %v5709_v33 = vld [vmem:[#allocation83_spill] sm:$0xff] }
 0x14f   :  { %v1664_v63 = vmul.f32 %v4467_v10, %v4326_v39  ;;  %v4500_v22 = vmul.f32 %v4471_v62, %v4326_v39  ;;  %v994_v43 = vmul.f32 %v5684_v15, %v4110_v9  ;;  %v798_v20 = vadd.f32 %v5694_v32, %v746_v41  ;;  %v5702_v15 = vld [vmem:[#allocation55_spill] sm:$0xff] }
 0x150   :  { %2009 = vperm.xlu1 %2717, %v5695_v4   ;;  %v1666_v3 = vmul.f32 %v4477_v46, %v4326_v39  ;;  %v847_v13 = vadd.f32 %v5696_v53, %v795_v38  ;;  %v848_v8 = vadd.f32 %v5697_v48, %v796_v56  ;;  %v849_v34 = vadd.f32 %v5698_v36, %v797_v50  ;;  %v5705_v39 = vld [vmem:[#allocation89_spill] sm:$0xff]  ;;  %v4533_v32 = vpop.permute.xlu1 %1228 }
 0x151   :  { %v850_v7 = vadd.f32 %v5699_v40, %v798_v20  ;;  %v1043_v9 = vmul.f32 %v5701_v6, %v5700_v23  ;;  %v1044_v60 = vmul.f32 %v5702_v15, %v5700_v23  ;;  %v1045_v12 = vmul.f32 %v5703_v61, %v5700_v23 }
 0x152   :  { %v899_v19 = vadd.f32 %v5704_v24, %v847_v13  ;;  %v900_v21 = vadd.f32 %v5705_v39, %v848_v8  ;;  %v901_v57 = vadd.f32 %v5706_v5, %v849_v34  ;;  %v1046_v47 = vmul.f32 %v5707_v37, %v5700_v23  ;;  %v5713_v24 = vld [vmem:[#allocation63_spill] sm:$0xff] }
 0x153   :  { %v902_v31 = vadd.f32 %v5708_v26, %v850_v7  ;;  %v1047_v41 = vmul.f32 %v5701_v6, %v5709_v33  ;;  %v1048_v38 = vmul.f32 %v5702_v15, %v5709_v33  ;;  %v1049_v56 = vmul.f32 %v5703_v61, %v5709_v33 }
 0x154   :  { %v5710_v50 = vmov 7   ;;  %v951_v20 = vadd.f32 %v939_v55, %v899_v19  ;;  %v952_v53 = vadd.f32 %v940_v30, %v900_v21  ;;  %v953_v13 = vadd.f32 %v941_v52, %v901_v57  ;;  %v5711_v30 = vld [vmem:[#allocation85_spill] sm:$0xff]  ;;  %v5712_v52 = vld [vmem:[#allocation62_spill] sm:$0xff] }
 0x155   :  { %2719 = vset.pattern.permute.xlu1 %v5710_v50  ;;  %v1050_v48 = vmul.f32 %v5707_v37, %v5709_v33  ;;  %v954_v8 = vadd.f32 %v942_v2, %v902_v31  ;;  %v1059_v36 = vadd.f32 %v1047_v41, %v4415_v11  ;;  %v1060_v34 = vadd.f32 %v1048_v38, %v4417_v16  ;;  %v5714_v2 = vld [vmem:[#allocation64_spill] sm:$0xff]  ;;  %v5719_v33 = vld [vmem:[#allocation94_spill] sm:$0xff]  ;;  %v1690_v41 = vpop.permute.xlu0 %1689 }
 0x156   :  { %2049 = vperm.xlu1 %2719, %v5695_v4   ;;  %v1061_v40 = vadd.f32 %v1049_v56, %v4419_v58  ;;  %v1003_v7 = vadd.f32 %v991_v14, %v951_v20  ;;  %v1004_v23 = vadd.f32 %v992_v18, %v952_v53  ;;  %v1005_v6 = vadd.f32 %v993_v0, %v953_v13  ;;  %v5715_v58 = vld [vmem:[#allocation16_spill] sm:$0xff]  ;;  %v4551_v0 = vpop.permute.xlu1 %1276 }
 0x157   :  { %v1062_v15 = vadd.f32 %v1050_v48, %v4425_v29  ;;  %v1006_v55 = vadd.f32 %v994_v43, %v954_v8  ;;  %v1095_v61 = vmul.f32 %v5712_v52, %v5711_v30  ;;  %v1096_v19 = vmul.f32 %v5713_v24, %v5711_v30  ;;  %v5717_v43 = vld [vmem:[#allocation69_spill] sm:$0xff] }
 0x158   :  { %v1097_v39 = vmul.f32 %v5714_v2, %v5711_v30  ;;  %v1055_v11 = vadd.f32 %v1043_v9, %v1003_v7  ;;  %v1056_v21 = vadd.f32 %v1044_v60, %v1004_v23  ;;  %v1057_v16 = vadd.f32 %v1045_v12, %v1005_v6  ;;  %v5718_v9 = vld [vmem:[#allocation48_spill] sm:$0xff]  ;;  %v5721_v6 = vld [vmem:[#allocation65_spill] sm:$0xff] }
 0x159   :  { %v1098_v14 = vmul.f32 %v5715_v58, %v5711_v30  ;;  %v5716_v18 = vmov 8   ;;  %v1058_v29 = vadd.f32 %v1046_v47, %v1006_v55  ;;  %v1099_v5 = vmul.f32 %v5712_v52, %v5717_v43 }
 0x15a   :  { %2720 = vset.pattern.permute.xlu1 %v5716_v18  ;;  %v1100_v57 = vmul.f32 %v5713_v24, %v5717_v43  ;;  %v1101_v37 = vmul.f32 %v5714_v2, %v5717_v43  ;;  %v1625_v60 = vadd.f32 %v4439_v54, %v5718_v9  ;;  %v1107_v12 = vadd.f32 %v1095_v61, %v1055_v11  ;;  %v4569_v54 = vpop.permute.xlu1 %1280  ;;  %v5729_v18 = vld [vmem:[#allocation70_spill] sm:$0xff] }
 0x15b   :  { %2093 = vperm.xlu1 %2720, %v4182_v35   ;;  %v1108_v26 = vadd.f32 %v1096_v19, %v1056_v21  ;;  %v1109_v31 = vadd.f32 %v1097_v39, %v1057_v16  ;;  %v1626_v47 = vadd.f32 %v4446_v28, %v5719_v33  ;;  %v1110_v38 = vadd.f32 %v1098_v14, %v1058_v29  ;;  %v5720_v28 = vld [vmem:[#allocation45_spill] sm:$0xff]  ;;  %v5727_v21 = vld [vmem:[#allocation28_spill] sm:$0xff] }
 0x15c   :  { %v1102_v56 = vmul.f32 %v5715_v58, %v5717_v43  ;;  %v1111_v50 = vadd.f32 %v1099_v5, %v1059_v36  ;;  %v1675_v20 = vadd.f32 %v4491_v25, %v4448_v1  ;;  %v1676_v53 = vadd.f32 %v1664_v63, %v4453_v51  ;;  %v5723_v36 = vld [vmem:[#allocation66_spill] sm:$0xff]  ;;  %v5724_v1 = vld [vmem:[#allocation67_spill] sm:$0xff]  ;;  %v5725_v25 = vld [vmem:[#allocation68_spill] sm:$0xff] }
 0x15d   :  { %v1112_v13 = vadd.f32 %v1100_v57, %v1060_v34  ;;  %v1113_v48 = vadd.f32 %v1101_v37, %v1061_v40  ;;  %v1677_v8 = vadd.f32 %v4500_v22, %v1625_v60  ;;  %v1678_v7 = vadd.f32 %v1666_v3, %v1626_v47  ;;  %v5726_v3 = vld [vmem:[#allocation95_spill] sm:$0xff]  ;;  %v5728_v58 = vld [vmem:[#allocation29_spill] sm:$0xff]  ;;  %v5730_v5 = vld [vmem:[#allocation14_spill] sm:$0xff] }
 0x15e   :  { %v1114_v23 = vadd.f32 %v1102_v56, %v1062_v15  ;;  %v1147_v55 = vmul.f32 %v5721_v6, %v5720_v28  ;;  %v5722_v30 = vmov 9   ;;  %v1702_v52 = vadd.f32 %v1690_v41, %v1675_v20  ;;  %v4596_v43 = vpop.permute.xlu1 %1328 }
 0x15f   :  { %2722 = vset.pattern.permute.xlu1 %v5722_v30  ;;  %v1148_v61 = vmul.f32 %v5723_v36, %v5720_v28  ;;  %v1149_v51 = vmul.f32 %v5724_v1, %v5720_v28  ;;  %v1150_v63 = vmul.f32 %v5725_v25, %v5720_v28  ;;  %v1703_v22 = vadd.f32 %v1690_v41, %v1676_v53 }
 0x160   :  { %2133 = vperm.xlu1 %2722, %v4182_v35   ;;  %v1151_v34 = vmul.f32 %v5721_v6, %v5726_v3  ;;  %v1152_v40 = vmul.f32 %v5723_v36, %v5726_v3  ;;  %v1153_v15 = vmul.f32 %v5724_v1, %v5726_v3  ;;  %v1154_v24 = vmul.f32 %v5725_v25, %v5726_v3 }
 0x161   :  { %v1159_v19 = vadd.f32 %v1147_v55, %v1107_v12  ;;  %v1160_v2 = vadd.f32 %v1148_v61, %v1108_v26  ;;  %v1161_v39 = vadd.f32 %v1149_v51, %v1109_v31  ;;  %v1162_v11 = vadd.f32 %v1150_v63, %v1110_v38  ;;  %v5734_v61 = vld [vmem:[#allocation72_spill] sm:$0xff] }
 0x162   :  { %v1199_v16 = vmul.f32 %v5727_v21, %v4428_v27  ;;  %v1200_v14 = vmul.f32 %v5728_v58, %v4428_v27  ;;  %v1201_v29 = vmul.f32 %v5729_v18, %v4428_v27  ;;  %v1202_v57 = vmul.f32 %v5730_v5, %v4428_v27  ;;  %v4615_v6 = vpop.permute.xlu1 %1332 }
 0x163   :  { %v1163_v37 = vadd.f32 %v1151_v34, %v1111_v50  ;;  %v1164_v9 = vadd.f32 %v1152_v40, %v1112_v13  ;;  %v1165_v60 = vadd.f32 %v1153_v15, %v1113_v48  ;;  %v1166_v33 = vadd.f32 %v1154_v24, %v1114_v23  ;;  %v5731_v50 = vld [vmem:[#allocation30_spill] sm:$0xff]  ;;  %v5732_v13 = vld [vmem:[#allocation31_spill] sm:$0xff] }
 0x164   :  { %2129 = vperm.xlu1 %2722, %v5695_v4   ;;  %v1211_v12 = vadd.f32 %v1199_v16, %v1159_v19  ;;  %v1212_v26 = vadd.f32 %v1200_v14, %v1160_v2  ;;  %v1213_v31 = vadd.f32 %v1201_v29, %v1161_v39  ;;  %v1214_v47 = vadd.f32 %v1202_v57, %v1162_v11  ;;  %v5733_v23 = vld [vmem:[#allocation71_spill] sm:$0xff] }
 0x165   :  { %v1203_v38 = vmul.f32 %v5727_v21, %v4459_v59  ;;  %v1204_v56 = vmul.f32 %v5728_v58, %v4459_v59  ;;  %v1205_v20 = vmul.f32 %v5729_v18, %v4459_v59  ;;  %v1206_v27 = vmul.f32 %v5730_v5, %v4459_v59  ;;  %v5738_v5 = vld [vmem:[#allocation17_spill] sm:$0xff] }
 0x166   :  { %v1251_v53 = vmul.f32 %v5731_v50, %v4506_v45  ;;  %v1252_v48 = vmul.f32 %v5732_v13, %v4506_v45  ;;  %v1253_v28 = vmul.f32 %v5733_v23, %v4506_v45  ;;  %v1254_v1 = vmul.f32 %v5734_v61, %v4506_v45  ;;  %v4621_v34 = vpop.permute.xlu1 %1380 }
 0x167   :  { %v1215_v55 = vadd.f32 %v1203_v38, %v1163_v37  ;;  %v1216_v30 = vadd.f32 %v1204_v56, %v1164_v9  ;;  %v1217_v36 = vadd.f32 %v1205_v20, %v1165_v60  ;;  %v5735_v51 = vmov 10   ;;  %v5739_v37 = vld [vmem:[#allocation19_spill] sm:$0xff]  ;;  %v5740_v60 = vld [vmem:[#allocation21_spill] sm:$0xff] }
 0x168   :  { %2724 = vset.pattern.permute.xlu1 %v5735_v51  ;;  %v1704_v59 = vadd.f32 %v1690_v41, %v1677_v8  ;;  %v1705_v25 = vadd.f32 %v1690_v41, %v1678_v7  ;;  %v1714_v63 = vsub.f32 0.0, %v1702_v52  ;;  %v1715_v3 = vsub.f32 0.0, %v1703_v22 }
 0x169   :  { %2169 = vperm.xlu1 %2724, %v5695_v4   ;;  %v5736_v15 = vmov 11   ;;  %v5737_v8 = vmov 12   ;;  %v1218_v41 = vadd.f32 %v1206_v27, %v1166_v33  ;;  %v1263_v7 = vadd.f32 %v1251_v53, %v1211_v12 }
 0x16a   :  { %v1716_v40 = vsub.f32 0.0, %v1704_v59  ;;  %v1717_v24 = vsub.f32 0.0, %v1705_v25  ;;  %v1726_v19 = vmul.f32 1.442695, %v1714_v63  ;;  %v1728_v2 = vmul.f32 1.442695, %v1715_v3  ;;  %v4625_v39 = vpop.permute.xlu1 %1384 }
 0x16b   :  { %v1264_v22 = vadd.f32 %v1252_v48, %v1212_v26  ;;  %v1265_v21 = vadd.f32 %v1253_v28, %v1213_v31  ;;  %v1266_v16 = vadd.f32 %v1254_v1, %v1214_v47  ;;  %v1255_v58 = vmul.f32 %v5731_v50, %v4533_v32  ;;  %v5741_v47 = vld [vmem:[#allocation23_spill] sm:$0xff]  ;;  %v5745_v1 = vld [vmem:[#allocation33_spill] sm:$0xff] }
 0x16c   :  { %v1730_v45 = vmul.f32 1.442695, %v1716_v40  ;;  %v1732_v11 = vmul.f32 1.442695, %v1717_v24  ;;  %2787 = vpow2.f32 %v1726_v19  ;;  %v1256_v14 = vmul.f32 %v5732_v13, %v4533_v32  ;;  %v5746_v40 = vld [vmem:[#allocation34_spill] sm:$0xff] }
 0x16d   :  { %2725 = vset.pattern.permute.xlu1 %v5736_v15  ;;  %2789 = vpow2.f32 %v1728_v2  ;;  %v1257_v18 = vmul.f32 %v5733_v23, %v4533_v32  ;;  %v1258_v29 = vmul.f32 %v5734_v61, %v4533_v32  ;;  %v1303_v57 = vmul.f32 %v5738_v5, %v4551_v0 }
 0x16e   :  { %2213 = vperm.xlu1 %2725, %v4182_v35   ;;  %2791 = vpow2.f32 %v1730_v45  ;;  %v4629_v52 = vpop.permute.xlu1 %1432  ;;  %v1304_v9 = vmul.f32 %v5739_v37, %v4551_v0  ;;  %v1305_v12 = vmul.f32 %v5740_v60, %v4551_v0  ;;  %v1267_v26 = vadd.f32 %v1255_v58, %v1215_v55  ;;  %v5743_v55 = vld [vmem:[#allocation15_spill] sm:$0xff]  ;;  %v5747_v58 = vld [vmem:[#allocation74_spill] sm:$0xff] }
 0x16f   :  { %2793 = vpow2.f32 %v1732_v11  ;;  %v1268_v31 = vadd.f32 %v1256_v14, %v1216_v30  ;;  %v1269_v33 = vadd.f32 %v1257_v18, %v1217_v36  ;;  %v1306_v38 = vmul.f32 %v5741_v47, %v4551_v0  ;;  %v5744_v36 = vld [vmem:[#allocation32_spill] sm:$0xff]  ;;  %v5748_v18 = vld [vmem:[#allocation75_spill] sm:$0xff] }
 0x170   :  { %v1270_v20 = vadd.f32 %v1258_v29, %v1218_v41  ;;  %v1315_v27 = vadd.f32 %v1303_v57, %v1263_v7  ;;  %v1316_v32 = vadd.f32 %v1304_v9, %v1264_v22  ;;  %v1317_v50 = vadd.f32 %v1305_v12, %v1265_v21 }
 0x171   :  { %v1318_v53 = vadd.f32 %v1306_v38, %v1266_v16  ;;  %v1307_v13 = vmul.f32 %v5738_v5, %v4569_v54  ;;  %v1308_v48 = vmul.f32 %v5739_v37, %v4569_v54  ;;  %v1309_v23 = vmul.f32 %v5740_v60, %v4569_v54  ;;  %v5749_v5 = vld [vmem:[#allocation76_spill] sm:$0xff] }
 0x172   :  { %2727 = vset.pattern.permute.xlu1 %v5737_v8  ;;  %v4648_v56 = vpop.permute.xlu1 %1436  ;;  %v5742_v28 = vmov 13   ;;  %v1310_v0 = vmul.f32 %v5741_v47, %v4569_v54  ;;  %v1355_v30 = vmul.f32 %v5743_v55, %v4596_v43  ;;  %v1356_v61 = vmul.f32 %v5744_v36, %v4596_v43 }
 0x173   :  { %2253 = vperm.xlu1 %2727, %v4182_v35   ;;  %v1357_v51 = vmul.f32 %v5745_v1, %v4596_v43  ;;  %v1319_v25 = vadd.f32 %v1307_v13, %v1267_v26  ;;  %v1320_v63 = vadd.f32 %v1308_v48, %v1268_v31  ;;  %v1321_v3 = vadd.f32 %v1309_v23, %v1269_v33  ;;  %v5751_v26 = vld [vmem:[#allocation78_spill] sm:$0xff]  ;;  %v5752_v13 = vld [vmem:[#allocation79_spill] sm:$0xff]  ;;  %v5753_v23 = vld [vmem:[#allocation80_spill] sm:$0xff] }
 0x174   :  { %v1358_v15 = vmul.f32 %v5746_v40, %v4596_v43  ;;  %v1322_v24 = vadd.f32 %v1310_v0, %v1270_v20  ;;  %v1367_v19 = vadd.f32 %v1355_v30, %v1315_v27  ;;  %v1368_v2 = vadd.f32 %v1356_v61, %v1316_v32  ;;  %v5754_v0 = vld [vmem:[#allocation81_spill] sm:$0xff] }
 0x175   :  { %v1369_v45 = vadd.f32 %v1357_v51, %v1317_v50  ;;  %v1359_v7 = vmul.f32 %v5743_v55, %v4615_v6  ;;  %v1360_v22 = vmul.f32 %v5744_v36, %v4615_v6  ;;  %v1361_v21 = vmul.f32 %v5745_v1, %v4615_v6  ;;  %v5755_v1 = vld [vmem:[#allocation82_spill] sm:$0xff] }
 0x176   :  { %v4666_v59 = vpop.eup %2787  ;;  %v1485_v11 = vpop.permute.xlu1 %1484  ;;  %v1370_v41 = vadd.f32 %v1358_v15, %v1318_v53  ;;  %v1362_v16 = vmul.f32 %v5746_v40, %v4615_v6  ;;  %v1407_v14 = vmul.f32 %v5747_v58, %v4621_v34  ;;  %v1408_v29 = vmul.f32 %v5748_v18, %v4621_v34 }
 0x177   :  { %2249 = vperm.xlu1 %2727, %v5695_v4   ;;  %v4670_v54 = vpop.eup %2789  ;;  %v1409_v57 = vmul.f32 %v5749_v5, %v4621_v34  ;;  %v5750_v37 = vmov 14   ;;  %v1371_v9 = vadd.f32 %v1359_v7, %v1319_v25  ;;  %v1372_v60 = vadd.f32 %v1360_v22, %v1320_v63  ;;  %v5758_v22 = vld [vmem:[#allocation87_spill] sm:$0xff] }
 0x178   :  { %v4672_v8 = vpop.eup %2791  ;;  %v1373_v12 = vadd.f32 %v1361_v21, %v1321_v3  ;;  %v1410_v31 = vmul.f32 %v5751_v26, %v4621_v34  ;;  %v1374_v6 = vadd.f32 %v1362_v16, %v1322_v24  ;;  %v1419_v33 = vadd.f32 %v1407_v14, %v1367_v19  ;;  %v5759_v16 = vld [vmem:[#allocation40_spill] sm:$0xff] }
 0x179   :  { %v4680_v43 = vpop.eup %2793  ;;  %v1420_v47 = vadd.f32 %v1408_v29, %v1368_v2  ;;  %v1421_v38 = vadd.f32 %v1409_v57, %v1369_v45  ;;  %v1411_v32 = vmul.f32 %v5747_v58, %v4625_v39  ;;  %v1412_v50 = vmul.f32 %v5748_v18, %v4625_v39 }
 0x17a   :  { %v1489_v20 = vpop.permute.xlu1 %1488  ;;  %v1422_v27 = vadd.f32 %v1410_v31, %v1370_v41  ;;  %v1413_v53 = vmul.f32 %v5749_v5, %v4625_v39  ;;  %v1414_v34 = vmul.f32 %v5751_v26, %v4625_v39  ;;  %v1459_v48 = vmul.f32 %v5752_v13, %v4629_v52  ;;  %v5757_v41 = vld [vmem:[#allocation86_spill] sm:$0xff]  ;;  %v5760_v5 = vld [vmem:[#allocation41_spill] sm:$0xff] }
 0x17b   :  { %2729 = vset.pattern.permute.xlu1 %v5742_v28  ;;  %v1460_v28 = vmul.f32 %v5753_v23, %v4629_v52  ;;  %v1461_v55 = vmul.f32 %v5754_v0, %v4629_v52  ;;  %v1423_v30 = vadd.f32 %v1411_v32, %v1371_v9  ;;  %v1424_v36 = vadd.f32 %v1412_v50, %v1372_v60  ;;  %v5762_v32 = vld [vmem:[#allocation88_spill] sm:$0xff]  ;;  %v5763_v50 = vld [vmem:[#allocation91_spill] sm:$0xff] }
 0x17c   :  { %2289 = vperm.xlu1 %2729, %v5695_v4   ;;  %v1425_v61 = vadd.f32 %v1413_v53, %v1373_v12  ;;  %v1462_v51 = vmul.f32 %v5755_v1, %v4629_v52  ;;  %v5756_v25 = vmov 15   ;;  %v1426_v63 = vadd.f32 %v1414_v34, %v1374_v6 }
 0x17d   :  { %v1471_v3 = vadd.f32 %v1459_v48, %v1419_v33  ;;  %v1472_v39 = vadd.f32 %v1460_v28, %v1420_v47  ;;  %v1473_v40 = vadd.f32 %v1461_v55, %v1421_v38  ;;  %v1463_v24 = vmul.f32 %v5752_v13, %v4648_v56  ;;  %v5761_v38 = vld [vmem:[#allocation43_spill] sm:$0xff] }
 0x17e   :  { %v1474_v15 = vadd.f32 %v1462_v51, %v1422_v27  ;;  %v1464_v19 = vmul.f32 %v5753_v23, %v4648_v56  ;;  %v1465_v2 = vmul.f32 %v5754_v0, %v4648_v56  ;;  %v1537_v45 = vpop.permute.xlu1 %1536  ;;  %v1466_v52 = vmul.f32 %v5755_v1, %v4648_v56  ;;  %v5764_v23 = vld [vmem:[#allocation92_spill] sm:$0xff] }
 0x17f   :  { %v1511_v7 = vmul.f32 %v5757_v41, %v1485_v11  ;;  %v1512_v21 = vmul.f32 %v5758_v22, %v1485_v11  ;;  %v1513_v58 = vmul.f32 %v5759_v16, %v1485_v11  ;;  %v1475_v14 = vadd.f32 %v1463_v24, %v1423_v30 }
 0x180   :  { %2730 = vset.pattern.permute.xlu1 %v5750_v37  ;;  %v1476_v18 = vadd.f32 %v1464_v19, %v1424_v36  ;;  %v1477_v29 = vadd.f32 %v1465_v2, %v1425_v61  ;;  %v1514_v57 = vmul.f32 %v5760_v5, %v1485_v11  ;;  %v1478_v37 = vadd.f32 %v1466_v52, %v1426_v63 }
 0x181   :  { %2333 = vperm.xlu1 %2730, %v4182_v35   ;;  %v1523_v9 = vadd.f32 %v1511_v7, %v1471_v3  ;;  %v1524_v60 = vadd.f32 %v1512_v21, %v1472_v39  ;;  %v1525_v12 = vadd.f32 %v1513_v58, %v1473_v40  ;;  %v1515_v56 = vmul.f32 %v5757_v41, %v1489_v20  ;;  %v5767_v41 = vld [vmem:[#allocation47_spill] sm:$0xff] }
 0x182   :  { %v1526_v26 = vadd.f32 %v1514_v57, %v1474_v15  ;;  %v1516_v31 = vmul.f32 %v5758_v22, %v1489_v20  ;;  %v1517_v6 = vmul.f32 %v5759_v16, %v1489_v20  ;;  %v1541_v33 = vpop.permute.xlu1 %1540  ;;  %v1518_v47 = vmul.f32 %v5760_v5, %v1489_v20  ;;  %v5768_v22 = vld [vmem:[#allocation93_spill] sm:$0xff]  ;;  %v4753_v57 = vpop.permute.xlu0 %1776 }
 0x183   :  { %v1563_v27 = vmul.f32 %v5761_v38, %v1537_v45  ;;  %v1564_v11 = vmul.f32 %v5762_v32, %v1537_v45  ;;  %v1565_v53 = vmul.f32 %v5763_v50, %v1537_v45  ;;  %v1527_v34 = vadd.f32 %v1515_v56, %v1475_v14  ;;  %v50_v14 = vld [vmem:[%s5230_s6 + $0x8] sm:$0xf] }
 0x184   :  { %v1528_v13 = vadd.f32 %v1516_v31, %v1476_v18  ;;  %v1529_v48 = vadd.f32 %v1517_v6, %v1477_v29  ;;  %v1566_v28 = vmul.f32 %v5764_v23, %v1537_v45  ;;  %v1530_v0 = vadd.f32 %v1518_v47, %v1478_v37 }
 0x185   :  { %2732 = vset.pattern.permute.xlu1 %v5756_v25  ;;  %v1575_v55 = vadd.f32 %v1563_v27, %v1523_v9  ;;  %v1576_v30 = vadd.f32 %v1564_v11, %v1524_v60  ;;  %v1577_v36 = vadd.f32 %v1565_v53, %v1525_v12  ;;  %v5765_v61 = vmov 16  }
 0x186   :  { %2373 = vperm.xlu1 %2732, %v4182_v35   ;;  %v1578_v1 = vadd.f32 %v1566_v28, %v1526_v26  ;;  %v1567_v20 = vmul.f32 %v5761_v38, %v1541_v33  ;;  %v1568_v51 = vmul.f32 %v5762_v32, %v1541_v33  ;;  %v1569_v25 = vmul.f32 %v5763_v50, %v1541_v33  ;;  %v1810_v32 = vpop.permute.xlu0 %1809 }
 0x187   :  { %v1570_v63 = vmul.f32 %v5764_v23, %v1541_v33  ;;  %v1589_v3 = vpop.permute.xlu1 %1588  ;;  %v5766_v19 = vmov 17   ;;  %v1750_v2 = vadd.f32 1.0, %v4666_v59  ;;  %v1751_v45 = vadd.f32 1.0, %v4670_v54 }
 0x188   :  { %v1579_v39 = vadd.f32 %v1567_v20, %v1527_v34  ;;  %v1580_v40 = vadd.f32 %v1568_v51, %v1528_v13  ;;  %v1581_v15 = vadd.f32 %v1569_v25, %v1529_v48  ;;  %v1752_v58 = vadd.f32 1.0, %v4672_v8  ;;  %v49_v8 = vld [vmem:[%s5230_s6] sm:$0xff] }
 0x189   :  { %v1582_v24 = vadd.f32 %v1570_v63, %v1530_v0  ;;  %2795 = vrcp.f32 %v1750_v2  ;;  %v5769_v5 = vmov 0   ;;  %v1615_v9 = vmul.f32 %v5767_v41, %v1589_v3 }
 0x18a   :  { %2369 = vperm.xlu1 %2732, %v5695_v4   ;;  %2797 = vrcp.f32 %v1751_v45  ;;  %v1616_v60 = vmul.f32 %v5768_v22, %v1589_v3  ;;  %v1617_v12 = vmul.f32 %v4386_v17, %v1589_v3  ;;  %v1854_v63 = vpop.permute.xlu0 %1853 }
 0x18b   :  { %v1593_v52 = vpop.permute.xlu1 %1592  ;;  %2799 = vrcp.f32 %v1752_v58  ;;  %v1627_v11 = vadd.f32 %v1615_v9, %v1575_v55  ;;  %v53_v55 = vld [vmem:[#allocation2] sm:$0x1] }
 0x18c   :  { %v1619_v7 = vmul.f32 %v5767_v41, %v1593_v52  ;;  %v1621_v21 = vmul.f32 %v4386_v17, %v1593_v52  ;;  %v1622_v16 = vmul.f32 %v4390_v49, %v1593_v52  ;;  %v1628_v50 = vadd.f32 %v1616_v60, %v1576_v30 }
 0x18d   :  { %v1629_v53 = vadd.f32 %v1617_v12, %v1577_v36 }
 0x18e   :  { %2734 = vset.pattern.permute.xlu1 %v5765_v61  ;;  %v1631_v59 = vadd.f32 %v1619_v7, %v1579_v39  ;;  %v1633_v54 = vadd.f32 %v1621_v21, %v1581_v15  ;;  %v1634_v29 = vadd.f32 %v1622_v16, %v1582_v24 }
 0x18f   :  { %2409 = vperm.xlu1 %2734, %v5695_v4   ;;  %v1620_v4 = vmul.f32 %v5768_v22, %v1593_v52  ;;  %v5770_v52 = vld [vmem:[#allocation7_spill] sm:$0xff]  ;;  %v5771_v22 = vld [vmem:[#allocation8_spill] sm:$0xff] }
 0x191   :  { %v1632_v18 = vadd.f32 %v1620_v4, %v1580_v40 }
 0x192   :  { %v1641_v37 = vpop.permute.xlu1 %1640 }
 0x193   :  { %2735 = vset.pattern.permute.xlu1 %v5766_v19  ;;  %v1667_v26 = vmul.f32 %v4463_v42, %v1641_v37  ;;  %v1668_v56 = vmul.f32 %v4467_v10, %v1641_v37  ;;  %v1669_v31 = vmul.f32 %v4471_v62, %v1641_v37  ;;  %v1670_v6 = vmul.f32 %v4477_v46, %v1641_v37  ;;  %v4781_v0 = vpop.eup %2795 }
 0x194   :  { %2453 = vperm.xlu1 %2735, %v4182_v35   ;;  %v1753_v35 = vadd.f32 1.0, %v4680_v43  ;;  %v1618_v43 = vmul.f32 %v4390_v49, %v1589_v3  ;;  %v51_v49 = vld [vmem:[%s5231_s7] sm:$0xff]  ;;  %v4783_v30 = vpop.eup %2797  ;;  %v4793_v41 = vrot.slane %v4781_v0, %v5770_v52  ;;  %v4801_v4 = vrot.slane %v4781_v0, %v5771_v22  ;;  %s2888_s7 = smov [#allocation3]  }
 0x195   :  { %v1681_v23 = vadd.f32 %v1669_v31, %v1629_v53  ;;  %v4785_v25 = vpop.eup %2799  ;;  %v4797_v7 = vrot.slane %v4783_v30, %v5770_v52  ;;  %v4809_v58 = vrot.slane %v4783_v30, %v5771_v22  ;;  %s2618_s10 = sshll.u32 %s2888_s7, 4  ;;  %s2619_s10 = int_to_ptr.vmem [resolvable:$true] %s2618_s10 }
 0x196   :  { %2801 = vrcp.f32 %v1753_v35  ;;  %v1645_v33 = vpop.permute.xlu1 %1644  ;;  %v1630_v34 = vadd.f32 %v1618_v43, %v1578_v1  ;;  %v4805_v16 = vrot.slane %v4785_v25, %v5770_v52  ;;  %v5772_v43 = vld [vmem:[#allocation10_spill] sm:$0xff]  ;;  %s2839_s11 = scalar_lea.vmem %s2619_s10, 64  ;;  %p2844_p1 = scmp.lt.s32.totalorder %s2619_s10, %s2619_s10 }
 0x197   :  { %v1671_v47 = vmul.f32 %v4463_v42, %v1645_v33  ;;  %v1672_v38 = vmul.f32 %v4467_v10, %v1645_v33  ;;  %v1673_v27 = vmul.f32 %v4471_v62, %v1645_v33  ;;  %v1674_v17 = vmul.f32 %v4477_v46, %v1645_v33  ;;  %p2840_p0 = scmp.ne.s32.totalorder %s2619_s10, %s2839_s11  ;;  %p2845_p2 = scmp.lt.s32.totalorder %s2839_s11, %s2839_s11 }
 0x198   :  { %2737 = vset.pattern.permute.xlu1 %v5769_v5  ;;  %v1679_v62 = vadd.f32 %v1667_v26, %v1627_v11  ;;  %v1680_v46 = vadd.f32 %v1668_v56, %v1628_v50  ;;  %v1682_v28 = vadd.f32 %v1670_v6, %v1630_v34  ;;  %v1800_v5 = vmul.f32 %v4793_v41, %v4753_v57 }
 0x199   :  { %2495 = vperm.xlu1 %2737, %v50_v14   ;;  %v4773_v13 = vadd.f32 %v1671_v47, %v1631_v59  ;;  %v4775_v48 = vadd.f32 %v1672_v38, %v1632_v18  ;;  %v4777_v42 = vadd.f32 %v1673_v27, %v1633_v54  ;;  %v4779_v10 = vadd.f32 %v1674_v17, %v1634_v29  ;;  %v1930_v54 = vpop.permute.xlu0 %1929  ;;  %v5773_v27 = vld [vmem:[#allocation12_spill] sm:$0xff]  ;;  %p2846_p3 = por %p2845_p2, %p2844_p1 }
 0x19a   :  { %v4813_v14 = vrot.slane %v4785_v25, %v5771_v22  ;;  %v1801_v37 = vmul.f32 %v4797_v7, %v4753_v57  ;;  %v1802_v9 = vmul.f32 %v4805_v16, %v4753_v57  ;;  %v1833_v60 = vmul.f32 %v4809_v58, %v1810_v32 }
 0x19b   :  { %v4836_v26 = vrot.slane %v4781_v0, %v5772_v43  ;;  %v4840_v56 = vrot.slane %v4783_v30, %v5772_v43  ;;  %v4844_v31 = vrot.slane %v4785_v25, %v5772_v43  ;;  %v4857_v17 = vrot.slane %v4781_v0, %v5773_v27  ;;  %p2847_p4 = pnand %p2846_p3, %p2840_p0 }
 0x19c   :  { %v1695_v61 = vpop.permute.xlu1 %1694  ;;  %v1834_v12 = vmul.f32 %v4813_v14, %v1810_v32  ;;  %v4865_v53 = vadd.f32 %v1833_v60, %v1801_v37 }
 0x19d   :  { %2490 = vperm.xlu1 %2737, %v49_v8   ;;  %v1706_v36 = vadd.f32 %v1695_v61, %v1679_v62  ;;  %v1707_v1 = vadd.f32 %v1695_v61, %v1680_v46  ;;  %v1708_v20 = vadd.f32 %v1695_v61, %v1681_v23  ;;  %v1709_v51 = vadd.f32 %v1695_v61, %v1682_v28  ;;  %v1970_v11 = vpop.permute.xlu0 %1969  ;;  %v5774_v61 = vld [vmem:[#allocation13_spill] sm:$0xff] }
 0x19e   :  { %v1832_v8 = vmul.f32 %v4801_v4, %v1810_v32  ;;  %v4874_v34 = vmul.f32 %v4836_v26, %v1854_v63  ;;  %v4877_v62 = vmul.f32 %v4840_v56, %v1854_v63  ;;  %v4880_v46 = vmul.f32 %v4844_v31, %v1854_v63 }
 0x19f   :  { %v1718_v3 = vsub.f32 0.0, %v1706_v36  ;;  %v1719_v39 = vsub.f32 0.0, %v1707_v1  ;;  %v1720_v40 = vsub.f32 0.0, %v1708_v20  ;;  %v1721_v24 = vsub.f32 0.0, %v1709_v51 }
 0x1a0   :  { %v4787_v15 = vpop.eup %2801  ;;  %v4789_v19 = vpop.permute.xlu1 %1699  ;;  %v4863_v50 = vadd.f32 %v1832_v8, %v1800_v5  ;;  %v4894_v36 = vrot.slane %v4783_v30, %v5774_v61  ;;  %v4898_v1 = vrot.slane %v4785_v25, %v5774_v61  ;;  %v4933_v8 = vrot.slane %v4785_v25, %v5693_v44 }
 0x1a1   :  { %2516 = vperm.xlu1 %2737, %v51_v49   ;;  %v1734_v2 = vmul.f32 1.442695, %v1718_v3  ;;  %v1736_v45 = vmul.f32 1.442695, %v1719_v39  ;;  %v1738_v21 = vmul.f32 1.442695, %v1720_v40  ;;  %v4819_v29 = vrot.slane %v4787_v15, %v5770_v52 }
 0x1a2   :  { %v1740_v59 = vmul.f32 1.442695, %v1721_v24  ;;  %v4823_v35 = vrot.slane %v4787_v15, %v5771_v22  ;;  %v4853_v38 = vrot.slane %v4787_v15, %v5772_v43  ;;  %v4861_v49 = vrot.slane %v4783_v30, %v5773_v27  ;;  %5776 = vst [vmem:[#allocation20_spill] sm:$0xff] %v4894_v36  ;;  %5777 = vst [vmem:[#allocation22_spill] sm:$0xff] %v4898_v1 }
 0x1a3   :  { %2803 = vpow2.f32 %v1734_v2  ;;  %v1803_v33 = vmul.f32 %v4819_v29, %v4753_v57  ;;  %v4867_v57 = vadd.f32 %v1834_v12, %v1802_v9  ;;  %v4884_v23 = vrot.slane %v4787_v15, %v5773_v27  ;;  %5780 = vst [vmem:[#allocation50_spill] sm:$0xff] %v4933_v8  ;;  %v2054_v9 = vpop.permute.xlu0 %2053 }
 0x1a4   :  { %v4815_v18 = vpop.permute.xlu1 %1781  ;;  %2805 = vpow2.f32 %v1736_v45  ;;  %v1835_v47 = vmul.f32 %v4823_v35, %v1810_v32  ;;  %v4871_v32 = vrot.slane %v4785_v25, %v5773_v27  ;;  %v4901_v3 = vmul.f32 %v4853_v38, %v1854_v63 }
 0x1a5   :  { %2567 = vperm.xlu1 %2737, %v53_v55   ;;  %2807 = vpow2.f32 %v1738_v21  ;;  %v4890_v55 = vrot.slane %v4781_v0, %v5774_v61  ;;  %v4904_v39 = vmul.f32 %v4857_v17, %v1930_v54  ;;  %v4908_v40 = vrot.slane %v4787_v15, %v5774_v61 }
 0x1a6   :  { %2809 = vpow2.f32 %v1740_v59  ;;  %v4886_v28 = vadd.f32 %v1835_v47, %v1803_v33  ;;  %v1710_v24 = vadd.f32 %v4789_v19, %v4773_v13  ;;  %v4913_v45 = vmul.f32 %v4861_v49, %v1930_v54 }
 0x1a7   :  { %5775 = vst [vmem:[#allocation18_spill] sm:$0xff] %v4890_v55  ;;  %v4916_v21 = vmul.f32 %v4871_v32, %v1930_v54  ;;  %v4920_v63 = vrot.slane %v4781_v0, %v5693_v44  ;;  %v1711_v59 = vadd.f32 %v4789_v19, %v4775_v48  ;;  %v4925_v37 = vmul.f32 %v4884_v23, %v1930_v54 }
 0x1a8   :  { %v4929_v13 = vrot.slane %v4783_v30, %v5693_v44  ;;  %v1712_v60 = vadd.f32 %v4789_v19, %v4777_v42  ;;  %v4938_v33 = vmul.f32 %v4890_v55, %v1970_v11  ;;  %v4941_v48 = vmul.f32 %v4894_v36, %v1970_v11 }
 0x1a9   :  { %v4846_v6 = vpop.permute.xlu1 %1813  ;;  %5778 = vst [vmem:[#allocation24_spill] sm:$0xff] %v4920_v63  ;;  %v4944_v54 = vmul.f32 %v4898_v1, %v1970_v11  ;;  %v4947_v27 = vmul.f32 %v4908_v40, %v1970_v11  ;;  %v1713_v22 = vadd.f32 %v4789_v19, %v4779_v10  ;;  %v1722_v43 = vsub.f32 0.0, %v1710_v24  ;;  %v5786_v10 = vld [vmem:[#allocation11_spill] sm:$0xff] }
 0x1aa   :  { %5779 = vst [vmem:[#allocation49_spill] sm:$0xff] %v4929_v13  ;;  %5781 = vst [vmem:[#allocation51_spill] sm:$0xff] %v4941_v48  ;;  %v4953_v55 = vrot.slane %v4787_v15, %v5693_v44  ;;  %v4956_v36 = vmul.f32 %v4920_v63, %v2054_v9  ;;  %v1723_v1 = vsub.f32 0.0, %v1711_v59  ;;  %v4962_v11 = vmul.f32 %v4933_v8, %v2054_v9 }
 0x1ab   :  { %5782 = vst [vmem:[#allocation44_spill] sm:$0xff] %v4947_v27  ;;  %v1724_v27 = vsub.f32 0.0, %v1712_v60  ;;  %v1899_v19 = vrot.slane %v4781_v0, %v5786_v10  ;;  %v1903_v24 = vrot.slane %v4783_v30, %v5786_v10  ;;  %v4970_v44 = vrot.slane %v4785_v25, %v5786_v10 }
 0x1ac   :  { %5783 = vst [vmem:[#allocation53_spill] sm:$0xff] %v4956_v36  ;;  %5785 = vst [vmem:[#allocation52_spill] sm:$0xff] %v4962_v11  ;;  %v1725_v59 = vsub.f32 0.0, %v1713_v22  ;;  %v1744_v60 = vmul.f32 1.442695, %v1723_v1  ;;  %v1805_v11 = vmul.f32 %v4797_v7, %v4815_v18  ;;  %v1836_v22 = vmul.f32 %v4801_v4, %v4846_v6 }
 0x1ad   :  { %v2804_v51 = vpop.eup %2803  ;;  %v1746_v36 = vmul.f32 1.442695, %v1724_v27  ;;  %v1838_v7 = vmul.f32 %v4813_v14, %v4846_v6  ;;  %v1839_v27 = vmul.f32 %v4823_v35, %v4846_v6 }
 0x1ae   :  { %v2806_v2 = vpop.eup %2805  ;;  %v1754_v47 = vadd.f32 1.0, %v2804_v51  ;;  %v4959_v51 = vmul.f32 %v4929_v13, %v2054_v9 }
 0x1af   :  { %v2808_v5 = vpop.eup %2807  ;;  %v1755_v61 = vadd.f32 1.0, %v2806_v2 }
 0x1b0   :  { %v1850_v20 = vpop.permute.xlu1 %1849  ;;  %v2810_v12 = vpop.eup %2809  ;;  %v1756_v48 = vadd.f32 1.0, %v2808_v5  ;;  %5784 = vst [vmem:[#allocation57_spill] sm:$0xff] %v4959_v51  ;;  %2811 = vrcp.f32 %v1754_v47  ;;  %v1742_v5 = vmul.f32 1.442695, %v1722_v43  ;;  %v4974_v51 = vrot.slane %v4787_v15, %v5786_v10 }
 0x1b1   :  { %v1757_v2 = vadd.f32 1.0, %v2810_v12  ;;  %2813 = vrcp.f32 %v1755_v61  ;;  %v1804_v47 = vmul.f32 %v4793_v41, %v4815_v18  ;;  %v1837_v43 = vmul.f32 %v4809_v58, %v4846_v6 }
 0x1b2   :  { %2815 = vrcp.f32 %v1756_v48  ;;  %v1872_v61 = vmul.f32 %v4836_v26, %v1850_v20  ;;  %v1873_v10 = vmul.f32 %v4840_v56, %v1850_v20  ;;  %v1874_v1 = vmul.f32 %v4844_v31, %v1850_v20 }
 0x1b3   :  { %2817 = vrcp.f32 %v1757_v2  ;;  %v1875_v48 = vmul.f32 %v4853_v38, %v1850_v20  ;;  %v1748_v41 = vmul.f32 1.442695, %v1725_v59  ;;  %v1806_v56 = vmul.f32 %v4805_v16, %v4815_v18 }
 0x1b4   :  { %2819 = vpow2.f32 %v1742_v5  ;;  %v1807_v31 = vmul.f32 %v4819_v29, %v4815_v18  ;;  %v1844_v38 = vadd.f32 %v1836_v22, %v1804_v47  ;;  %v1845_v20 = vadd.f32 %v1837_v43, %v1805_v11 }
 0x1b5   :  { %v1890_v42 = vpop.permute.xlu1 %1889  ;;  %v1880_v14 = vadd.f32 %v1872_v61, %v4863_v50  ;;  %v1881_v59 = vadd.f32 %v1873_v10, %v4865_v53  ;;  %v1882_v35 = vadd.f32 %v1874_v1, %v4867_v57  ;;  %v1883_v6 = vadd.f32 %v1875_v48, %v4886_v28  ;;  %v5787_v53 = vld [vmem:[#allocation27_spill] sm:$0xff] }
 0x1b6   :  { %v1912_v4 = vmul.f32 %v1899_v19, %v1890_v42  ;;  %v1913_v2 = vmul.f32 %v1903_v24, %v1890_v42  ;;  %v1914_v58 = vmul.f32 %v4970_v44, %v1890_v42  ;;  %v1915_v26 = vmul.f32 %v4974_v51, %v1890_v42 }
 0x1b7   :  { %v5005_v5 = vmul.f32 %v4953_v55, %v2054_v9  ;;  %2821 = vpow2.f32 %v1744_v60  ;;  %v1846_v42 = vadd.f32 %v1838_v7, %v1806_v56  ;;  %v1847_v13 = vadd.f32 %v1839_v27, %v1807_v31 }
 0x1b8   :  { %v1920_v63 = vadd.f32 %v1912_v4, %v1880_v14  ;;  %v1921_v18 = vadd.f32 %v1913_v2, %v1881_v59  ;;  %v1922_v29 = vadd.f32 %v1914_v58, %v1882_v35  ;;  %v1923_v11 = vadd.f32 %v1915_v26, %v1883_v6  ;;  %v5789_v2 = vld [vmem:[#allocation51_spill] sm:$0xff]  ;;  %v5790_v6 = vld [vmem:[#allocation18_spill] sm:$0xff] }
 0x1b9   :  { %v4976_v12 = vpop.permute.xlu1 %1893  ;;  %2823 = vpow2.f32 %v1746_v36  ;;  %v5013_v57 = vrot.slane %v4781_v0, %v5787_v53  ;;  %v5017_v28 = vrot.slane %v4783_v30, %v5787_v53  ;;  %v5021_v9 = vrot.slane %v4785_v25, %v5787_v53 }
 0x1ba   :  { %v5007_v16 = vpop.eup %2811  ;;  %2825 = vpow2.f32 %v1748_v41  ;;  %v1884_v60 = vadd.f32 %v4874_v34, %v1844_v38  ;;  %v1885_v36 = vadd.f32 %v4877_v62, %v1845_v20  ;;  %v5029_v22 = vrot.slane %v4787_v15, %v5787_v53 }
 0x1bb   :  { %v5009_v47 = vpop.eup %2813  ;;  %v1886_v30 = vadd.f32 %v4880_v46, %v1846_v42  ;;  %v1887_v43 = vadd.f32 %v4901_v3, %v1847_v13  ;;  %v1916_v25 = vmul.f32 %v1899_v19, %v4976_v12  ;;  %v1917_v61 = vmul.f32 %v1903_v24, %v4976_v12 }
 0x1bc   :  { %v5023_v10 = vpop.eup %2815  ;;  %v1960_v1 = vadd.f32 %v4904_v39, %v1920_v63  ;;  %v1961_v34 = vadd.f32 %v4913_v45, %v1921_v18  ;;  %v1962_v62 = vadd.f32 %v4916_v21, %v1922_v29  ;;  %v1963_v48 = vadd.f32 %v4925_v37, %v1923_v11  ;;  %v5791_v18 = vld [vmem:[#allocation20_spill] sm:$0xff] }
 0x1bd   :  { %v5031_v0 = vpop.eup %2817  ;;  %v5045_v41 = vrot.slane %v5007_v16, %v5770_v52  ;;  %v5049_v46 = vrot.slane %v5009_v47, %v5770_v52  ;;  %v1918_v3 = vmul.f32 %v4970_v44, %v4976_v12  ;;  %v1919_v39 = vmul.f32 %v4974_v51, %v4976_v12  ;;  %v2090_v51 = vpop.permute.xlu0 %2089  ;;  %v5788_v12 = vld [vmem:[#allocation10_spill] sm:$0xff] }
 0x1be   :  { %v5041_v15 = vpop.eup %2819  ;;  %v5057_v45 = vrot.slane %v5023_v10, %v5770_v52  ;;  %v5061_v21 = vrot.slane %v5031_v0, %v5770_v52  ;;  %v1924_v19 = vadd.f32 %v1916_v25, %v1884_v60  ;;  %v1925_v24 = vadd.f32 %v1917_v61, %v1885_v36  ;;  %v5792_v60 = vld [vmem:[#allocation22_spill] sm:$0xff] }
 0x1bf   :  { %v5069_v27 = vrot.slane %v5007_v16, %v5788_v12  ;;  %v5073_v4 = vrot.slane %v5009_v47, %v5788_v12  ;;  %v5080_v26 = vmul.f32 %v5045_v41, %v2090_v51 }
 0x1c0   :  { %v1934_v8 = vpop.permute.xlu1 %1933  ;;  %v5086_v56 = vmul.f32 %v5057_v45, %v2090_v51  ;;  %v5089_v31 = vmul.f32 %v5061_v21, %v2090_v51 }
 0x1c1   :  { %v1956_v63 = vmul.f32 %v4857_v17, %v1934_v8  ;;  %v1957_v37 = vmul.f32 %v4861_v49, %v1934_v8  ;;  %v1958_v44 = vmul.f32 %v4871_v32, %v1934_v8  ;;  %v1959_v7 = vmul.f32 %v4884_v23, %v1934_v8  ;;  %v5077_v58 = vpop.eup %2821 }
 0x1c2   :  { %v2000_v17 = vadd.f32 %v4938_v33, %v1960_v1  ;;  %v2001_v49 = vadd.f32 %v5789_v2, %v1961_v34  ;;  %v5083_v32 = vmul.f32 %v5049_v46, %v2090_v51  ;;  %v1926_v23 = vadd.f32 %v1918_v3, %v1886_v30 }
 0x1c3   :  { %v1927_v8 = vadd.f32 %v1919_v39, %v1887_v43  ;;  %v1964_v38 = vadd.f32 %v1956_v63, %v1924_v19  ;;  %v1965_v33 = vadd.f32 %v1957_v37, %v1925_v24  ;;  %v5091_v14 = vpop.eup %2823  ;;  %v2002_v37 = vadd.f32 %v4944_v54, %v1962_v62  ;;  %v5793_v19 = vld [vmem:[#allocation44_spill] sm:$0xff]  ;;  %v5795_v54 = vld [vmem:[#allocation49_spill] sm:$0xff] }
 0x1c4   :  { %v1966_v59 = vadd.f32 %v1958_v44, %v1926_v23  ;;  %v5095_v11 = vpop.eup %2825  ;;  %v2003_v24 = vadd.f32 %v5793_v19, %v1963_v48 }
 0x1c5   :  { %v1974_v50 = vpop.permute.xlu1 %1973  ;;  %v1967_v35 = vadd.f32 %v1959_v7, %v1927_v8 }
 0x1c6   :  { %v1996_v42 = vmul.f32 %v5790_v6, %v1974_v50  ;;  %v1997_v29 = vmul.f32 %v5791_v18, %v1974_v50  ;;  %v1998_v36 = vmul.f32 %v5792_v60, %v1974_v50  ;;  %v1999_v30 = vmul.f32 %v4908_v40, %v1974_v50  ;;  %v5797_v60 = vld [vmem:[#allocation53_spill] sm:$0xff] }
 0x1c8   :  { %v2004_v61 = vadd.f32 %v1996_v42, %v1964_v38  ;;  %v2005_v1 = vadd.f32 %v1997_v29, %v1965_v33  ;;  %v2006_v39 = vadd.f32 %v1998_v36, %v1966_v59  ;;  %v2007_v63 = vadd.f32 %v1999_v30, %v1967_v35  ;;  %v5794_v59 = vld [vmem:[#allocation24_spill] sm:$0xff]  ;;  %v5796_v42 = vld [vmem:[#allocation50_spill] sm:$0xff]  ;;  %v5798_v30 = vld [vmem:[#allocation57_spill] sm:$0xff] }
 0x1cb   :  { %v2014_v13 = vpop.permute.xlu1 %2013 }
 0x1cc   :  { %v2036_v43 = vmul.f32 %v5013_v57, %v2014_v13  ;;  %v2037_v25 = vmul.f32 %v5017_v28, %v2014_v13  ;;  %v2038_v34 = vmul.f32 %v5021_v9, %v2014_v13  ;;  %v2039_v3 = vmul.f32 %v5029_v22, %v2014_v13 }
 0x1ce   :  { %v2044_v44 = vadd.f32 %v2036_v43, %v2004_v61  ;;  %v2045_v7 = vadd.f32 %v2037_v25, %v2005_v1  ;;  %v2046_v2 = vadd.f32 %v2038_v34, %v2006_v39  ;;  %v2047_v23 = vadd.f32 %v2039_v3, %v2007_v63  ;;  %v5800_v3 = vld [vmem:[#allocation8_spill] sm:$0xff] }
 0x1cf   :  { %v2010_v20 = vpop.permute.xlu1 %2009  ;;  %v2139_v39 = vrot.slane %v5007_v16, %v5800_v3  ;;  %v2143_v63 = vrot.slane %v5009_v47, %v5800_v3 }
 0x1d0   :  { %v2032_v40 = vmul.f32 %v5013_v57, %v2010_v20  ;;  %v2033_v50 = vmul.f32 %v5017_v28, %v2010_v20  ;;  %v2034_v8 = vmul.f32 %v5021_v9, %v2010_v20  ;;  %v2035_v38 = vmul.f32 %v5029_v22, %v2010_v20 }
 0x1d1   :  { %v2084_v36 = vadd.f32 %v5797_v60, %v2044_v44  ;;  %v2085_v9 = vadd.f32 %v5798_v30, %v2045_v7  ;;  %v2087_v25 = vadd.f32 %v5005_v5, %v2047_v23  ;;  %v2151_v5 = vrot.slane %v5031_v0, %v5800_v3 }
 0x1d2   :  { %v2040_v13 = vadd.f32 %v2032_v40, %v2000_v17  ;;  %v2041_v33 = vadd.f32 %v2033_v50, %v2001_v49  ;;  %v2042_v48 = vadd.f32 %v2034_v8, %v2002_v37  ;;  %v2043_v6 = vadd.f32 %v2035_v38, %v2003_v24  ;;  %v5799_v49 = vld [vmem:[#allocation52_spill] sm:$0xff]  ;;  %v2174_v8 = vpop.permute.xlu0 %2173 }
 0x1d3   :  { %v2086_v20 = vadd.f32 %v5799_v49, %v2046_v2  ;;  %v2147_v37 = vrot.slane %v5023_v10, %v5800_v3  ;;  %v1758_v40 = vadd.f32 1.0, %v5041_v15  ;;  %v1759_v50 = vadd.f32 1.0, %v5077_v58 }
 0x1d4   :  { %v2191_v2 = vrot.slane %v5031_v0, %v5788_v12 }
 0x1d5   :  { %v2050_v51 = vpop.permute.xlu1 %2049  ;;  %2827 = vrcp.f32 %v1758_v40 }
 0x1d6   :  { %v2072_v35 = vmul.f32 %v5794_v59, %v2050_v51  ;;  %v2073_v62 = vmul.f32 %v5795_v54, %v2050_v51  ;;  %v2074_v18 = vmul.f32 %v5796_v42, %v2050_v51  ;;  %v2075_v57 = vmul.f32 %v4953_v55, %v2050_v51 }
 0x1d7   :  { %v2187_v51 = vrot.slane %v5023_v10, %v5788_v12  ;;  %2829 = vrcp.f32 %v1759_v50 }
 0x1d8   :  { %v2080_v28 = vadd.f32 %v2072_v35, %v2040_v13  ;;  %v2081_v29 = vadd.f32 %v2073_v62, %v2041_v33  ;;  %v2082_v43 = vadd.f32 %v2074_v18, %v2042_v48  ;;  %v2083_v22 = vadd.f32 %v2075_v57, %v2043_v6  ;;  %v5801_v33 = vld [vmem:[#allocation11_spill] sm:$0xff] }
 0x1d9   :  { %v2219_v15 = vrot.slane %v5007_v16, %v5801_v33  ;;  %v2223_v58 = vrot.slane %v5009_v47, %v5801_v33  ;;  %v2198_v62 = vmul.f32 %v2187_v51, %v2174_v8  ;;  %v2199_v48 = vmul.f32 %v2191_v2, %v2174_v8 }
 0x1da   :  { %v2094_v17 = vpop.permute.xlu1 %2093  ;;  %v2122_v44 = vadd.f32 %v5086_v56, %v2082_v43  ;;  %v2123_v7 = vadd.f32 %v5089_v31, %v2083_v22  ;;  %v2196_v56 = vmul.f32 %v5069_v27, %v2174_v8  ;;  %v2197_v31 = vmul.f32 %v5073_v4, %v2174_v8  ;;  %v5802_v8 = vld [vmem:[#allocation13_spill] sm:$0xff] }
 0x1db   :  { %v2116_v61 = vmul.f32 %v5045_v41, %v2094_v17  ;;  %v2117_v1 = vmul.f32 %v5049_v46, %v2094_v17  ;;  %v2118_v34 = vmul.f32 %v5057_v45, %v2094_v17  ;;  %v2119_v55 = vmul.f32 %v5061_v21, %v2094_v17 }
 0x1dc   :  { %v2120_v45 = vadd.f32 %v5080_v26, %v2080_v28  ;;  %v2121_v21 = vadd.f32 %v5083_v32, %v2081_v29  ;;  %v2227_v6 = vrot.slane %v5023_v10, %v5801_v33  ;;  %v2231_v42 = vrot.slane %v5031_v0, %v5801_v33 }
 0x1dd   :  { %v2124_v19 = vadd.f32 %v2116_v61, %v2084_v36  ;;  %v2125_v41 = vadd.f32 %v2117_v1, %v2085_v9  ;;  %v2126_v24 = vadd.f32 %v2118_v34, %v2086_v20  ;;  %v2127_v46 = vadd.f32 %v2119_v55, %v2087_v25  ;;  %v2210_v1 = vpop.permute.xlu0 %2209 }
 0x1de   :  { %v1760_v25 = vadd.f32 1.0, %v5091_v14 }
 0x1df   :  { %v2134_v23 = vpop.permute.xlu1 %2133 }
 0x1e0   :  { %v2156_v38 = vmul.f32 %v2139_v39, %v2134_v23  ;;  %v2157_v26 = vmul.f32 %v2143_v63, %v2134_v23  ;;  %v2158_v13 = vmul.f32 %v2147_v37, %v2134_v23  ;;  %v2159_v32 = vmul.f32 %v2151_v5, %v2134_v23 }
 0x1e1   :  { %2831 = vrcp.f32 %v1760_v25  ;;  %v2343_v25 = vrot.slane %v5009_v47, %v5787_v53 }
 0x1e2   :  { %v2164_v59 = vadd.f32 %v2156_v38, %v2124_v19  ;;  %v2165_v35 = vadd.f32 %v2157_v26, %v2125_v41  ;;  %v2166_v54 = vadd.f32 %v2158_v13, %v2126_v24  ;;  %v2167_v12 = vadd.f32 %v2159_v32, %v2127_v46 }
 0x1e3   :  { %v2130_v18 = vpop.permute.xlu1 %2129  ;;  %v2234_v19 = vmul.f32 %v2227_v6, %v2210_v1  ;;  %v2235_v41 = vmul.f32 %v2231_v42, %v2210_v1  ;;  %v2299_v38 = vrot.slane %v5007_v16, %v5802_v8  ;;  %v2303_v26 = vrot.slane %v5009_v47, %v5802_v8 }
 0x1e4   :  { %v2152_v57 = vmul.f32 %v2139_v39, %v2130_v18  ;;  %v2153_v28 = vmul.f32 %v2143_v63, %v2130_v18  ;;  %v2154_v29 = vmul.f32 %v2147_v37, %v2130_v18  ;;  %v2155_v60 = vmul.f32 %v2151_v5, %v2130_v18 }
 0x1e5   :  { %v2204_v36 = vadd.f32 %v2196_v56, %v2164_v59  ;;  %v2205_v30 = vadd.f32 %v2197_v31, %v2165_v35  ;;  %v2206_v9 = vadd.f32 %v2198_v62, %v2166_v54  ;;  %v2207_v43 = vadd.f32 %v2199_v48, %v2167_v12 }
 0x1e6   :  { %v2160_v22 = vadd.f32 %v2152_v57, %v2120_v45  ;;  %v2161_v17 = vadd.f32 %v2153_v28, %v2121_v21  ;;  %v2162_v49 = vadd.f32 %v2154_v29, %v2122_v44  ;;  %v2163_v20 = vadd.f32 %v2155_v60, %v2123_v7 }
 0x1e7   :  { %v2232_v37 = vmul.f32 %v2219_v15, %v2210_v1  ;;  %v2233_v5 = vmul.f32 %v2223_v58, %v2210_v1  ;;  %v1761_v44 = vadd.f32 1.0, %v5095_v11  ;;  %v2307_v13 = vrot.slane %v5023_v10, %v5802_v8 }
 0x1e8   :  { %v2170_v61 = vpop.permute.xlu1 %2169  ;;  %v2311_v11 = vrot.slane %v5031_v0, %v5802_v8  ;;  %v2351_v1 = vrot.slane %v5031_v0, %v5787_v53 }
 0x1e9   :  { %v2192_v34 = vmul.f32 %v5069_v27, %v2170_v61  ;;  %v2193_v55 = vmul.f32 %v5073_v4, %v2170_v61  ;;  %v2194_v39 = vmul.f32 %v2187_v51, %v2170_v61  ;;  %v2195_v63 = vmul.f32 %v2191_v2, %v2170_v61 }
 0x1ea   :  { %2833 = vrcp.f32 %v1761_v44  ;;  %v2347_v61 = vrot.slane %v5023_v10, %v5787_v53 }
 0x1eb   :  { %v2200_v24 = vadd.f32 %v2192_v34, %v2160_v22  ;;  %v2201_v46 = vadd.f32 %v2193_v55, %v2161_v17  ;;  %v2202_v45 = vadd.f32 %v2194_v39, %v2162_v49  ;;  %v2203_v21 = vadd.f32 %v2195_v63, %v2163_v20 }
 0x1ec   :  { %v2339_v20 = vrot.slane %v5007_v16, %v5787_v53 }
 0x1ed   :  { %v2214_v14 = vpop.permute.xlu1 %2213  ;;  %v2240_v7 = vadd.f32 %v2232_v37, %v2200_v24  ;;  %v2241_v40 = vadd.f32 %v2233_v5, %v2201_v46  ;;  %v2242_v50 = vadd.f32 %v2234_v19, %v2202_v45  ;;  %v2243_v27 = vadd.f32 %v2235_v41, %v2203_v21 }
 0x1ee   :  { %v2236_v23 = vmul.f32 %v2219_v15, %v2214_v14  ;;  %v2237_v4 = vmul.f32 %v2223_v58, %v2214_v14  ;;  %v2238_v51 = vmul.f32 %v2227_v6, %v2214_v14  ;;  %v2239_v2 = vmul.f32 %v2231_v42, %v2214_v14  ;;  %v5161_v15 = vpop.eup %2827  ;;  %v5803_v58 = vld [vmem:[#allocation12_spill] sm:$0xff]  ;;  %v2294_v6 = vpop.permute.xlu0 %2293 }
 0x1ef   :  { %v2259_v59 = vrot.slane %v5007_v16, %v5803_v58  ;;  %v2263_v35 = vrot.slane %v5009_v47, %v5803_v58  ;;  %v2267_v54 = vrot.slane %v5023_v10, %v5803_v58  ;;  %v2271_v12 = vrot.slane %v5031_v0, %v5803_v58  ;;  %v5171_v62 = vpop.eup %2829 }
 0x1f0   :  { %v2244_v32 = vadd.f32 %v2236_v23, %v2204_v36  ;;  %v2245_v56 = vadd.f32 %v2237_v4, %v2205_v30  ;;  %v2246_v31 = vadd.f32 %v2238_v51, %v2206_v9  ;;  %v2247_v33 = vadd.f32 %v2239_v2, %v2207_v43  ;;  %v5173_v49 = vpop.eup %2831 }
 0x1f1   :  { %v2316_v29 = vmul.f32 %v2299_v38, %v2294_v6  ;;  %v2317_v60 = vmul.f32 %v2303_v26, %v2294_v6  ;;  %v2318_v36 = vmul.f32 %v2307_v13, %v2294_v6  ;;  %v2319_v30 = vmul.f32 %v2311_v11, %v2294_v6 }
 0x1f2   :  { %v2254_v48 = vpop.permute.xlu1 %2253  ;;  %v2330_v4 = vpop.permute.xlu0 %2329 }
 0x1f3   :  { %v2276_v42 = vmul.f32 %v2259_v59, %v2254_v48  ;;  %v2277_v18 = vmul.f32 %v2263_v35, %v2254_v48  ;;  %v2278_v57 = vmul.f32 %v2267_v54, %v2254_v48  ;;  %v2279_v28 = vmul.f32 %v2271_v12, %v2254_v48 }
 0x1f4   :  { %v2834_v23 = vpop.eup %2833 }
 0x1f5   :  { %v2284_v9 = vadd.f32 %v2276_v42, %v2244_v32  ;;  %v2285_v43 = vadd.f32 %v2277_v18, %v2245_v56  ;;  %v2286_v22 = vadd.f32 %v2278_v57, %v2246_v31  ;;  %v2287_v17 = vadd.f32 %v2279_v28, %v2247_v33 }
 0x1f6   :  { %v2250_v34 = vpop.permute.xlu1 %2249  ;;  %v2352_v32 = vmul.f32 %v2339_v20, %v2330_v4  ;;  %v2353_v56 = vmul.f32 %v2343_v25, %v2330_v4  ;;  %v2354_v31 = vmul.f32 %v2347_v61, %v2330_v4  ;;  %v2355_v33 = vmul.f32 %v2351_v1, %v2330_v4 }
 0x1f7   :  { %v2272_v55 = vmul.f32 %v2259_v59, %v2250_v34  ;;  %v2273_v39 = vmul.f32 %v2263_v35, %v2250_v34  ;;  %v2274_v63 = vmul.f32 %v2267_v54, %v2250_v34  ;;  %v2275_v37 = vmul.f32 %v2271_v12, %v2250_v34 }
 0x1f8   :  { %v2324_v5 = vadd.f32 %v2316_v29, %v2284_v9  ;;  %v2325_v19 = vadd.f32 %v2317_v60, %v2285_v43  ;;  %v2326_v41 = vadd.f32 %v2318_v36, %v2286_v22  ;;  %v2327_v24 = vadd.f32 %v2319_v30, %v2287_v17  ;;  %v5804_v29 = vld [vmem:[#allocation35_spill] sm:$0xff] }
 0x1f9   :  { %v2280_v46 = vadd.f32 %v2272_v55, %v2240_v7  ;;  %v2281_v45 = vadd.f32 %v2273_v39, %v2241_v40  ;;  %v2282_v21 = vadd.f32 %v2274_v63, %v2242_v50  ;;  %v2283_v44 = vadd.f32 %v2275_v37, %v2243_v27 }
 0x1fa   :  { %v2379_v60 = vrot.slane %v5007_v16, %v5804_v29  ;;  %v2383_v36 = vrot.slane %v5009_v47, %v5804_v29  ;;  %v2387_v30 = vrot.slane %v5023_v10, %v5804_v29  ;;  %v2391_v9 = vrot.slane %v5031_v0, %v5804_v29 }
 0x1fb   :  { %v2290_v14 = vpop.permute.xlu1 %2289  ;;  %v2427_v43 = vrot.slane %v5173_v49, %v5770_v52  ;;  %v2431_v22 = vrot.slane %v2834_v23, %v5770_v52  ;;  %v2459_v47 = vrot.slane %v5161_v15, %v5800_v3  ;;  %v2463_v10 = vrot.slane %v5171_v62, %v5800_v3 }
 0x1fc   :  { %v2312_v51 = vmul.f32 %v2299_v38, %v2290_v14  ;;  %v2313_v2 = vmul.f32 %v2303_v26, %v2290_v14  ;;  %v2314_v8 = vmul.f32 %v2307_v13, %v2290_v14  ;;  %v2315_v53 = vmul.f32 %v2311_v11, %v2290_v14 }
 0x1fd   :  { %v2419_v26 = vrot.slane %v5161_v15, %v5770_v52  ;;  %v2423_v13 = vrot.slane %v5171_v62, %v5770_v52 }
 0x1fe   :  { %v2320_v58 = vadd.f32 %v2312_v51, %v2280_v46  ;;  %v2321_v59 = vadd.f32 %v2313_v2, %v2281_v45  ;;  %v2322_v35 = vadd.f32 %v2314_v8, %v2282_v21  ;;  %v2323_v54 = vadd.f32 %v2315_v53, %v2283_v44 }
 0x200   :  { %v2334_v12 = vpop.permute.xlu1 %2333  ;;  %v2360_v7 = vadd.f32 %v2352_v32, %v2320_v58  ;;  %v2361_v40 = vadd.f32 %v2353_v56, %v2321_v59  ;;  %v2362_v50 = vadd.f32 %v2354_v31, %v2322_v35  ;;  %v2363_v27 = vadd.f32 %v2355_v33, %v2323_v54 }
 0x201   :  { %v2356_v48 = vmul.f32 %v2339_v20, %v2334_v12  ;;  %v2357_v6 = vmul.f32 %v2343_v25, %v2334_v12  ;;  %v2358_v42 = vmul.f32 %v2347_v61, %v2334_v12  ;;  %v2359_v38 = vmul.f32 %v2351_v1, %v2334_v12  ;;  %v2414_v20 = vpop.permute.xlu0 %2413 }
 0x202   :  { %v2436_v34 = vmul.f32 %v2419_v26, %v2414_v20  ;;  %v2437_v55 = vmul.f32 %v2423_v13, %v2414_v20 }
 0x203   :  { %v2364_v11 = vadd.f32 %v2356_v48, %v2324_v5  ;;  %v2365_v18 = vadd.f32 %v2357_v6, %v2325_v19  ;;  %v2366_v57 = vadd.f32 %v2358_v42, %v2326_v41  ;;  %v2367_v28 = vadd.f32 %v2359_v38, %v2327_v24 }
 0x204   :  { %v2438_v5 = vmul.f32 %v2427_v43, %v2414_v20  ;;  %v2439_v19 = vmul.f32 %v2431_v22, %v2414_v20  ;;  %v2467_v41 = vrot.slane %v5173_v49, %v5800_v3  ;;  %v2471_v24 = vrot.slane %v2834_v23, %v5800_v3 }
 0x205   :  { %v2374_v17 = vpop.permute.xlu1 %2373  ;;  %v2450_v56 = vpop.permute.xlu0 %2449 }
 0x206   :  { %v2396_v25 = vmul.f32 %v2379_v60, %v2374_v17  ;;  %v2397_v61 = vmul.f32 %v2383_v36, %v2374_v17  ;;  %v2398_v1 = vmul.f32 %v2387_v30, %v2374_v17  ;;  %v2399_v16 = vmul.f32 %v2391_v9, %v2374_v17 }
 0x207   :  { %v2472_v3 = vmul.f32 %v2459_v47, %v2450_v56  ;;  %v2473_v23 = vmul.f32 %v2463_v10, %v2450_v56  ;;  %v2474_v35 = vmul.f32 %v2467_v41, %v2450_v56  ;;  %v2475_v54 = vmul.f32 %v2471_v24, %v2450_v56 }
 0x208   :  { %v2404_v0 = vadd.f32 %v2396_v25, %v2364_v11  ;;  %v2405_v39 = vadd.f32 %v2397_v61, %v2365_v18  ;;  %v2406_v63 = vadd.f32 %v2398_v1, %v2366_v57  ;;  %v2407_v37 = vadd.f32 %v2399_v16, %v2367_v28 }
 0x209   :  { %v2370_v46 = vpop.permute.xlu1 %2369  ;;  %v2522_v1 = vpop.permute.xlu0 %2521 }
 0x20a   :  { %v2392_v45 = vmul.f32 %v2379_v60, %v2370_v46  ;;  %v2393_v21 = vmul.f32 %v2383_v36, %v2370_v46  ;;  %v2394_v44 = vmul.f32 %v2387_v30, %v2370_v46  ;;  %v2395_v14 = vmul.f32 %v2391_v9, %v2370_v46 }
 0x20b   :  { %v2444_v15 = vadd.f32 %v2436_v34, %v2404_v0  ;;  %v2445_v4 = vadd.f32 %v2437_v55, %v2405_v39  ;;  %v2446_v51 = vadd.f32 %v2438_v5, %v2406_v63  ;;  %v2447_v62 = vadd.f32 %v2439_v19, %v2407_v37 }
 0x20c   :  { %v2400_v2 = vadd.f32 %v2392_v45, %v2360_v7  ;;  %v2401_v8 = vadd.f32 %v2393_v21, %v2361_v40  ;;  %v2402_v53 = vadd.f32 %v2394_v44, %v2362_v50  ;;  %v2403_v32 = vadd.f32 %v2395_v14, %v2363_v27 }
 0x20e   :  { %v2410_v31 = vpop.permute.xlu1 %2409 }
 0x20f   :  { %v2432_v33 = vmul.f32 %v2419_v26, %v2410_v31  ;;  %v2433_v58 = vmul.f32 %v2423_v13, %v2410_v31  ;;  %v2434_v49 = vmul.f32 %v2427_v43, %v2410_v31  ;;  %v2435_v59 = vmul.f32 %v2431_v22, %v2410_v31 }
 0x211   :  { %v2440_v12 = vadd.f32 %v2432_v33, %v2400_v2  ;;  %v2441_v48 = vadd.f32 %v2433_v58, %v2401_v8  ;;  %v2442_v6 = vadd.f32 %v2434_v49, %v2402_v53  ;;  %v2443_v42 = vadd.f32 %v2435_v59, %v2403_v32 }
 0x213   :  { %v2454_v38 = vpop.permute.xlu1 %2453  ;;  %v2480_v11 = vadd.f32 %v2472_v3, %v2440_v12  ;;  %v2481_v7 = vadd.f32 %v2473_v23, %v2441_v48  ;;  %v2482_v40 = vadd.f32 %v2474_v35, %v2442_v6  ;;  %v2483_v50 = vadd.f32 %v2475_v54, %v2443_v42 }
 0x214   :  { %v2476_v27 = vmul.f32 %v2459_v47, %v2454_v38  ;;  %v2477_v18 = vmul.f32 %v2463_v10, %v2454_v38  ;;  %v2478_v57 = vmul.f32 %v2467_v41, %v2454_v38  ;;  %v2479_v26 = vmul.f32 %v2471_v24, %v2454_v38 }
 0x215   :  { %v2887_v35 = vmov 1966171168  }
 0x216   :  { %v2484_v13 = vadd.f32 %v2476_v27, %v2444_v15  ;;  %v2485_v28 = vadd.f32 %v2477_v18, %v2445_v4  ;;  %v2486_v29 = vadd.f32 %v2478_v57, %v2446_v51  ;;  %v2487_v60 = vadd.f32 %v2479_v26, %v2447_v62 }
 0x217   :  { %v2585_v54 = vunpack.c.l.s4 %v2887_v35 }
 0x218   :  { %v2496_v36 = vpop.permute.xlu1 %2495 }
 0x219   :  { %v2502_v30 = vadd.f32 %v2496_v36, %v2484_v13  ;;  %v2503_v9 = vadd.f32 %v2496_v36, %v2485_v28  ;;  %v2504_v43 = vadd.f32 %v2496_v36, %v2486_v29  ;;  %v2505_v22 = vadd.f32 %v2496_v36, %v2487_v60 }
 0x21a   :  { %v2586_v27 = vunpack.c.0.s8 %v2585_v54 }
 0x21b   :  { %v2510_v17 = vmax.f32 %v2502_v30, 0.0  ;;  %v2511_v20 = vmax.f32 %v2503_v9, 0.0  ;;  %v2512_v25 = vmax.f32 %v2504_v43, 0.0  ;;  %v2513_v61 = vmax.f32 %v2505_v22, 0.0  ;;  %v5805_v9 = vld [vmem:[#allocation6_spill] sm:$0xff] }
 0x21c   :  { %v2491_v16 = vpop.permute.xlu1 %2490  ;;  %v2589_v43 = vsub.s32 %v2586_v27, %v5805_v9 }
 0x21d   :  { %v2498_v34 = vadd.f32 %v2491_v16, %v2480_v11  ;;  %v2499_v55 = vadd.f32 %v2491_v16, %v2481_v7  ;;  %v2500_v47 = vadd.f32 %v2491_v16, %v2482_v40  ;;  %v2501_v10 = vadd.f32 %v2491_v16, %v2483_v50 }
 0x21e   :  { %v2528_v0 = vmul.f32 %v2522_v1, %v2510_v17  ;;  %v2529_v39 = vmul.f32 %v2522_v1, %v2511_v20  ;;  %v2530_v63 = vmul.f32 %v2522_v1, %v2512_v25  ;;  %v2531_v37 = vmul.f32 %v2522_v1, %v2513_v61 }
 0x21f   :  { %v2506_v5 = vmax.f32 %v2498_v34, 0.0  ;;  %v2507_v19 = vmax.f32 %v2499_v55, 0.0  ;;  %v2508_v41 = vmax.f32 %v2500_v47, 0.0  ;;  %v2509_v24 = vmax.f32 %v2501_v10, 0.0 }
 0x220   :  { %v2517_v46 = vpop.permute.xlu1 %2516  ;;  %v2533_v15 = vsel %vm2532_vm0, %v2528_v0, 0.0  ;;  %v2541_v4 = vsel %vm2532_vm0, %v2529_v39, 0.0  ;;  %v2549_v51 = vsel %vm2532_vm0, %v2530_v63, 0.0  ;;  %v2557_v62 = vsel %vm2532_vm0, %v2531_v37, 0.0 }
 0x221   :  { %v2524_v45 = vmul.f32 %v2517_v46, %v2506_v5  ;;  %v2525_v21 = vmul.f32 %v2517_v46, %v2507_v19  ;;  %v2526_v44 = vmul.f32 %v2517_v46, %v2508_v41  ;;  %v2527_v14 = vmul.f32 %v2517_v46, %v2509_v24 }
 0x222   :  { %v5806_v47 = vlaneseq }
 0x223   :  { %v2534_v2 = vadd.f32 %v2533_v15, %v2524_v45  ;;  %v2542_v8 = vadd.f32 %v2541_v4, %v2525_v21  ;;  %v2550_v53 = vadd.f32 %v2549_v51, %v2526_v44  ;;  %v2558_v32 = vadd.f32 %v2557_v62, %v2527_v14 }
 0x224   :  { %v2568_v50 = vpop.permute.xlu1 %2567  ;;  %vm2609_vm1 = vcmp.lt.s32.totalorder %v5806_v47, 512 }
 0x225   :  { %v2535_v56 = vrot.slane %v2534_v2, 4  ;;  %v2543_v31 = vrot.slane %v2542_v8, 4  ;;  %v2551_v33 = vrot.slane %v2550_v53, 4  ;;  %v2559_v58 = vrot.slane %v2558_v32, 4 }
 0x226   :  { %v2573_v28 = vrot.slane %v2568_v50, %v5770_v52 }
 0x227   :  { %v2536_v49 = vadd.f32 %v2535_v56, %v2534_v2  ;;  %v2544_v59 = vadd.f32 %v2543_v31, %v2542_v8  ;;  %v2552_v3 = vadd.f32 %v2551_v33, %v2550_v53  ;;  %v2560_v23 = vadd.f32 %v2559_v58, %v2558_v32 }
 0x229   :  { %v2537_v12 = vrot.slane %v2536_v49, 2  ;;  %v2545_v48 = vrot.slane %v2544_v59, 2  ;;  %v2553_v6 = vrot.slane %v2552_v3, 2  ;;  %v2561_v42 = vrot.slane %v2560_v23, 2 }
 0x22b   :  { %v2538_v38 = vadd.f32 %v2537_v12, %v2536_v49  ;;  %v2546_v11 = vadd.f32 %v2545_v48, %v2544_v59  ;;  %v2554_v7 = vadd.f32 %v2553_v6, %v2552_v3  ;;  %v2562_v40 = vadd.f32 %v2561_v42, %v2560_v23 }
 0x22d   :  { %v2539_v18 = vrot.slane %v2538_v38, 1  ;;  %v2547_v57 = vrot.slane %v2546_v11, 1  ;;  %v2555_v26 = vrot.slane %v2554_v7, 1  ;;  %v2563_v13 = vrot.slane %v2562_v40, 1 }
 0x22f   :  { %v2540_v29 = vadd.f32 %v2539_v18, %v2538_v38  ;;  %v2548_v60 = vadd.f32 %v2547_v57, %v2546_v11  ;;  %v2556_v36 = vadd.f32 %v2555_v26, %v2554_v7  ;;  %v2564_v30 = vadd.f32 %v2563_v13, %v2562_v40 }
 0x231   :  { %v2574_v22 = vadd.f32 %v2573_v28, %v2540_v29  ;;  %v2575_v17 = vadd.f32 %v2573_v28, %v2548_v60  ;;  %v2576_v20 = vadd.f32 %v2573_v28, %v2556_v36  ;;  %v2577_v25 = vadd.f32 %v2573_v28, %v2564_v30 }
 0x233   :  { %v2582_v61 = vcombine.low %v2574_v22, %v2575_v17  ;;  %v2583_v1 = vcombine.low %v2576_v20, %v2577_v25 }
 0x235   :  { %v2590_v16 = vrot.slane %v2582_v61, %v2589_v43  ;;  %v2597_v34 = vrot.slane %v2583_v1, %v2589_v43 }
 0x237   :  { %v2598_v55 = vcombine.low %v2590_v16, %v2597_v34 }
 0x239   :  { %v2605_v52 = vrot.slane %v2598_v55, %v2589_v43 }
 0x23b   :  { %2611 = vst.msk [vmem:[#allocation3] sm:$0xf] %vm2609_vm1, %v2605_v52 }
 0x23c   :  { %2850 = shalt.err (!%p2847_p4)
}
 0x23d   :  { %s2851_s13 = scalar_lea.hbm %s5233_s9, 64 }
 0x23e   :  { %p2852_p5 = scmp.ne.s32.totalorder %s5233_s9, %s2851_s13  ;;  %p2855_p6 = scmp.lt.u32.totalorder %s2851_s13, %s5233_s9 }
 0x240   :  { %p2857_p7 = pnand %p2855_p6, %p2852_p5 }
 0x242   :  { %2860 = shalt.err (!%p2857_p7)
}
 0x243   :  { %2621 = dma.vmem_to_hbm [thread:$0]  %s2619_s10, 64, %s5233_s9, [#allocation4]  }
 0x244   :  { %2861 = dma.done.wait [#allocation4], 64  }
 0x245   :  { %2862 = vsyncadd [#allocation4], 4294967232 }
 0x246   :  { %2625 = vsyncpa [#allocation4], 1 }

</bundles_post_ra>
